<compile_context>
chip_gen: v6e
topology: v6e:2x2x1
jax: 0.10.0
libtpu: 0.0.40
codegen_flags: <defaults>
</compile_context>

<pallas_src>
import jax
import jax.numpy as jnp
from jax import lax
from jax.experimental import pallas as pl
from jax.experimental.pallas import tpu as pltpu


def _backbone_kernel(x_ref,
                     w1, g1, b1, w2, g2, b2, w3, g3, b3, w4, g4, b4,
                     out_ref):
    eps = 1e-5
    neg_slope = 0.2

    x = x_ref[...]                                      # (B, C, N)
    B, C, N = x.shape
    M = B * N

    # ---- get_graph_feature prologue: center per (batch, channel) + global scale
    xc = x - jnp.mean(x, axis=-1, keepdims=True)        # (B, C, N)
    xx0 = jnp.sum(xc * xc, axis=1, keepdims=True)       # (B, 1, N)
    gmax = jnp.max(jnp.max(xx0, axis=-1, keepdims=True), axis=0, keepdims=True)
    inv = 1.0 / jnp.sqrt(gmax)                          # torch: 1 / max(xx) ** 0.5
    xs = xc * inv                                       # scaled points (B, C, N)
    xsq = xs * xs
    sq = jnp.sum(xsq, axis=1, keepdims=True)            # (B, 1, N)  ||x_j||^2 rows

    ones_cn = jnp.ones((C, N), jnp.float32)
    dn = (((0,), (0,)), ((), ()))                       # contract channel dim of both

    sq_rows, fsq_rows, dist_rows = [], [], []
    for b in range(B):                                  # B tiny & static: unrolled
        xb = xs[b]                                      # (C, N)
        sqr = sq[b]                                     # (1, N)   sq_j along columns
        # column-broadcast of ||x_i||^2 via a tiny MXU matmul (avoids an XLU transpose)
        sqc = lax.dot_general(xsq[b], ones_cn, dn,
                              preferred_element_type=jnp.float32)      # (N, N) = sq_i
        inner2 = 2.0 * lax.dot_general(xb, xb, dn,
                                       preferred_element_type=jnp.float32)  # (N, N)
        d = (sqc + sqr) - inner2                        # pairwise sq. distance (symmetric)
        # dist_j = max_i d[i, j]  (== torch's max over dim=-1 by symmetry of d)
        dist = jnp.max(d, axis=0, keepdims=True)        # (1, N)
        # ||x||^2 of the furthest point (max-value tie-break on exact fp ties)
        fsq = jnp.max(jnp.where(d == dist, sqc, -jnp.inf),
                      axis=0, keepdims=True)            # (1, N)
        sq_rows.append(sqr)
        fsq_rows.append(fsq)
        dist_rows.append(dist)

    sq_all = jnp.concatenate(sq_rows, axis=-1)          # (1, M) lane-dense
    fsq_all = jnp.concatenate(fsq_rows, axis=-1)        # (1, M)
    dist_all = jnp.concatenate(dist_rows, axis=-1)      # (1, M)

    inv_m = 1.0 / M

    def bn_lrelu(z, g_ref, beta_ref):
        # training-mode BN: one-pass batch stats over the B*N samples, biased var
        s1 = jnp.sum(z, axis=1, keepdims=True)
        s2 = jnp.sum(z * z, axis=1, keepdims=True)
        mean = s1 * inv_m
        var = jnp.maximum(s2 * inv_m - mean * mean, 0.0)
        a = g_ref[...] * lax.rsqrt(var + eps)           # (C, 1)
        bias = beta_ref[...] - mean * a                 # (C, 1)
        y = z * a + bias
        return jnp.maximum(y, neg_slope * y)            # LeakyReLU(0.2)

    # layer 1 (3 -> 16): degenerate K=3 contraction -> pure VPU broadcast-FMAs
    w1v = w1[...]                                       # (16, 3): [sq, furthest, dist]
    z1 = (w1v[:, 0:1] * sq_all +
          w1v[:, 1:2] * fsq_all +
          w1v[:, 2:3] * dist_all)                       # (16, M)
    h = bn_lrelu(z1, g1, b1)
    # layers 2..4: channel-first 1x1 convs == MXU matmuls
    h = bn_lrelu(jnp.dot(w2[...], h, preferred_element_type=jnp.float32), g2, b2)  # (64, M)
    h = bn_lrelu(jnp.dot(w3[...], h, preferred_element_type=jnp.float32), g3, b3)  # (256, M)
    h = bn_lrelu(jnp.dot(w4[...], h, preferred_element_type=jnp.float32), g4, b4)  # (E, M)

    # output already channel-first; per-batch slabs are 128-lane aligned
    for b in range(B):
        out_ref[b] = h[:, b * N:(b + 1) * N]            # (emb, N)


def backbone_forward(x, params, emb_dims=128):
    # x: (B, num_dims, N) float32 — same layout as the PyTorch module input
    B, _, N = x.shape
    args = [x] + list(params)
    return pl.pallas_call(
        _backbone_kernel,
        out_shape=jax.ShapeDtypeStruct((B, emb_dims, N), jnp.float32),
        in_specs=[pl.BlockSpec(memory_space=pltpu.MemorySpace.VMEM)] * len(args),
        out_specs=pl.BlockSpec(memory_space=pltpu.MemorySpace.VMEM),
    )(*args)


def init_params(key, emb_dims=128):
    # conv weights (Cout, Cin) — PyTorch Conv2d layout, kaiming-uniform bound
    # 1/sqrt(fan_in); BN gamma=1, beta=0 (PyTorch defaults), shaped (Cout, 1)
    # for channel-first broadcasting inside the kernel.
    dims = [3, 16, 64, 256, emb_dims]
    params = []
    for i in range(4):
        key, sub = jax.random.split(key)
        bound = 1.0 / (dims[i] ** 0.5)
        w = jax.random.uniform(sub, (dims[i + 1], dims[i]), jnp.float32, -bound, bound)
        g = jnp.ones((dims[i + 1], 1), jnp.float32)
        b = jnp.zeros((dims[i + 1], 1), jnp.float32)
        params += [w, g, b]
    return params
    # TODO(synk): nn.BatchNorm2d running-mean/var buffer updates are training-time
    # state mutation and are intentionally not modeled (no effect on the output).


if __name__ == "__main__":
    key = jax.random.PRNGKey(0)
    kx, kp = jax.random.split(key)

    B, num_dims, N = 2, 3, 128          # small point-cloud style input
    emb_dims = 128
    x = jax.random.normal(kx, (B, num_dims, N), dtype=jnp.float32)
    params = init_params(kp, emb_dims)

    out = backbone_forward(x, params, emb_dims)
    out = jax.block_until_ready(out)
    assert out.shape == (B, emb_dims, N), out.shape
    print("KERNEL_OK")
</pallas_src>

<mosaic_0001>
module attributes {stable_mosaic.version = 11 : i64} {
  func.func @_backbone_kernel(%arg0: memref<2x3x128xf32, #tpu.memory_space<vmem>>, %arg1: memref<16x3xf32, #tpu.memory_space<vmem>>, %arg2: memref<16x1xf32, #tpu.memory_space<vmem>>, %arg3: memref<16x1xf32, #tpu.memory_space<vmem>>, %arg4: memref<64x16xf32, #tpu.memory_space<vmem>>, %arg5: memref<64x1xf32, #tpu.memory_space<vmem>>, %arg6: memref<64x1xf32, #tpu.memory_space<vmem>>, %arg7: memref<256x64xf32, #tpu.memory_space<vmem>>, %arg8: memref<256x1xf32, #tpu.memory_space<vmem>>, %arg9: memref<256x1xf32, #tpu.memory_space<vmem>>, %arg10: memref<128x256xf32, #tpu.memory_space<vmem>>, %arg11: memref<128x1xf32, #tpu.memory_space<vmem>>, %arg12: memref<128x1xf32, #tpu.memory_space<vmem>>, %arg13: memref<2x128x128xf32, #tpu.memory_space<vmem>>) attributes {dimension_semantics = [], scalar_prefetch = 0 : i64, scratch_operands = 0 : i64, tpu.core_type = #tpu.core_type<tc>} {
    %c0 = arith.constant 0 : index
    %c0_0 = arith.constant 0 : index
    %c0_1 = arith.constant 0 : index
    %0 = vector.load %arg0[%c0, %c0_0, %c0_1] : memref<2x3x128xf32, #tpu.memory_space<vmem>>, vector<2x3x128xf32>
    %cst = arith.constant dense<0.000000e+00> : vector<2x3xf32>
    %1 = vector.multi_reduction <add>, %0, %cst [2] : vector<2x3x128xf32> to vector<2x3xf32>
    %2 = vector.shape_cast %1 : vector<2x3xf32> to vector<2x3x1xf32>
    %cst_2 = arith.constant 1.280000e+02 : f32
    %3 = vector.broadcast %cst_2 : f32 to vector<2x3x1xf32>
    %4 = arith.divf %2, %3 : vector<2x3x1xf32>
    %5 = vector.broadcast %4 : vector<2x3x1xf32> to vector<2x3x128xf32>
    %6 = arith.subf %0, %5 : vector<2x3x128xf32>
    %7 = arith.mulf %6, %6 : vector<2x3x128xf32>
    %cst_3 = arith.constant dense<0.000000e+00> : vector<2x128xf32>
    %8 = vector.multi_reduction <add>, %7, %cst_3 [1] : vector<2x3x128xf32> to vector<2x128xf32>
    %9 = vector.shape_cast %8 : vector<2x128xf32> to vector<2x1x128xf32>
    %cst_4 = arith.constant dense<0xFF800000> : vector<2x1xf32>
    %10 = vector.multi_reduction <maximumf>, %9, %cst_4 [2] : vector<2x1x128xf32> to vector<2x1xf32>
    %11 = vector.shape_cast %10 : vector<2x1xf32> to vector<2x1x1xf32>
    %cst_5 = arith.constant dense<0xFF800000> : vector<1x1xf32>
    %12 = vector.multi_reduction <maximumf>, %11, %cst_5 [0] : vector<2x1x1xf32> to vector<1x1xf32>
    %13 = vector.shape_cast %12 : vector<1x1xf32> to vector<1x1x1xf32>
    %14 = math.sqrt %13 : vector<1x1x1xf32>
    %cst_6 = arith.constant 1.000000e+00 : f32
    %15 = vector.broadcast %cst_6 : f32 to vector<1x1x1xf32>
    %16 = arith.divf %15, %14 : vector<1x1x1xf32>
    %17 = vector.broadcast %16 : vector<1x1x1xf32> to vector<2x3x128xf32>
    %18 = arith.mulf %6, %17 : vector<2x3x128xf32>
    %19 = arith.mulf %18, %18 : vector<2x3x128xf32>
    %cst_7 = arith.constant dense<0.000000e+00> : vector<2x128xf32>
    %20 = vector.multi_reduction <add>, %19, %cst_7 [1] : vector<2x3x128xf32> to vector<2x128xf32>
    %21 = vector.shape_cast %20 : vector<2x128xf32> to vector<2x1x128xf32>
    %cst_8 = arith.constant 1.000000e+00 : f32
    %22 = vector.broadcast %cst_8 : f32 to vector<3x128xf32>
    %23 = vector.extract_strided_slice %18 {offsets = [0, 0, 0], sizes = [1, 3, 128], strides = [1, 1, 1]} : vector<2x3x128xf32> to vector<1x3x128xf32>
    %24 = vector.shape_cast %23 : vector<1x3x128xf32> to vector<3x128xf32>
    %25 = vector.extract_strided_slice %21 {offsets = [0, 0, 0], sizes = [1, 1, 128], strides = [1, 1, 1]} : vector<2x1x128xf32> to vector<1x1x128xf32>
    %26 = vector.shape_cast %25 : vector<1x1x128xf32> to vector<1x128xf32>
    %27 = vector.extract_strided_slice %19 {offsets = [0, 0, 0], sizes = [1, 3, 128], strides = [1, 1, 1]} : vector<2x3x128xf32> to vector<1x3x128xf32>
    %28 = vector.shape_cast %27 : vector<1x3x128xf32> to vector<3x128xf32>
    %cst_9 = arith.constant dense<0.000000e+00> : vector<128x128xf32>
    %29 = tpu.matmul %28, %22, %cst_9 {dimension_numbers = #tpu.dot_dimension_numbers<[0], [0], [1], [1], [0, 1, 1, 1], [], []>} : vector<3x128xf32>, vector<3x128xf32>, vector<128x128xf32> -> vector<128x128xf32>
    %cst_10 = arith.constant dense<0.000000e+00> : vector<128x128xf32>
    %30 = tpu.matmul %24, %24, %cst_10 {dimension_numbers = #tpu.dot_dimension_numbers<[0], [0], [1], [1], [0, 1, 1, 1], [], []>} : vector<3x128xf32>, vector<3x128xf32>, vector<128x128xf32> -> vector<128x128xf32>
    %cst_11 = arith.constant 2.000000e+00 : f32
    %31 = vector.broadcast %cst_11 : f32 to vector<128x128xf32>
    %32 = arith.mulf %31, %30 : vector<128x128xf32>
    %33 = vector.broadcast %26 : vector<1x128xf32> to vector<128x128xf32>
    %34 = arith.addf %29, %33 : vector<128x128xf32>
    %35 = arith.subf %34, %32 : vector<128x128xf32>
    %cst_12 = arith.constant dense<0xFF800000> : vector<128xf32>
    %36 = vector.multi_reduction <maximumf>, %35, %cst_12 [0] : vector<128x128xf32> to vector<128xf32>
    %37 = vector.shape_cast %36 : vector<128xf32> to vector<1x128xf32>
    %38 = vector.broadcast %37 : vector<1x128xf32> to vector<128x128xf32>
    %39 = arith.cmpf oeq, %35, %38 : vector<128x128xf32>
    %cst_13 = arith.constant 0xFF800000 : f32
    %40 = vector.broadcast %cst_13 : f32 to vector<128x128xf32>
    %41 = arith.select %39, %29, %40 : vector<128x128xi1>, vector<128x128xf32>
    %cst_14 = arith.constant dense<0xFF800000> : vector<128xf32>
    %42 = vector.multi_reduction <maximumf>, %41, %cst_14 [0] : vector<128x128xf32> to vector<128xf32>
    %43 = vector.shape_cast %42 : vector<128xf32> to vector<1x128xf32>
    %44 = vector.extract_strided_slice %18 {offsets = [1, 0, 0], sizes = [1, 3, 128], strides = [1, 1, 1]} : vector<2x3x128xf32> to vector<1x3x128xf32>
    %45 = vector.shape_cast %44 : vector<1x3x128xf32> to vector<3x128xf32>
    %46 = vector.extract_strided_slice %21 {offsets = [1, 0, 0], sizes = [1, 1, 128], strides = [1, 1, 1]} : vector<2x1x128xf32> to vector<1x1x128xf32>
    %47 = vector.shape_cast %46 : vector<1x1x128xf32> to vector<1x128xf32>
    %48 = vector.extract_strided_slice %19 {offsets = [1, 0, 0], sizes = [1, 3, 128], strides = [1, 1, 1]} : vector<2x3x128xf32> to vector<1x3x128xf32>
    %49 = vector.shape_cast %48 : vector<1x3x128xf32> to vector<3x128xf32>
    %cst_15 = arith.constant dense<0.000000e+00> : vector<128x128xf32>
    %50 = tpu.matmul %49, %22, %cst_15 {dimension_numbers = #tpu.dot_dimension_numbers<[0], [0], [1], [1], [0, 1, 1, 1], [], []>} : vector<3x128xf32>, vector<3x128xf32>, vector<128x128xf32> -> vector<128x128xf32>
    %cst_16 = arith.constant dense<0.000000e+00> : vector<128x128xf32>
    %51 = tpu.matmul %45, %45, %cst_16 {dimension_numbers = #tpu.dot_dimension_numbers<[0], [0], [1], [1], [0, 1, 1, 1], [], []>} : vector<3x128xf32>, vector<3x128xf32>, vector<128x128xf32> -> vector<128x128xf32>
    %cst_17 = arith.constant 2.000000e+00 : f32
    %52 = vector.broadcast %cst_17 : f32 to vector<128x128xf32>
    %53 = arith.mulf %52, %51 : vector<128x128xf32>
    %54 = vector.broadcast %47 : vector<1x128xf32> to vector<128x128xf32>
    %55 = arith.addf %50, %54 : vector<128x128xf32>
    %56 = arith.subf %55, %53 : vector<128x128xf32>
    %cst_18 = arith.constant dense<0xFF800000> : vector<128xf32>
    %57 = vector.multi_reduction <maximumf>, %56, %cst_18 [0] : vector<128x128xf32> to vector<128xf32>
    %58 = vector.shape_cast %57 : vector<128xf32> to vector<1x128xf32>
    %59 = vector.broadcast %58 : vector<1x128xf32> to vector<128x128xf32>
    %60 = arith.cmpf oeq, %56, %59 : vector<128x128xf32>
    %cst_19 = arith.constant 0xFF800000 : f32
    %61 = vector.broadcast %cst_19 : f32 to vector<128x128xf32>
    %62 = arith.select %60, %50, %61 : vector<128x128xi1>, vector<128x128xf32>
    %cst_20 = arith.constant dense<0xFF800000> : vector<128xf32>
    %63 = vector.multi_reduction <maximumf>, %62, %cst_20 [0] : vector<128x128xf32> to vector<128xf32>
    %64 = vector.shape_cast %63 : vector<128xf32> to vector<1x128xf32>
    %65 = tpu.concatenate %26, %47 in 1 : vector<1x128xf32>, vector<1x128xf32> -> vector<1x256xf32>
    %66 = tpu.concatenate %43, %64 in 1 : vector<1x128xf32>, vector<1x128xf32> -> vector<1x256xf32>
    %67 = tpu.concatenate %37, %58 in 1 : vector<1x128xf32>, vector<1x128xf32> -> vector<1x256xf32>
    %c0_21 = arith.constant 0 : index
    %c0_22 = arith.constant 0 : index
    %68 = vector.load %arg1[%c0_21, %c0_22] : memref<16x3xf32, #tpu.memory_space<vmem>>, vector<16x3xf32>
    %69 = vector.extract_strided_slice %68 {offsets = [0, 0], sizes = [16, 1], strides = [1, 1]} : vector<16x3xf32> to vector<16x1xf32>
    %70 = vector.broadcast %69 : vector<16x1xf32> to vector<16x256xf32>
    %71 = vector.broadcast %65 : vector<1x256xf32> to vector<16x256xf32>
    %72 = arith.mulf %70, %71 : vector<16x256xf32>
    %73 = vector.extract_strided_slice %68 {offsets = [0, 1], sizes = [16, 1], strides = [1, 1]} : vector<16x3xf32> to vector<16x1xf32>
    %74 = vector.broadcast %73 : vector<16x1xf32> to vector<16x256xf32>
    %75 = vector.broadcast %66 : vector<1x256xf32> to vector<16x256xf32>
    %76 = arith.mulf %74, %75 : vector<16x256xf32>
    %77 = arith.addf %72, %76 : vector<16x256xf32>
    %78 = vector.extract_strided_slice %68 {offsets = [0, 2], sizes = [16, 1], strides = [1, 1]} : vector<16x3xf32> to vector<16x1xf32>
    %79 = vector.broadcast %78 : vector<16x1xf32> to vector<16x256xf32>
    %80 = vector.broadcast %67 : vector<1x256xf32> to vector<16x256xf32>
    %81 = arith.mulf %79, %80 : vector<16x256xf32>
    %82 = arith.addf %77, %81 : vector<16x256xf32>
    %cst_23 = arith.constant dense<0.000000e+00> : vector<16xf32>
    %83 = vector.multi_reduction <add>, %82, %cst_23 [1] : vector<16x256xf32> to vector<16xf32>
    %84 = vector.shape_cast %83 : vector<16xf32> to vector<16x1xf32>
    %85 = arith.mulf %82, %82 : vector<16x256xf32>
    %cst_24 = arith.constant dense<0.000000e+00> : vector<16xf32>
    %86 = vector.multi_reduction <add>, %85, %cst_24 [1] : vector<16x256xf32> to vector<16xf32>
    %87 = vector.shape_cast %86 : vector<16xf32> to vector<16x1xf32>
    %cst_25 = arith.constant 3.906250e-03 : f32
    %88 = vector.broadcast %cst_25 : f32 to vector<16x1xf32>
    %89 = arith.mulf %84, %88 : vector<16x1xf32>
    %cst_26 = arith.constant 3.906250e-03 : f32
    %90 = vector.broadcast %cst_26 : f32 to vector<16x1xf32>
    %91 = arith.mulf %87, %90 : vector<16x1xf32>
    %92 = arith.mulf %89, %89 : vector<16x1xf32>
    %93 = arith.subf %91, %92 : vector<16x1xf32>
    %cst_27 = arith.constant 0.000000e+00 : f32
    %94 = vector.broadcast %cst_27 : f32 to vector<16x1xf32>
    %95 = arith.maximumf %93, %94 : vector<16x1xf32>
    %c0_28 = arith.constant 0 : index
    %c0_29 = arith.constant 0 : index
    %96 = vector.load %arg2[%c0_28, %c0_29] : memref<16x1xf32, #tpu.memory_space<vmem>>, vector<16x1xf32>
    %cst_30 = arith.constant 9.99999974E-6 : f32
    %97 = vector.broadcast %cst_30 : f32 to vector<16x1xf32>
    %98 = arith.addf %95, %97 : vector<16x1xf32>
    %99 = math.rsqrt %98 : vector<16x1xf32>
    %100 = arith.mulf %96, %99 : vector<16x1xf32>
    %c0_31 = arith.constant 0 : index
    %c0_32 = arith.constant 0 : index
    %101 = vector.load %arg3[%c0_31, %c0_32] : memref<16x1xf32, #tpu.memory_space<vmem>>, vector<16x1xf32>
    %102 = arith.mulf %89, %100 : vector<16x1xf32>
    %103 = arith.subf %101, %102 : vector<16x1xf32>
    %104 = vector.broadcast %100 : vector<16x1xf32> to vector<16x256xf32>
    %105 = arith.mulf %82, %104 : vector<16x256xf32>
    %106 = vector.broadcast %103 : vector<16x1xf32> to vector<16x256xf32>
    %107 = arith.addf %105, %106 : vector<16x256xf32>
    %cst_33 = arith.constant 2.000000e-01 : f32
    %108 = vector.broadcast %cst_33 : f32 to vector<16x256xf32>
    %109 = arith.mulf %108, %107 : vector<16x256xf32>
    %110 = arith.maximumf %107, %109 : vector<16x256xf32>
    %c0_34 = arith.constant 0 : index
    %c0_35 = arith.constant 0 : index
    %111 = vector.load %arg4[%c0_34, %c0_35] : memref<64x16xf32, #tpu.memory_space<vmem>>, vector<64x16xf32>
    %cst_36 = arith.constant dense<0.000000e+00> : vector<64x256xf32>
    %112 = tpu.matmul %111, %110, %cst_36 {dimension_numbers = #tpu.dot_dimension_numbers<[1], [0], [0], [1], [0, 0, 1, 1], [], []>} : vector<64x16xf32>, vector<16x256xf32>, vector<64x256xf32> -> vector<64x256xf32>
    %cst_37 = arith.constant dense<0.000000e+00> : vector<64xf32>
    %113 = vector.multi_reduction <add>, %112, %cst_37 [1] : vector<64x256xf32> to vector<64xf32>
    %114 = vector.shape_cast %113 : vector<64xf32> to vector<64x1xf32>
    %115 = arith.mulf %112, %112 : vector<64x256xf32>
    %cst_38 = arith.constant dense<0.000000e+00> : vector<64xf32>
    %116 = vector.multi_reduction <add>, %115, %cst_38 [1] : vector<64x256xf32> to vector<64xf32>
    %117 = vector.shape_cast %116 : vector<64xf32> to vector<64x1xf32>
    %cst_39 = arith.constant 3.906250e-03 : f32
    %118 = vector.broadcast %cst_39 : f32 to vector<64x1xf32>
    %119 = arith.mulf %114, %118 : vector<64x1xf32>
    %cst_40 = arith.constant 3.906250e-03 : f32
    %120 = vector.broadcast %cst_40 : f32 to vector<64x1xf32>
    %121 = arith.mulf %117, %120 : vector<64x1xf32>
    %122 = arith.mulf %119, %119 : vector<64x1xf32>
    %123 = arith.subf %121, %122 : vector<64x1xf32>
    %cst_41 = arith.constant 0.000000e+00 : f32
    %124 = vector.broadcast %cst_41 : f32 to vector<64x1xf32>
    %125 = arith.maximumf %123, %124 : vector<64x1xf32>
    %c0_42 = arith.constant 0 : index
    %c0_43 = arith.constant 0 : index
    %126 = vector.load %arg5[%c0_42, %c0_43] : memref<64x1xf32, #tpu.memory_space<vmem>>, vector<64x1xf32>
    %cst_44 = arith.constant 9.99999974E-6 : f32
    %127 = vector.broadcast %cst_44 : f32 to vector<64x1xf32>
    %128 = arith.addf %125, %127 : vector<64x1xf32>
    %129 = math.rsqrt %128 : vector<64x1xf32>
    %130 = arith.mulf %126, %129 : vector<64x1xf32>
    %c0_45 = arith.constant 0 : index
    %c0_46 = arith.constant 0 : index
    %131 = vector.load %arg6[%c0_45, %c0_46] : memref<64x1xf32, #tpu.memory_space<vmem>>, vector<64x1xf32>
    %132 = arith.mulf %119, %130 : vector<64x1xf32>
    %133 = arith.subf %131, %132 : vector<64x1xf32>
    %134 = vector.broadcast %130 : vector<64x1xf32> to vector<64x256xf32>
    %135 = arith.mulf %112, %134 : vector<64x256xf32>
    %136 = vector.broadcast %133 : vector<64x1xf32> to vector<64x256xf32>
    %137 = arith.addf %135, %136 : vector<64x256xf32>
    %cst_47 = arith.constant 2.000000e-01 : f32
    %138 = vector.broadcast %cst_47 : f32 to vector<64x256xf32>
    %139 = arith.mulf %138, %137 : vector<64x256xf32>
    %140 = arith.maximumf %137, %139 : vector<64x256xf32>
    %c0_48 = arith.constant 0 : index
    %c0_49 = arith.constant 0 : index
    %141 = vector.load %arg7[%c0_48, %c0_49] : memref<256x64xf32, #tpu.memory_space<vmem>>, vector<256x64xf32>
    %cst_50 = arith.constant dense<0.000000e+00> : vector<256x256xf32>
    %142 = tpu.matmul %141, %140, %cst_50 {dimension_numbers = #tpu.dot_dimension_numbers<[1], [0], [0], [1], [0, 0, 1, 1], [], []>} : vector<256x64xf32>, vector<64x256xf32>, vector<256x256xf32> -> vector<256x256xf32>
    %cst_51 = arith.constant dense<0.000000e+00> : vector<256xf32>
    %143 = vector.multi_reduction <add>, %142, %cst_51 [1] : vector<256x256xf32> to vector<256xf32>
    %144 = vector.shape_cast %143 : vector<256xf32> to vector<256x1xf32>
    %145 = arith.mulf %142, %142 : vector<256x256xf32>
    %cst_52 = arith.constant dense<0.000000e+00> : vector<256xf32>
    %146 = vector.multi_reduction <add>, %145, %cst_52 [1] : vector<256x256xf32> to vector<256xf32>
    %147 = vector.shape_cast %146 : vector<256xf32> to vector<256x1xf32>
    %cst_53 = arith.constant 3.906250e-03 : f32
    %148 = vector.broadcast %cst_53 : f32 to vector<256x1xf32>
    %149 = arith.mulf %144, %148 : vector<256x1xf32>
    %cst_54 = arith.constant 3.906250e-03 : f32
    %150 = vector.broadcast %cst_54 : f32 to vector<256x1xf32>
    %151 = arith.mulf %147, %150 : vector<256x1xf32>
    %152 = arith.mulf %149, %149 : vector<256x1xf32>
    %153 = arith.subf %151, %152 : vector<256x1xf32>
    %cst_55 = arith.constant 0.000000e+00 : f32
    %154 = vector.broadcast %cst_55 : f32 to vector<256x1xf32>
    %155 = arith.maximumf %153, %154 : vector<256x1xf32>
    %c0_56 = arith.constant 0 : index
    %c0_57 = arith.constant 0 : index
    %156 = vector.load %arg8[%c0_56, %c0_57] : memref<256x1xf32, #tpu.memory_space<vmem>>, vector<256x1xf32>
    %cst_58 = arith.constant 9.99999974E-6 : f32
    %157 = vector.broadcast %cst_58 : f32 to vector<256x1xf32>
    %158 = arith.addf %155, %157 : vector<256x1xf32>
    %159 = math.rsqrt %158 : vector<256x1xf32>
    %160 = arith.mulf %156, %159 : vector<256x1xf32>
    %c0_59 = arith.constant 0 : index
    %c0_60 = arith.constant 0 : index
    %161 = vector.load %arg9[%c0_59, %c0_60] : memref<256x1xf32, #tpu.memory_space<vmem>>, vector<256x1xf32>
    %162 = arith.mulf %149, %160 : vector<256x1xf32>
    %163 = arith.subf %161, %162 : vector<256x1xf32>
    %164 = vector.broadcast %160 : vector<256x1xf32> to vector<256x256xf32>
    %165 = arith.mulf %142, %164 : vector<256x256xf32>
    %166 = vector.broadcast %163 : vector<256x1xf32> to vector<256x256xf32>
    %167 = arith.addf %165, %166 : vector<256x256xf32>
    %cst_61 = arith.constant 2.000000e-01 : f32
    %168 = vector.broadcast %cst_61 : f32 to vector<256x256xf32>
    %169 = arith.mulf %168, %167 : vector<256x256xf32>
    %170 = arith.maximumf %167, %169 : vector<256x256xf32>
    %c0_62 = arith.constant 0 : index
    %c0_63 = arith.constant 0 : index
    %171 = vector.load %arg10[%c0_62, %c0_63] : memref<128x256xf32, #tpu.memory_space<vmem>>, vector<128x256xf32>
    %cst_64 = arith.constant dense<0.000000e+00> : vector<128x256xf32>
    %172 = tpu.matmul %171, %170, %cst_64 {dimension_numbers = #tpu.dot_dimension_numbers<[1], [0], [0], [1], [0, 0, 1, 1], [], []>} : vector<128x256xf32>, vector<256x256xf32>, vector<128x256xf32> -> vector<128x256xf32>
    %cst_65 = arith.constant dense<0.000000e+00> : vector<128xf32>
    %173 = vector.multi_reduction <add>, %172, %cst_65 [1] : vector<128x256xf32> to vector<128xf32>
    %174 = vector.shape_cast %173 : vector<128xf32> to vector<128x1xf32>
    %175 = arith.mulf %172, %172 : vector<128x256xf32>
    %cst_66 = arith.constant dense<0.000000e+00> : vector<128xf32>
    %176 = vector.multi_reduction <add>, %175, %cst_66 [1] : vector<128x256xf32> to vector<128xf32>
    %177 = vector.shape_cast %176 : vector<128xf32> to vector<128x1xf32>
    %cst_67 = arith.constant 3.906250e-03 : f32
    %178 = vector.broadcast %cst_67 : f32 to vector<128x1xf32>
    %179 = arith.mulf %174, %178 : vector<128x1xf32>
    %cst_68 = arith.constant 3.906250e-03 : f32
    %180 = vector.broadcast %cst_68 : f32 to vector<128x1xf32>
    %181 = arith.mulf %177, %180 : vector<128x1xf32>
    %182 = arith.mulf %179, %179 : vector<128x1xf32>
    %183 = arith.subf %181, %182 : vector<128x1xf32>
    %cst_69 = arith.constant 0.000000e+00 : f32
    %184 = vector.broadcast %cst_69 : f32 to vector<128x1xf32>
    %185 = arith.maximumf %183, %184 : vector<128x1xf32>
    %c0_70 = arith.constant 0 : index
    %c0_71 = arith.constant 0 : index
    %186 = vector.load %arg11[%c0_70, %c0_71] : memref<128x1xf32, #tpu.memory_space<vmem>>, vector<128x1xf32>
    %cst_72 = arith.constant 9.99999974E-6 : f32
    %187 = vector.broadcast %cst_72 : f32 to vector<128x1xf32>
    %188 = arith.addf %185, %187 : vector<128x1xf32>
    %189 = math.rsqrt %188 : vector<128x1xf32>
    %190 = arith.mulf %186, %189 : vector<128x1xf32>
    %c0_73 = arith.constant 0 : index
    %c0_74 = arith.constant 0 : index
    %191 = vector.load %arg12[%c0_73, %c0_74] : memref<128x1xf32, #tpu.memory_space<vmem>>, vector<128x1xf32>
    %192 = arith.mulf %179, %190 : vector<128x1xf32>
    %193 = arith.subf %191, %192 : vector<128x1xf32>
    %194 = vector.broadcast %190 : vector<128x1xf32> to vector<128x256xf32>
    %195 = arith.mulf %172, %194 : vector<128x256xf32>
    %196 = vector.broadcast %193 : vector<128x1xf32> to vector<128x256xf32>
    %197 = arith.addf %195, %196 : vector<128x256xf32>
    %cst_75 = arith.constant 2.000000e-01 : f32
    %198 = vector.broadcast %cst_75 : f32 to vector<128x256xf32>
    %199 = arith.mulf %198, %197 : vector<128x256xf32>
    %200 = arith.maximumf %197, %199 : vector<128x256xf32>
    %201 = vector.extract_strided_slice %200 {offsets = [0, 0], sizes = [128, 128], strides = [1, 1]} : vector<128x256xf32> to vector<128x128xf32>
    %c0_76 = arith.constant 0 : index
    %c0_77 = arith.constant 0 : index
    %c0_78 = arith.constant 0 : index
    %202 = vector.load %arg13[%c0_76, %c0_77, %c0_78] : memref<2x128x128xf32, #tpu.memory_space<vmem>>, vector<1x128x128xf32>
    %203 = vector.shape_cast %202 : vector<1x128x128xf32> to vector<128x128xf32>
    %204 = vector.shape_cast %201 : vector<128x128xf32> to vector<1x128x128xf32>
    tpu.vector_store %arg13[%c0_76, %c0_77, %c0_78], %204 {strides = array<i32>} : memref<2x128x128xf32, #tpu.memory_space<vmem>>, vector<1x128x128xf32>,
    %205 = vector.extract_strided_slice %200 {offsets = [0, 128], sizes = [128, 128], strides = [1, 1]} : vector<128x256xf32> to vector<128x128xf32>
    %c1 = arith.constant 1 : index
    %c0_79 = arith.constant 0 : index
    %c0_80 = arith.constant 0 : index
    %206 = vector.load %arg13[%c1, %c0_79, %c0_80] : memref<2x128x128xf32, #tpu.memory_space<vmem>>, vector<1x128x128xf32>
    %207 = vector.shape_cast %206 : vector<1x128x128xf32> to vector<128x128xf32>
    %208 = vector.shape_cast %205 : vector<128x128xf32> to vector<1x128x128xf32>
    tpu.vector_store %arg13[%c1, %c0_79, %c0_80], %208 {strides = array<i32>} : memref<2x128x128xf32, #tpu.memory_space<vmem>>, vector<1x128x128xf32>,
    return
  }
}

</mosaic_0001>

<bundles_post_ra>
// kernel: tpu_custom_call.1
= control target key start
LH: loop header
LB: loop body
LE: loop exit
PB: predicated region body
PF: predicated region fallthrough
CT: control target
= control target key end

     0   :  { %vm47_vm0 = vcmask 1042432   ;;  %s6984_s0 = inlined_call_operand.vmem [shape: f32[2,3,128], index: 0, kind: input, shape index: {}]   ;;  %s6985_s1 = inlined_call_operand.vmem [shape: f32[16,3], index: 1, kind: input, shape index: {}]   ;;  %s6986_s2 = inlined_call_operand.vmem [shape: f32[16,1], index: 2, kind: input, shape index: {}]   ;;  %s6987_s3 = inlined_call_operand.vmem [shape: f32[16,1], index: 3, kind: input, shape index: {}]   ;;  %s6988_s4 = inlined_call_operand.vmem [shape: f32[64,16], index: 4, kind: input, shape index: {}]   ;;  %s6989_s5 = inlined_call_operand.vmem [shape: f32[64,1], index: 5, kind: input, shape index: {}]   ;;  %s6990_s6 = inlined_call_operand.vmem [shape: f32[64,1], index: 6, kind: input, shape index: {}]   ;;  %s6991_s7 = inlined_call_operand.vmem [shape: f32[256,64], index: 7, kind: input, shape index: {}]   ;;  %s6992_s8 = inlined_call_operand.vmem [shape: f32[256,1], index: 8, kind: input, shape index: {}]   ;;  %s6993_s9 = inlined_call_operand.vmem [shape: f32[256,1], index: 9, kind: input, shape index: {}]   ;;  %s6994_s10 = inlined_call_operand.vmem [shape: f32[128,256], index: 10, kind: input, shape index: {}]   ;;  %s6995_s11 = inlined_call_operand.vmem [shape: f32[128,1], index: 11, kind: input, shape index: {}]   ;;  %s6996_s12 = inlined_call_operand.vmem [shape: f32[128,1], index: 12, kind: input, shape index: {}]   ;;  %s6997_s13 = inlined_call_operand.hbm [shape: f32[2,128,128], index: 13, kind: output, shape index: {}]  }
   0x1   :  { %v45_v0 = vld [vmem:[%s6984_s0] sm:$0x7]  ;;  %v46_v1 = vld [vmem:[%s6984_s0 + $0x4] sm:$0x7] }
   0x2   :  { %v48_v2 = vsel %vm47_vm0, %v45_v0, 0.0 }
   0x3   :  { %18 = vsyncpa [#allocation3], 0  ;;  %49 = vadd.xlane.f32.xlu0 %v48_v2  ;;  %v51_v3 = vsel %vm47_vm0, %v46_v1, 0.0  ;;  %v4749_v38 = vmov 1.0   ;;  %v4750_v40 = vmov 1   ;;  %v4751_v41 = vmov 0  }
   0x4   :  { %4487 = vmatprep.subr.msk.mxu0 %vm47_vm0, %v4749_v38  ;;  %vm139_vm3 = vcmask 23552   ;;  %v1262_v55 = vld [vmem:[%s6985_s1 + $0x8] sm:$0xff]  ;;  %v1261_v58 = vld [vmem:[%s6985_s1] sm:$0xff] }
   0x5   :  { %4488 = vmatpush3.msk.msra.mxu0 %vm47_vm0, %v4749_v38 }
   0x6   :  { %4539 = vmatprep.subr.msk.mxu0 %vm47_vm0, %v4749_v38 }
   0x7   :  { %52 = vadd.xlane.f32.xlu0 %v51_v3 }
  0x8c   :  { %v50_v4 = vpop.xlane.xlu0 %49 }
  0x8d   :  { %v55_v5 = vmul.f32 0.0078125, %v50_v4 }
  0x8f   :  { %v57_v6 = vsub.f32 %v45_v0, %v55_v5 }
  0x90   :  { %v53_v7 = vpop.xlane.xlu0 %52 }
  0x91   :  { %v59_v8 = vmul.f32 %v57_v6, %v57_v6  ;;  %v56_v9 = vmul.f32 0.0078125, %v53_v7 }
  0x93   :  { %v58_v10 = vsub.f32 %v46_v1, %v56_v9  ;;  %v61_v11 = vsel %vm47_vm0, %v59_v8, 0.0  ;;  %v4752_v1 = vmov 2  }
  0x94   :  { %v62_v12 = vrot.slane %v61_v11, 4 }
  0x95   :  { %v60_v13 = vmul.f32 %v58_v10, %v58_v10 }
  0x96   :  { %v63_v14 = vadd.f32 %v62_v12, %v61_v11 }
  0x97   :  { %v68_v15 = vsel %vm47_vm0, %v60_v13, 0.0 }
  0x98   :  { %v64_v16 = vrot.slane %v63_v14, 2  ;;  %v69_v17 = vrot.slane %v68_v15, 4 }
  0x9a   :  { %v65_v18 = vadd.f32 %v64_v16, %v63_v14  ;;  %v70_v19 = vadd.f32 %v69_v17, %v68_v15 }
  0x9c   :  { %v66_v20 = vrot.slane %v65_v18, 1  ;;  %v71_v21 = vrot.slane %v70_v19, 2 }
  0x9e   :  { %v67_v22 = vadd.f32 %v66_v20, %v65_v18  ;;  %v72_v23 = vadd.f32 %v71_v21, %v70_v19 }
  0xa0   :  { %75 = vmax.xlane.f32.xlu1 %v67_v22  ;;  %v73_v24 = vrot.slane %v72_v23, 1 }
  0xa2   :  { %v74_v25 = vadd.f32 %v73_v24, %v72_v23 }
  0xa4   :  { %77 = vmax.xlane.f32.xlu1 %v74_v25 }
 0x129   :  { %v76_v26 = vpop.xlane.xlu1 %75 }
 0x12d   :  { %v78_v27 = vpop.xlane.xlu1 %77 }
 0x12e   :  { %v79_v28 = vmax.f32 %v76_v26, %v78_v27 }
 0x130   :  { %4607 = vrsqrt.f32 %v79_v28  ;;  %vm82_vm1 = vcmp.eq.f32.partialorder %v79_v28, inf  ;;  %v85_v31 = vand.u32 2147483648, %v79_v28  ;;  %vm84_vm2 = vcmp.eq.f32.partialorder %v79_v28, 0.0 }
 0x13d   :  { %v4608_v29 = vpop.eup %4607 }
 0x13e   :  { %v81_v30 = vmul.f32 %v4608_v29, %v79_v28 }
 0x140   :  { %v83_v32 = vsel %vm82_vm1, %v79_v28, %v81_v30 }
 0x141   :  { %v86_v33 = vsel %vm84_vm2, %v85_v31, %v83_v32 }
 0x142   :  { %4609 = vrcp.f32 %v86_v33 }
 0x14f   :  { %v4610_v34 = vpop.eup %4609 }
 0x150   :  { %v89_v35 = vmul.f32 %v4610_v34, %v57_v6  ;;  %v90_v36 = vmul.f32 %v4610_v34, %v58_v10 }
 0x152   :  { %336 = vxpose.xlu1.b32.start.end [1/1] (short) %v89_v35, 128  ;;  %4513 = vmatprep.subr.msk.mxu1 %vm47_vm0, %v89_v35  ;;  %v4838_v37 = vmul.f32 %v89_v35, %v89_v35  ;;  %v4846_v39 = vmul.f32 %v90_v36, %v90_v36 }
 0x153   :  { %4514 = vmatpush3.msk.msra.mxu1 %vm47_vm0, %v89_v35 }
 0x154   :  { %4565 = vmatprep.subr.msk.mxu1 %vm47_vm0, %v90_v36  ;;  %107 = vxpose.xlu0.b32.start.end [1/1] (short) %v4838_v37, 128 }
 0x18f   :  { %911 = vxpose.xlu1.b32.start.end [1/1] (short) %v90_v36, 128 }
 0x191   :  { %686 = vxpose.xlu0.b32.start.end [1/1] (short) %v4846_v39, 128 }
 0x1ad   :  { %4600 = vset.pattern.permute.xlu1 %v4750_v40 }
 0x1ba   :  { %4599 = vset.pattern.permute.xlu0 %v4751_v41 }
 0x1ce   :  { %v352_v42 = vpop.trf.xlu1 }
 0x1cf   :  { %4515 = vmatprep.mubr.msk.f32.mxu1 %vm139_vm3, %v352_v42 }
 0x1d0   :  { %v123_v43 = vpop.trf.xlu0 }
 0x1d1   :  { %4489 = vmatprep.mubr.msk.f32.mxu0 %vm139_vm3, %v123_v43 }
 0x1d2   :  { %v353_v44 = vpop.trf.xlu1 }
 0x1d3   :  { %4516 = vmatmul.mubr.msk.f32.vlgmr.msra.gmra.mxu1 %vm139_vm3, %v353_v44 }
 0x1d4   :  { %4566 = vmatpush3.msk.msra.mxu1 %vm47_vm0, %v90_v36  ;;  %v124_v45 = vpop.trf.xlu0 }
 0x1d5   :  { %4490 = vmatmul.mubr.msk.f32.vlgmr.msra.gmra.mxu0 %vm139_vm3, %v124_v45 }
 0x1d6   :  { %v354_v46 = vpop.trf.xlu1  ;;  %4540 = vmatpush3.msk.msra.mxu0 %vm47_vm0, %v4749_v38 }
 0x1d7   :  { %4518 = vmatprep.mubr.msk.f32.mxu1 %vm139_vm3, %v354_v46 }
 0x1d8   :  { %v125_v47 = vpop.trf.xlu0 }
 0x1d9   :  { %4492 = vmatprep.mubr.msk.f32.mxu0 %vm139_vm3, %v125_v47 }
 0x1da   :  { %v355_v48 = vpop.trf.xlu1 }
 0x1db   :  { %4519 = vmatmul.mubr.msk.f32.gmra.mxu1 %vm139_vm3, %v355_v48 }
 0x1dc   :  { %v126_v49 = vpop.trf.xlu0 }
 0x1dd   :  { %4493 = vmatmul.mubr.msk.f32.gmra.mxu0 %vm139_vm3, %v126_v49 }
 0x1de   :  { %v356_v50 = vpop.trf.xlu1 }
 0x1df   :  { %4521 = vmatprep.mubr.msk.f32.mxu1 %vm139_vm3, %v356_v50 }
 0x1e0   :  { %v127_v51 = vpop.trf.xlu0 }
 0x1e1   :  { %4495 = vmatprep.mubr.msk.f32.mxu0 %vm139_vm3, %v127_v51 }
 0x1e2   :  { %v357_v52 = vpop.trf.xlu1 }
 0x1e3   :  { %4522 = vmatmul.mubr.msk.f32.gmra.mxu1 %vm139_vm3, %v357_v52 }
 0x1e4   :  { %v128_v53 = vpop.trf.xlu0 }
 0x1e5   :  { %4496 = vmatmul.mubr.msk.f32.gmra.mxu0 %vm139_vm3, %v128_v53  ;;  %v93_v53 = vsel %vm47_vm0, %v4838_v37, 0.0 }
 0x1e6   :  { %v358_v54 = vpop.trf.xlu1 }
 0x1e7   :  { %4524 = vmatprep.mubr.msk.f32.mxu1 %vm139_vm3, %v358_v54  ;;  %v94_v54 = vrot.slane %v93_v53, 4 }
 0x1e8   :  { %v129_v56 = vpop.trf.xlu0 }
 0x1e9   :  { %1290 = vperm.xlu1 %4600, %v1262_v55   ;;  %4498 = vmatprep.mubr.msk.f32.mxu0 %vm139_vm3, %v129_v56 }
 0x1ea   :  { %v359_v57 = vpop.trf.xlu1 }
 0x1eb   :  { %4525 = vmatmul.mubr.msk.f32.gmra.mxu1 %vm139_vm3, %v359_v57 }
 0x1ec   :  { %v130_v59 = vpop.trf.xlu0 }
 0x1ed   :  { %4601 = vset.pattern.permute.xlu1 %v4751_v41  ;;  %4499 = vmatmul.mubr.msk.f32.gmra.mxu0 %vm139_vm3, %v130_v59  ;;  %v95_v59 = vadd.f32 %v94_v54, %v93_v53 }
 0x1ee   :  { %1265 = vperm.xlu1 %4601, %v1261_v58   ;;  %v360_v60 = vpop.trf.xlu1 }
 0x1ef   :  { %4527 = vmatprep.mubr.msk.f32.mxu1 %vm139_vm3, %v360_v60 }
 0x1f0   :  { %v131_v61 = vpop.trf.xlu0 }
 0x1f1   :  { %4501 = vmatprep.mubr.msk.f32.mxu0 %vm139_vm3, %v131_v61 }
 0x1f2   :  { %v361_v62 = vpop.trf.xlu1  ;;  %4602 = vset.pattern.permute.xlu1 %v4750_v40 }
 0x1f3   :  { %4528 = vmatmul.mubr.msk.f32.gmra.mxu1 %vm139_vm3, %v361_v62  ;;  %1286 = vperm.xlu1 %4602, %v1261_v58   ;;  %v96_v62 = vrot.slane %v95_v59, 2 }
 0x1f4   :  { %v132_v63 = vpop.trf.xlu0 }
 0x1f5   :  { %4502 = vmatmul.mubr.msk.f32.gmra.mxu0 %vm139_vm3, %v132_v63 }
 0x1f6   :  { %v362_v0 = vpop.trf.xlu1  ;;  %1270 = vperm.xlu0 %4599, %v1262_v55  }
 0x1f7   :  { %4530 = vmatprep.mubr.msk.f32.mxu1 %vm139_vm3, %v362_v0  ;;  %4604 = vset.pattern.permute.xlu1 %v4752_v1 }
 0x1f8   :  { %v133_v2 = vpop.trf.xlu0  ;;  %1310 = vperm.xlu1 %4604, %v1261_v58  }
 0x1f9   :  { %4504 = vmatprep.mubr.msk.f32.mxu0 %vm139_vm3, %v133_v2 }
 0x1fa   :  { %v363_v3 = vpop.trf.xlu1  ;;  %4603 = vset.pattern.permute.xlu0 %v4752_v1  ;;  %v97_v1 = vadd.f32 %v96_v62, %v95_v59 }
 0x1fb   :  { %4531 = vmatmul.mubr.msk.f32.gmra.mxu1 %vm139_vm3, %v363_v3  ;;  %1314 = vperm.xlu0 %4603, %v1262_v55  }
 0x1fc   :  { %v134_v4 = vpop.trf.xlu0  ;;  %4605 = vset.pattern.permute.xlu1 %v4751_v41 }
 0x1fd   :  { %4505 = vmatmul.mubr.msk.f32.gmra.mxu0 %vm139_vm3, %v134_v4 }
 0x1fe   :  { %v364_v5 = vpop.trf.xlu1 }
 0x1ff   :  { %4533 = vmatprep.mubr.msk.f32.mxu1 %vm139_vm3, %v364_v5  ;;  %4606 = vset.pattern.permute.xlu0 %v4751_v41  ;;  %v98_v5 = vrot.slane %v97_v1, 1 }
 0x200   :  { %v135_v6 = vpop.trf.xlu0 }
 0x201   :  { %4507 = vmatprep.mubr.msk.f32.mxu0 %vm139_vm3, %v135_v6 }
 0x202   :  { %v365_v7 = vpop.trf.xlu1 }
 0x203   :  { %4534 = vmatmul.mubr.msk.f32.gmra.mxu1 %vm139_vm3, %v365_v7 }
 0x204   :  { %v136_v8 = vpop.trf.xlu0 }
 0x205   :  { %4508 = vmatmul.mubr.msk.f32.gmra.mxu0 %vm139_vm3, %v136_v8  ;;  %v4947_v8 = vadd.f32 %v98_v5, %v97_v1 }
 0x206   :  { %v366_v9 = vpop.trf.xlu1 }
 0x207   :  { %4536 = vmatprep.mubr.msk.f32.mxu1 %vm139_vm3, %v366_v9 }
 0x208   :  { %v137_v10 = vpop.trf.xlu0 }
 0x209   :  { %4510 = vmatprep.mubr.msk.f32.mxu0 %vm139_vm3, %v137_v10 }
 0x20a   :  { %v367_v11 = vpop.trf.xlu1 }
 0x20b   :  { %4537 = vmatmul.mubr.msk.f32.gmra.mxu1 %vm139_vm3, %v367_v11 }
 0x20c   :  { %v138_v12 = vpop.trf.xlu0 }
 0x20d   :  { %4511 = vmatmul.mubr.msk.f32.gmra.mxu0 %vm139_vm3, %v138_v12 }
 0x20e   :  { %v927_v13 = vpop.trf.xlu1 }
 0x20f   :  { %4567 = vmatprep.mubr.msk.f32.mxu1 %vm139_vm3, %v927_v13 }
 0x210   :  { %v702_v14 = vpop.trf.xlu0 }
 0x211   :  { %4541 = vmatprep.mubr.msk.f32.mxu0 %vm139_vm3, %v702_v14 }
 0x212   :  { %v928_v15 = vpop.trf.xlu1 }
 0x213   :  { %4568 = vmatmul.mubr.msk.f32.vlgmr.msra.gmra.mxu1 %vm139_vm3, %v928_v15 }
 0x214   :  { %v703_v16 = vpop.trf.xlu0 }
 0x215   :  { %4542 = vmatmul.mubr.msk.f32.vlgmr.msra.gmra.mxu0 %vm139_vm3, %v703_v16 }
 0x216   :  { %v929_v17 = vpop.trf.xlu1 }
 0x217   :  { %4570 = vmatprep.mubr.msk.f32.mxu1 %vm139_vm3, %v929_v17 }
 0x218   :  { %v704_v18 = vpop.trf.xlu0 }
 0x219   :  { %4544 = vmatprep.mubr.msk.f32.mxu0 %vm139_vm3, %v704_v18 }
 0x21a   :  { %v930_v19 = vpop.trf.xlu1 }
 0x21b   :  { %4571 = vmatmul.mubr.msk.f32.gmra.mxu1 %vm139_vm3, %v930_v19 }
 0x21c   :  { %v705_v20 = vpop.trf.xlu0 }
 0x21d   :  { %4545 = vmatmul.mubr.msk.f32.gmra.mxu0 %vm139_vm3, %v705_v20 }
 0x21e   :  { %v931_v21 = vpop.trf.xlu1 }
 0x21f   :  { %4573 = vmatprep.mubr.msk.f32.mxu1 %vm139_vm3, %v931_v21 }
 0x220   :  { %v706_v22 = vpop.trf.xlu0 }
 0x221   :  { %4547 = vmatprep.mubr.msk.f32.mxu0 %vm139_vm3, %v706_v22 }
 0x222   :  { %v932_v23 = vpop.trf.xlu1 }
 0x223   :  { %4574 = vmatmul.mubr.msk.f32.gmra.mxu1 %vm139_vm3, %v932_v23 }
 0x224   :  { %v707_v24 = vpop.trf.xlu0 }
 0x225   :  { %4548 = vmatmul.mubr.msk.f32.gmra.mxu0 %vm139_vm3, %v707_v24 }
 0x226   :  { %v933_v25 = vpop.trf.xlu1 }
 0x227   :  { %4576 = vmatprep.mubr.msk.f32.mxu1 %vm139_vm3, %v933_v25 }
 0x228   :  { %v708_v26 = vpop.trf.xlu0 }
 0x229   :  { %4550 = vmatprep.mubr.msk.f32.mxu0 %vm139_vm3, %v708_v26 }
 0x22a   :  { %v934_v27 = vpop.trf.xlu1 }
 0x22b   :  { %4577 = vmatmul.mubr.msk.f32.gmra.mxu1 %vm139_vm3, %v934_v27 }
 0x22c   :  { %v709_v28 = vpop.trf.xlu0 }
 0x22d   :  { %4551 = vmatmul.mubr.msk.f32.gmra.mxu0 %vm139_vm3, %v709_v28 }
 0x22e   :  { %v935_v29 = vpop.trf.xlu1 }
 0x22f   :  { %4579 = vmatprep.mubr.msk.f32.mxu1 %vm139_vm3, %v935_v29 }
 0x230   :  { %v710_v30 = vpop.trf.xlu0 }
 0x231   :  { %4553 = vmatprep.mubr.msk.f32.mxu0 %vm139_vm3, %v710_v30 }
 0x232   :  { %v936_v31 = vpop.trf.xlu1 }
 0x233   :  { %4580 = vmatmul.mubr.msk.f32.gmra.mxu1 %vm139_vm3, %v936_v31 }
 0x234   :  { %v711_v32 = vpop.trf.xlu0 }
 0x235   :  { %4554 = vmatmul.mubr.msk.f32.gmra.mxu0 %vm139_vm3, %v711_v32 }
 0x236   :  { %v937_v33 = vpop.trf.xlu1 }
 0x237   :  { %4582 = vmatprep.mubr.msk.f32.mxu1 %vm139_vm3, %v937_v33 }
 0x238   :  { %v712_v34 = vpop.trf.xlu0 }
 0x239   :  { %4556 = vmatprep.mubr.msk.f32.mxu0 %vm139_vm3, %v712_v34 }
 0x23a   :  { %v938_v35 = vpop.trf.xlu1 }
 0x23b   :  { %4583 = vmatmul.mubr.msk.f32.gmra.mxu1 %vm139_vm3, %v938_v35 }
 0x23c   :  { %v713_v36 = vpop.trf.xlu0 }
 0x23d   :  { %4557 = vmatmul.mubr.msk.f32.gmra.mxu0 %vm139_vm3, %v713_v36 }
 0x23e   :  { %v939_v38 = vpop.trf.xlu1 }
 0x23f   :  { %4585 = vmatprep.mubr.msk.f32.mxu1 %vm139_vm3, %v939_v38 }
 0x240   :  { %v714_v40 = vpop.trf.xlu0 }
 0x241   :  { %4559 = vmatprep.mubr.msk.f32.mxu0 %vm139_vm3, %v714_v40 }
 0x242   :  { %v940_v41 = vpop.trf.xlu1 }
 0x243   :  { %4586 = vmatmul.mubr.msk.f32.gmra.mxu1 %vm139_vm3, %v940_v41 }
 0x244   :  { %v715_v42 = vpop.trf.xlu0 }
 0x245   :  { %4560 = vmatmul.mubr.msk.f32.gmra.mxu0 %vm139_vm3, %v715_v42 }
 0x246   :  { %v941_v43 = vpop.trf.xlu1 }
 0x247   :  { %4588 = vmatprep.mubr.msk.f32.mxu1 %vm139_vm3, %v941_v43 }
 0x248   :  { %v716_v44 = vpop.trf.xlu0 }
 0x249   :  { %4562 = vmatprep.mubr.msk.f32.mxu0 %vm139_vm3, %v716_v44 }
 0x24a   :  { %v942_v45 = vpop.trf.xlu1 }
 0x24b   :  { %4589 = vmatmul.mubr.msk.f32.gmra.mxu1 %vm139_vm3, %v942_v45 }
 0x24c   :  { %v717_v46 = vpop.trf.xlu0 }
 0x24d   :  { %4563 = vmatmul.mubr.msk.f32.gmra.mxu0 %vm139_vm3, %v717_v46 }
 0x293   :  { %v4517_v47 = vpop.f32.mrf.mxu1 }
 0x294   :  { %v565_v11 = vmul.f32 2.0, %v4517_v47 }
 0x295   :  { %v4925_v48 = vpop.f32.mrf.mxu0  ;;  %v485_v49 = vpop.f32.mrf.mxu1 }
 0x296   :  { %v581_v12 = vadd.f32 %v4925_v48, %v4947_v8  ;;  %v564_v16 = vmul.f32 2.0, %v485_v49 }
 0x297   :  { %v4927_v50 = vpop.f32.mrf.mxu0 }
 0x298   :  { %v580_v13 = vadd.f32 %v4927_v50, %v4947_v8  ;;  %v4961_v20 = vsub.f32 %v581_v12, %v565_v11 }
 0x29a   :  { %v4965_v23 = vsub.f32 %v580_v13, %v564_v16 }
 0x29b   :  { %v4520_v51 = vpop.f32.mrf.mxu1 }
 0x29c   :  { %v567_v24 = vmul.f32 2.0, %v4520_v51 }
 0x29d   :  { %v4929_v52 = vpop.f32.mrf.mxu0  ;;  %v495_v55 = vpop.f32.mrf.mxu1 }
 0x29e   :  { %v583_v25 = vadd.f32 %v4929_v52, %v4947_v8  ;;  %v566_v32 = vmul.f32 2.0, %v495_v55 }
 0x29f   :  { %v4933_v56 = vpop.f32.mrf.mxu0 }
 0x2a0   :  { %v582_v33 = vadd.f32 %v4933_v56, %v4947_v8  ;;  %v599_v62 = vsub.f32 %v583_v25, %v567_v24 }
 0x2a3   :  { %v4523_v57 = vpop.f32.mrf.mxu1 }
 0x2a4   :  { %v569_v17 = vmul.f32 2.0, %v4523_v57 }
 0x2a5   :  { %v4935_v58 = vpop.f32.mrf.mxu0  ;;  %v505_v60 = vpop.f32.mrf.mxu1 }
 0x2a6   :  { %v585_v18 = vadd.f32 %v4935_v58, %v4947_v8  ;;  %v568_v26 = vmul.f32 2.0, %v505_v60 }
 0x2a7   :  { %v4937_v61 = vpop.f32.mrf.mxu0 }
 0x2a8   :  { %v584_v19 = vadd.f32 %v4937_v61, %v4947_v8  ;;  %v4979_v34 = vsub.f32 %v585_v18, %v569_v17 }
 0x2aa   :  { %v4981_v35 = vsub.f32 %v584_v19, %v568_v26  ;;  %v613_v13 = vmax.f32 %v4961_v20, %v4979_v34 }
 0x2ab   :  { %v4526_v63 = vpop.f32.mrf.mxu1 }
 0x2ac   :  { %v571_v27 = vmul.f32 2.0, %v4526_v63  ;;  %v598_v63 = vsub.f32 %v582_v33, %v566_v32  ;;  %v612_v1 = vmax.f32 %v4965_v23, %v4981_v35 }
 0x2ad   :  { %v4939_v0 = vpop.f32.mrf.mxu0  ;;  %v515_v2 = vpop.f32.mrf.mxu1 }
 0x2ae   :  { %v587_v28 = vadd.f32 %v4939_v0, %v4947_v8  ;;  %v570_v36 = vmul.f32 2.0, %v515_v2 }
 0x2af   :  { %v4941_v3 = vpop.f32.mrf.mxu0 }
 0x2b0   :  { %v586_v29 = vadd.f32 %v4941_v3, %v4947_v8  ;;  %v4991_v47 = vsub.f32 %v587_v28, %v571_v27 }
 0x2b2   :  { %v4993_v49 = vsub.f32 %v586_v29, %v570_v36 }
 0x2b3   :  { %v4529_v37 = vpop.f32.mrf.mxu1 }
 0x2b4   :  { %v573_v38 = vmul.f32 2.0, %v4529_v37  ;;  %v614_v16 = vmax.f32 %v598_v63, %v4993_v49 }
 0x2b5   :  { %v4943_v4 = vpop.f32.mrf.mxu0  ;;  %v525_v6 = vpop.f32.mrf.mxu1 }
 0x2b6   :  { %v589_v40 = vadd.f32 %v4943_v4, %v4947_v8  ;;  %v572_v41 = vmul.f32 2.0, %v525_v6 }
 0x2b7   :  { %v4945_v7 = vpop.f32.mrf.mxu0 }
 0x2b8   :  { %v588_v30 = vadd.f32 %v4945_v7, %v4947_v8  ;;  %v5001_v2 = vsub.f32 %v589_v40, %v573_v38 }
 0x2ba   :  { %v4995_v51 = vsub.f32 %v588_v30, %v572_v41  ;;  %v617_v26 = vmax.f32 %v613_v13, %v5001_v2 }
 0x2bb   :  { %v4532_v9 = vpop.f32.mrf.mxu1 }
 0x2bc   :  { %v575_v43 = vmul.f32 2.0, %v4532_v9  ;;  %v616_v17 = vmax.f32 %v612_v1, %v4995_v51 }
 0x2bd   :  { %v4949_v10 = vpop.f32.mrf.mxu0  ;;  %v535_v14 = vpop.f32.mrf.mxu1 }
 0x2be   :  { %v591_v44 = vadd.f32 %v4949_v10, %v4947_v8  ;;  %v574_v53 = vmul.f32 2.0, %v535_v14  ;;  %v615_v14 = vmax.f32 %v599_v62, %v4991_v47 }
 0x2bf   :  { %v4955_v15 = vpop.f32.mrf.mxu0 }
 0x2c0   :  { %v590_v45 = vadd.f32 %v4955_v15, %v4947_v8  ;;  %v5005_v6 = vsub.f32 %v591_v44, %v575_v43 }
 0x2c2   :  { %v5007_v9 = vsub.f32 %v590_v45, %v574_v53  ;;  %v619_v27 = vmax.f32 %v615_v14, %v5005_v6  ;;  %v100_v45 = vsel %vm47_vm0, %v4846_v39, 0.0 }
 0x2c3   :  { %v4535_v21 = vpop.f32.mrf.mxu1 }
 0x2c4   :  { %v577_v55 = vmul.f32 2.0, %v4535_v21  ;;  %v618_v28 = vmax.f32 %v614_v16, %v5007_v9 }
 0x2c5   :  { %v4963_v22 = vpop.f32.mrf.mxu0  ;;  %v545_v42 = vpop.f32.mrf.mxu1 }
 0x2c6   :  { %v593_v57 = vadd.f32 %v4963_v22, %v4947_v8  ;;  %v576_v59 = vmul.f32 2.0, %v545_v42 }
 0x2c7   :  { %v4975_v31 = vpop.f32.mrf.mxu0 }
 0x2c8   :  { %v592_v46 = vadd.f32 %v4975_v31, %v4947_v8  ;;  %v609_v19 = vsub.f32 %v593_v57, %v577_v55  ;;  %v101_v55 = vrot.slane %v100_v45, 4 }
 0x2ca   :  { %v5009_v11 = vsub.f32 %v592_v46, %v576_v59  ;;  %v621_v32 = vmax.f32 %v617_v26, %v609_v19 }
 0x2cb   :  { %v4538_v54 = vpop.f32.mrf.mxu1 }
 0x2cc   :  { %v579_v60 = vmul.f32 2.0, %v4538_v54  ;;  %v620_v29 = vmax.f32 %v616_v17, %v5009_v11 }
 0x2cd   :  { %v5003_v37 = vpop.f32.mrf.mxu0  ;;  %v555_v5 = vpop.f32.mrf.mxu1 }
 0x2ce   :  { %v595_v12 = vadd.f32 %v5003_v37, %v4947_v8  ;;  %v578_v24 = vmul.f32 2.0, %v555_v5  ;;  %v624_v38 = vmax.f32 %v620_v29, %v621_v32  ;;  %v102_v5 = vadd.f32 %v101_v55, %v100_v45 }
 0x2cf   :  { %v5018_v18 = vpop.f32.mrf.mxu0 }
 0x2d0   :  { %v5020_v21 = vsub.f32 %v595_v12, %v579_v60  ;;  %v594_v25 = vadd.f32 %v5018_v18, %v4947_v8  ;;  %v103_v13 = vrot.slane %v102_v5, 2 }
 0x2d2   :  { %v5028_v30 = vsub.f32 %v594_v25, %v578_v24  ;;  %v623_v33 = vmax.f32 %v619_v27, %v5020_v21 }
 0x2d3   :  { %v5034_v53 = vpop.f32.mrf.mxu1 }
 0x2d4   :  { %v622_v36 = vmax.f32 %v618_v28, %v5028_v30 }
 0x2d5   :  { %v5036_v54 = vpop.f32.mrf.mxu0  ;;  %v5040_v60 = vpop.f32.mrf.mxu1 }
 0x2d6   :  { %v625_v40 = vmax.f32 %v622_v36, %v623_v33 }
 0x2d7   :  { %v5042_v1 = vpop.f32.mrf.mxu0 }
 0x2d8   :  { %v626_v41 = vmax.f32 %v624_v38, %v625_v40 }
 0x2da   :  { %v627_v42 = vrot.slane %v626_v41, 4 }
 0x2db   :  { %v5052_v39 = vpop.f32.mrf.mxu1 }
 0x2dc   :  { %v628_v43 = vmax.f32 %v626_v41, %v627_v42 }
 0x2dd   :  { %v5054_v12 = vpop.f32.mrf.mxu0 }
 0x2de   :  { %v629_v44 = vrot.slane %v628_v43, 2 }
 0x2e0   :  { %v630_v46 = vmax.f32 %v628_v43, %v629_v44 }
 0x2e2   :  { %v631_v57 = vrot.slane %v630_v46, 1 }
 0x2e4   :  { %v5038_v59 = vmax.f32 %v630_v46, %v631_v57 }
 0x2e6   :  { %vm633_vm4 = vcmp.eq.f32.partialorder %v4965_v23, %v5038_v59  ;;  %vm634_vm5 = vcmp.eq.f32.partialorder %v4961_v20, %v5038_v59  ;;  %vm635_vm6 = vcmp.eq.f32.partialorder %v598_v63, %v5038_v59  ;;  %vm636_vm7 = vcmp.eq.f32.partialorder %v599_v62, %v5038_v59  ;;  %v5079_v63 = vpop.f32.mrf.mxu1 }
 0x2e7   :  { %vm637_vm8 = vcmp.eq.f32.partialorder %v4981_v35, %v5038_v59  ;;  %vm638_vm9 = vcmp.eq.f32.partialorder %v4979_v34, %v5038_v59  ;;  %vm639_vm10 = vcmp.eq.f32.partialorder %v4993_v49, %v5038_v59  ;;  %vm640_vm11 = vcmp.eq.f32.partialorder %v4991_v47, %v5038_v59 }
 0x2e8   :  { %vm641_vm12 = vcmp.eq.f32.partialorder %v4995_v51, %v5038_v59  ;;  %vm642_vm13 = vcmp.eq.f32.partialorder %v5001_v2, %v5038_v59  ;;  %vm643_vm14 = vcmp.eq.f32.partialorder %v5007_v9, %v5038_v59  ;;  %vm644_vm15 = vcmp.eq.f32.partialorder %v5005_v6, %v5038_v59  ;;  %v5081_v2 = vpop.f32.mrf.mxu0 }
 0x2e9   :  { %vm646_vm0 = vcmp.eq.f32.partialorder %v609_v19, %v5038_v59  ;;  %v649_v20 = vsel %vm633_vm4, %v4927_v50, -inf  ;;  %v650_v23 = vsel %vm634_vm5, %v4925_v48, -inf  ;;  %v651_v34 = vsel %vm635_vm6, %v4933_v56, -inf }
 0x2ea   :  { %v652_v35 = vsel %vm636_vm7, %v4929_v52, -inf  ;;  %v653_v47 = vsel %vm637_vm8, %v4937_v61, -inf  ;;  %v654_v49 = vsel %vm638_vm9, %v4935_v58, -inf  ;;  %v655_v51 = vsel %vm639_vm10, %v4941_v3, -inf  ;;  %v4575_v61 = vpop.f32.mrf.mxu1 }
 0x2eb   :  { %v656_v62 = vsel %vm640_vm11, %v4939_v0, -inf  ;;  %v657_v50 = vsel %vm641_vm12, %v4945_v7, -inf  ;;  %v658_v48 = vsel %vm642_vm13, %v4943_v4, -inf  ;;  %v659_v56 = vsel %vm643_vm14, %v4955_v15, -inf  ;;  %v5096_v0 = vpop.f32.mrf.mxu0 }
 0x2ec   :  { %v660_v52 = vsel %vm644_vm15, %v4949_v10, -inf  ;;  %vm645_vm1 = vcmp.eq.f32.partialorder %v5009_v11, %v5038_v59  ;;  %vm647_vm2 = vcmp.eq.f32.partialorder %v5028_v30, %v5038_v59  ;;  %vm648_vm3 = vcmp.eq.f32.partialorder %v5020_v21, %v5038_v59  ;;  %v1080_v19 = vpop.f32.mrf.mxu1  ;;  %v5103_v21 = vpop.permute.xlu1 %1290 }
 0x2ed   :  { %v662_v58 = vsel %vm646_vm0, %v4963_v22, -inf  ;;  %v665_v3 = vmax.f32 %v649_v20, %v653_v47  ;;  %v666_v4 = vmax.f32 %v650_v23, %v654_v49  ;;  %v667_v7 = vmax.f32 %v651_v34, %v655_v51  ;;  %v5101_v22 = vpop.f32.mrf.mxu0  ;;  %v5121_v34 = vpop.permute.xlu0 %1270 }
 0x2ee   :  { %v668_v10 = vmax.f32 %v652_v35, %v656_v62  ;;  %v661_v14 = vsel %vm645_vm1, %v4975_v31, -inf  ;;  %v663_v16 = vsel %vm647_vm2, %v5018_v18, -inf  ;;  %v664_v17 = vsel %vm648_vm3, %v5003_v37, -inf  ;;  %v4578_v28 = vpop.f32.mrf.mxu1 }
 0x2ef   :  { %v669_v15 = vmax.f32 %v665_v3, %v657_v50  ;;  %v670_v6 = vmax.f32 %v666_v4, %v658_v48  ;;  %v671_v9 = vmax.f32 %v667_v7, %v659_v56  ;;  %v5105_v29 = vpop.f32.mrf.mxu0  ;;  %v1273_v30 = vlaneseq }
 0x2f0   :  { %v672_v11 = vmax.f32 %v668_v10, %v660_v52  ;;  %v104_v31 = vadd.f32 %v103_v13, %v102_v5  ;;  %v1090_v18 = vpop.f32.mrf.mxu1  ;;  %v5109_v40 = vpop.permute.xlu1 %1265  ;;  %v1140_v47 = vmul.f32 2.0, %v5034_v53  ;;  %v1139_v52 = vmul.f32 2.0, %v5040_v60 }
 0x2f1   :  { %v673_v24 = vmax.f32 %v669_v15, %v661_v14  ;;  %v674_v25 = vmax.f32 %v670_v6, %v662_v58  ;;  %v675_v26 = vmax.f32 %v671_v9, %v663_v16  ;;  %v5107_v38 = vpop.f32.mrf.mxu0  ;;  %v1274_v37 = vshrl.u32 %v1273_v30, 7  ;;  %v5141_v15 = vpop.permute.xlu0 %1314 }
 0x2f2   :  { %v676_v27 = vmax.f32 %v672_v11, %v664_v17  ;;  %v105_v42 = vrot.slane %v104_v31, 1  ;;  %v1144_v58 = vmul.f32 2.0, %v4575_v61  ;;  %v1143_v16 = vmul.f32 2.0, %v1080_v19 }
 0x2f3   :  { %v677_v32 = vmax.f32 %v673_v24, %v674_v25  ;;  %v4581_v43 = vpop.f32.mrf.mxu1  ;;  %v5113_v46 = vsub.s32 0, %v1274_v37  ;;  %v1141_v17 = vmul.f32 2.0, %v5079_v63 }
 0x2f4   :  { %v678_v33 = vmax.f32 %v675_v26, %v676_v27  ;;  %v5115_v57 = vpop.permute.xlu1 %1286  ;;  %v5117_v20 = vadd.f32 %v105_v42, %v104_v31  ;;  %v1146_v31 = vmul.f32 2.0, %v4578_v28 }
 0x2f5   :  { %v5111_v44 = vpop.f32.mrf.mxu0  ;;  %v1100_v5 = vpop.f32.mrf.mxu1  ;;  %v1276_v48 = vrot.slane %v4947_v8, %v5113_v46  ;;  %v1320_v53 = vrot.slane %v5038_v59, %v5113_v46  ;;  %v1142_v59 = vmul.f32 2.0, %v5052_v39 }
 0x2f6   :  { %v679_v36 = vmax.f32 %v677_v32, %v678_v33  ;;  %v1156_v49 = vadd.f32 %v5036_v54, %v5117_v20  ;;  %v1155_v51 = vadd.f32 %v5042_v1, %v5117_v20  ;;  %v1160_v3 = vadd.f32 %v5096_v0, %v5117_v20 }
 0x2f7   :  { %v5119_v23 = vpop.f32.mrf.mxu0  ;;  %v1159_v10 = vadd.f32 %v5101_v22, %v5117_v20  ;;  %v1281_v8 = vmul.f32 %v1276_v48, %v5109_v40  ;;  %v1283_v6 = vmul.f32 %v1276_v48, %v5121_v34  ;;  %v1158_v13 = vadd.f32 %v5054_v12, %v5117_v20 }
 0x2f8   :  { %v680_v41 = vrot.slane %v679_v36, 4  ;;  %v5137_v7 = vpop.permute.xlu1 %1310  ;;  %v5145_v60 = vsub.f32 %v1156_v49, %v1140_v47  ;;  %v5147_v61 = vsub.f32 %v1155_v51, %v1139_v52  ;;  %v1157_v24 = vadd.f32 %v5081_v2, %v5117_v20 }
 0x2f9   :  { %v5158_v25 = vsub.f32 %v1160_v3, %v1144_v58  ;;  %v1325_v26 = vmul.f32 %v1320_v53, %v5137_v7  ;;  %v5165_v33 = vsub.f32 %v1159_v10, %v1143_v16  ;;  %v1327_v19 = vmul.f32 %v1320_v53, %v5141_v15 }
 0x2fa   :  { %v681_v45 = vmax.f32 %v679_v36, %v680_v41  ;;  %v1162_v63 = vadd.f32 %v5105_v29, %v5117_v20  ;;  %v1161_v36 = vadd.f32 %v5107_v38, %v5117_v20  ;;  %v1163_v37 = vadd.f32 %v5119_v23, %v5117_v20 }
 0x2fb   :  { %v4584_v62 = vpop.f32.mrf.mxu1  ;;  %v1164_v47 = vadd.f32 %v5111_v44, %v5117_v20  ;;  %v1147_v49 = vmul.f32 2.0, %v1100_v5  ;;  %v1173_v16 = vsub.f32 %v1157_v24, %v1141_v17 }
 0x2fc   :  { %v682_v55 = vrot.slane %v681_v45, 2  ;;  %v1150_v28 = vmul.f32 2.0, %v4584_v62 }
 0x2fd   :  { %v5128_v50 = vpop.f32.mrf.mxu0  ;;  %v1110_v9 = vpop.f32.mrf.mxu1  ;;  %v5188_v53 = vsub.f32 %v1163_v37, %v1147_v49 }
 0x2fe   :  { %v683_v35 = vmax.f32 %v681_v45, %v682_v55  ;;  %v1145_v55 = vmul.f32 2.0, %v1090_v18  ;;  %v1166_v51 = vadd.f32 %v5128_v50, %v5117_v20  ;;  %v1149_v5 = vmul.f32 2.0, %v1110_v9 }
 0x2ff   :  { %v5149_v11 = vpop.f32.mrf.mxu0 }
 0x300   :  { %v684_v56 = vrot.slane %v683_v35, 1  ;;  %v1165_v58 = vadd.f32 %v5149_v11, %v5117_v20  ;;  %v1177_v3 = vsub.f32 %v1161_v36, %v1145_v55  ;;  %v1188_v36 = vmax.f32 %v5145_v60, %v5158_v25 }
 0x302   :  { %v685_v4 = vmax.f32 %v683_v35, %v684_v56  ;;  %v1148_v35 = vmul.f32 2.0, %v4581_v43  ;;  %v1178_v43 = vsub.f32 %v1162_v63, %v1146_v31  ;;  %v1182_v31 = vsub.f32 %v1166_v51, %v1150_v28 }
 0x303   :  { %v4587_v27 = vpop.f32.mrf.mxu1  ;;  %v1181_v63 = vsub.f32 %v1165_v58, %v1149_v5 }
 0x304   :  { %v1296_v14 = vrot.slane %v685_v4, %v5113_v46  ;;  %v1152_v4 = vmul.f32 2.0, %v4587_v27 }
 0x305   :  { %v5161_v30 = vpop.f32.mrf.mxu0  ;;  %v1120_v48 = vpop.f32.mrf.mxu1 }
 0x306   :  { %v1301_v39 = vmul.f32 %v1296_v14, %v5115_v57  ;;  %v1303_v32 = vmul.f32 %v1296_v14, %v5103_v21  ;;  %v1168_v10 = vadd.f32 %v5161_v30, %v5117_v20  ;;  %v1174_v14 = vsub.f32 %v1158_v13, %v1142_v59 }
 0x307   :  { %v5174_v41 = vpop.f32.mrf.mxu0  ;;  %v1189_v13 = vmax.f32 %v1173_v16, %v1177_v3 }
 0x308   :  { %v1305_v42 = vadd.f32 %v1301_v39, %v1281_v8  ;;  %v1307_v45 = vadd.f32 %v1303_v32, %v1283_v6  ;;  %v1167_v18 = vadd.f32 %v5174_v41, %v5117_v20  ;;  %v1151_v8 = vmul.f32 2.0, %v1120_v48 }
 0x309   :  { %v5194_v39 = vsub.f32 %v1164_v47, %v1148_v35  ;;  %v1190_v59 = vmax.f32 %v1174_v14, %v1178_v43  ;;  %v1184_v37 = vsub.f32 %v1168_v10, %v1152_v4  ;;  %v1193_v49 = vmax.f32 %v1189_v13, %v1181_v63 }
 0x30a   :  { %v5180_v56 = vadd.f32 %v1325_v26, %v1305_v42  ;;  %v5182_v52 = vadd.f32 %v1327_v19, %v1307_v45  ;;  %v1187_v26 = vmax.f32 %v5147_v61, %v5165_v33  ;;  %v5198_v9 = vsub.f32 %v1167_v18, %v1151_v8 }
 0x30b   :  { %v4590_v62 = vpop.f32.mrf.mxu1  ;;  %v1192_v35 = vmax.f32 %v1188_v36, %v5194_v39  ;;  %v1194_v47 = vmax.f32 %v1190_v59, %v1182_v31 }
 0x30c   :  { %7044 = vst [vmem:[#allocation5_spill] sm:$0xff] %v5180_v56  ;;  %v1154_v6 = vmul.f32 2.0, %v4590_v62  ;;  %v1191_v17 = vmax.f32 %v1187_v26, %v5188_v53 }
 0x30d   :  { %v5196_v32 = vpop.f32.mrf.mxu0  ;;  %v1130_v19 = vpop.f32.mrf.mxu1  ;;  %v1196_v48 = vmax.f32 %v1192_v35, %v1184_v37 }
 0x30e   :  { %v1170_v27 = vadd.f32 %v5196_v32, %v5117_v20  ;;  %v1153_v45 = vmul.f32 2.0, %v1130_v19  ;;  %v1195_v28 = vmax.f32 %v1191_v17, %v5198_v9 }
 0x30f   :  { %v902_v24 = vpop.f32.mrf.mxu0 }
 0x310   :  { %v1186_v42 = vsub.f32 %v1170_v27, %v1154_v6  ;;  %v1169_v55 = vadd.f32 %v902_v24, %v5117_v20  ;;  %v1199_v5 = vmax.f32 %v1195_v28, %v1196_v48 }
 0x312   :  { %v1185_v51 = vsub.f32 %v1169_v55, %v1153_v45  ;;  %v1198_v58 = vmax.f32 %v1194_v47, %v1186_v42 }
 0x314   :  { %v1197_v18 = vmax.f32 %v1193_v49, %v1185_v51 }
 0x316   :  { %v1200_v62 = vmax.f32 %v1197_v18, %v1198_v58 }
 0x318   :  { %v1201_v8 = vmax.f32 %v1199_v5, %v1200_v62 }
 0x31a   :  { %v1202_v26 = vrot.slane %v1201_v8, 4 }
 0x31c   :  { %v1203_v56 = vmax.f32 %v1201_v8, %v1202_v26  ;;  %v7045_v26 = vld [vmem:[#allocation5_spill] sm:$0xff] }
 0x31e   :  { %v1204_v4 = vrot.slane %v1203_v56, 2 }
 0x320   :  { %v1205_v10 = vmax.f32 %v1203_v56, %v1204_v4 }
 0x322   :  { %v1206_v6 = vrot.slane %v1205_v10, 1 }
 0x324   :  { %v1207_v19 = vmax.f32 %v1205_v10, %v1206_v6 }
 0x326   :  { %vm1208_vm4 = vcmp.eq.f32.partialorder %v5147_v61, %v1207_v19  ;;  %vm1209_vm5 = vcmp.eq.f32.partialorder %v5145_v60, %v1207_v19  ;;  %vm1210_vm6 = vcmp.eq.f32.partialorder %v1173_v16, %v1207_v19  ;;  %vm1211_vm7 = vcmp.eq.f32.partialorder %v1174_v14, %v1207_v19 }
 0x327   :  { %vm1212_vm8 = vcmp.eq.f32.partialorder %v5165_v33, %v1207_v19  ;;  %vm1213_vm9 = vcmp.eq.f32.partialorder %v5158_v25, %v1207_v19  ;;  %vm1214_vm10 = vcmp.eq.f32.partialorder %v1177_v3, %v1207_v19  ;;  %vm1215_vm11 = vcmp.eq.f32.partialorder %v1178_v43, %v1207_v19 }
 0x328   :  { %v1224_v27 = vsel %vm1208_vm4, %v5042_v1, -inf  ;;  %v1225_v36 = vsel %vm1209_vm5, %v5036_v54, -inf  ;;  %v1226_v56 = vsel %vm1210_vm6, %v5081_v2, -inf  ;;  %v1227_v59 = vsel %vm1211_vm7, %v5054_v12, -inf }
 0x329   :  { %v1228_v61 = vsel %vm1212_vm8, %v5101_v22, -inf  ;;  %v1229_v60 = vsel %vm1213_vm9, %v5096_v0, -inf  ;;  %v1230_v14 = vsel %vm1214_vm10, %v5107_v38, -inf  ;;  %v1231_v33 = vsel %vm1215_vm11, %v5105_v29, -inf }
 0x32a   :  { %vm1216_vm12 = vcmp.eq.f32.partialorder %v5188_v53, %v1207_v19  ;;  %vm1217_vm13 = vcmp.eq.f32.partialorder %v5194_v39, %v1207_v19  ;;  %vm1218_vm14 = vcmp.eq.f32.partialorder %v1181_v63, %v1207_v19  ;;  %vm1219_vm15 = vcmp.eq.f32.partialorder %v1182_v31, %v1207_v19 }
 0x32b   :  { %vm1220_vm0 = vcmp.eq.f32.partialorder %v5198_v9, %v1207_v19  ;;  %vm1221_vm1 = vcmp.eq.f32.partialorder %v1184_v37, %v1207_v19  ;;  %vm1222_vm2 = vcmp.eq.f32.partialorder %v1185_v51, %v1207_v19  ;;  %vm1223_vm3 = vcmp.eq.f32.partialorder %v1186_v42, %v1207_v19 }
 0x32c   :  { %v1240_v54 = vmax.f32 %v1224_v27, %v1228_v61  ;;  %v1241_v1 = vmax.f32 %v1225_v36, %v1229_v60  ;;  %v1242_v12 = vmax.f32 %v1226_v56, %v1230_v14  ;;  %v1243_v2 = vmax.f32 %v1227_v59, %v1231_v33 }
 0x32d   :  { %v1232_v0 = vsel %vm1216_vm12, %v5119_v23, -inf  ;;  %v1233_v22 = vsel %vm1217_vm13, %v5111_v44, -inf  ;;  %v1234_v29 = vsel %vm1218_vm14, %v5149_v11, -inf  ;;  %v1235_v38 = vsel %vm1219_vm15, %v5128_v50, -inf }
 0x32e   :  { %v1244_v25 = vmax.f32 %v1240_v54, %v1232_v0  ;;  %v1245_v43 = vmax.f32 %v1241_v1, %v1233_v22  ;;  %v1246_v3 = vmax.f32 %v1242_v12, %v1234_v29  ;;  %v1247_v53 = vmax.f32 %v1243_v2, %v1235_v38  ;;  %v1360_v0 = vld [vmem:[%s6986_s2 + $0x8] sm:$0xff] }
 0x32f   :  { %v1236_v16 = vsel %vm1220_vm0, %v5174_v41, -inf  ;;  %v1237_v39 = vsel %vm1221_vm1, %v5161_v30, -inf  ;;  %v1238_v31 = vsel %vm1222_vm2, %v902_v24, -inf  ;;  %v1239_v44 = vsel %vm1223_vm3, %v5196_v32, -inf  ;;  %v1368_v38 = vld [vmem:[%s6987_s3 + $0x8] sm:$0xff] }
 0x330   :  { %v1248_v23 = vmax.f32 %v1244_v25, %v1236_v16  ;;  %v1249_v11 = vmax.f32 %v1245_v43, %v1237_v39  ;;  %v1250_v63 = vmax.f32 %v1246_v3, %v1238_v31  ;;  %v1251_v50 = vmax.f32 %v1247_v53, %v1239_v44  ;;  %v1359_v25 = vld [vmem:[%s6986_s2] sm:$0xff] }
 0x331   :  { %v1280_v30 = vrot.slane %v5117_v20, %v5113_v46  ;;  %v1324_v32 = vrot.slane %v1207_v19, %v5113_v46  ;;  %v1367_v39 = vld [vmem:[%s6987_s3] sm:$0xff]  ;;  %vm1417_vm4 = vcmask 130048   ;;  %vm1891_vm5 = vcmask 523264  }
 0x332   :  { %v1252_v13 = vmax.f32 %v1248_v23, %v1249_v11  ;;  %v1253_v17 = vmax.f32 %v1250_v63, %v1251_v50  ;;  %v4753_v23 = vmov 0.0  }
 0x333   :  { %v1282_v37 = vmul.f32 %v1280_v30, %v5109_v40  ;;  %v1284_v42 = vmul.f32 %v1280_v30, %v5121_v34  ;;  %v1328_v58 = vmul.f32 %v1324_v32, %v5141_v15  ;;  %v1326_v5 = vmul.f32 %v1324_v32, %v5137_v7  ;;  %1506 = vmatprep.mubr.f32.mxu0 %v4753_v23 }
 0x334   :  { %v1254_v45 = vmax.f32 %v1252_v13, %v1253_v17  ;;  %v1339_v34 = vmul.f32 %v7045_v26, %v7045_v26  ;;  %2052 = vmatprep.mubr.f32.mxu1 %v4753_v23 }
 0x336   :  { %v1255_v55 = vrot.slane %v1254_v45, 4 }
 0x338   :  { %v1256_v35 = vmax.f32 %v1254_v45, %v1255_v55 }
 0x33a   :  { %v1257_v47 = vrot.slane %v1256_v35, 2 }
 0x33c   :  { %v1258_v9 = vmax.f32 %v1256_v35, %v1257_v47 }
 0x33e   :  { %v1259_v41 = vrot.slane %v1258_v9, 1 }
 0x340   :  { %v1260_v49 = vmax.f32 %v1258_v9, %v1259_v41 }
 0x342   :  { %v1300_v24 = vrot.slane %v1260_v49, %v5113_v46 }
 0x344   :  { %v1304_v28 = vmul.f32 %v1300_v24, %v5103_v21  ;;  %v1302_v51 = vmul.f32 %v1300_v24, %v5115_v57  ;;  %v1341_v21 = vmul.f32 %v5182_v52, %v5182_v52 }
 0x346   :  { %v1308_v48 = vadd.f32 %v1304_v28, %v1284_v42  ;;  %v1306_v18 = vadd.f32 %v1302_v51, %v1282_v37 }
 0x348   :  { %v1332_v62 = vadd.f32 %v1328_v58, %v1308_v48  ;;  %v1330_v20 = vadd.f32 %v1326_v5, %v1306_v18  ;;  %v1409_v48 = vld [vmem:[%s6988_s4] sm:$0xff]  ;;  %v1410_v58 = vld [vmem:[%s6988_s4 + $0x8] sm:$0xff]  ;;  %v1411_v18 = vld [vmem:[%s6988_s4 + $0x10] sm:$0xff] }
 0x349   :  { %v1412_v5 = vld [vmem:[%s6988_s4 + $0x18] sm:$0xff] }
 0x34a   :  { %v1336_v8 = vadd.f32 %v1332_v62, %v5182_v52  ;;  %v1333_v46 = vadd.f32 %v1330_v20, %v7045_v26  ;;  %v1342_v4 = vmul.f32 %v1332_v62, %v1332_v62  ;;  %v1340_v57 = vmul.f32 %v1330_v20, %v1330_v20 }
 0x34c   :  { %1337 = vadd.xlane.f32.xlu1 %v1336_v8  ;;  %1334 = vadd.xlane.f32.xlu0 %v1333_v46  ;;  %v1346_v40 = vadd.f32 %v1342_v4, %v1341_v21  ;;  %v1343_v15 = vadd.f32 %v1340_v57, %v1339_v34  ;;  %v1415_v8 = vld [vmem:[%s6988_s4 + $0x30] sm:$0xff] }
 0x350   :  { %1347 = vadd.xlane.f32.xlu0 %v1346_v40 }
 0x354   :  { %1344 = vadd.xlane.f32.xlu0 %v1343_v15 }
 0x3d5   :  { %v1338_v7 = vpop.xlane.xlu1 %1337  ;;  %v1335_v10 = vpop.xlane.xlu0 %1334 }
 0x3d6   :  { %v1350_v6 = vmul.f32 0.00390625, %v1338_v7  ;;  %v1349_v36 = vmul.f32 0.00390625, %v1335_v10 }
 0x3d8   :  { %v1354_v27 = vmul.f32 %v1350_v6, %v1350_v6  ;;  %v1353_v60 = vmul.f32 %v1349_v36, %v1349_v36 }
 0x3d9   :  { %v1348_v19 = vpop.xlane.xlu0 %1347 }
 0x3da   :  { %v1352_v56 = vmul.f32 0.00390625, %v1348_v19 }
 0x3dc   :  { %v1356_v59 = vsub.f32 %v1352_v56, %v1354_v27 }
 0x3dd   :  { %v1345_v61 = vpop.xlane.xlu0 %1344 }
 0x3de   :  { %v1358_v14 = vmax.f32 %v1356_v59, 0.0  ;;  %v1351_v33 = vmul.f32 0.00390625, %v1345_v61 }
 0x3e0   :  { %v1362_v54 = vadd.f32 1e-05, %v1358_v14  ;;  %v1355_v1 = vsub.f32 %v1351_v33, %v1353_v60 }
 0x3e2   :  { %4611 = vrsqrt.f32 %v1362_v54  ;;  %v1357_v12 = vmax.f32 %v1355_v1, 0.0 }
 0x3e4   :  { %v1361_v2 = vadd.f32 1e-05, %v1357_v12 }
 0x3e6   :  { %4613 = vrsqrt.f32 %v1361_v2 }
 0x3ef   :  { %v4612_v22 = vpop.eup %4611 }
 0x3f0   :  { %v1366_v29 = vmul.f32 %v4612_v22, %v1360_v0 }
 0x3f2   :  { %1380 = vperm.xlu1 %4605, %v1366_v29   ;;  %v1370_v43 = vmul.f32 %v1366_v29, %v1350_v6 }
 0x3f3   :  { %v4614_v3 = vpop.eup %4613 }
 0x3f4   :  { %v1372_v53 = vsub.f32 %v1368_v38, %v1370_v43  ;;  %v1365_v16 = vmul.f32 %v4614_v3, %v1359_v25 }
 0x3f6   :  { %1394 = vperm.xlu1 %4605, %v1372_v53   ;;  %1375 = vperm.xlu0 %4606, %v1365_v16   ;;  %v1369_v31 = vmul.f32 %v1365_v16, %v1349_v36 }
 0x3f8   :  { %v1371_v44 = vsub.f32 %v1367_v39, %v1369_v31 }
 0x3fa   :  { %1389 = vperm.xlu1 %4605, %v1371_v44  }
 0x46d   :  { %v1381_v11 = vpop.permute.xlu1 %1380 }
 0x46e   :  { %v1385_v63 = vmul.f32 %v1381_v11, %v5182_v52  ;;  %v1386_v50 = vmul.f32 %v1381_v11, %v1332_v62  ;;  %v1413_v62 = vld [vmem:[%s6988_s4 + $0x20] sm:$0xff] }
 0x471   :  { %v1395_v13 = vpop.permute.xlu1 %1394  ;;  %v1376_v17 = vpop.permute.xlu0 %1375 }
 0x472   :  { %v1399_v45 = vadd.f32 %v1395_v13, %v1385_v63  ;;  %v1400_v55 = vadd.f32 %v1395_v13, %v1386_v50  ;;  %v1383_v9 = vmul.f32 %v1376_v17, %v7045_v26  ;;  %v1384_v41 = vmul.f32 %v1376_v17, %v1330_v20  ;;  %v1414_v20 = vld [vmem:[%s6988_s4 + $0x28] sm:$0xff]  ;;  %v1416_v26 = vld [vmem:[%s6988_s4 + $0x38] sm:$0xff] }
 0x474   :  { %v1403_v35 = vmul.f32 0.2, %v1399_v45  ;;  %v1404_v47 = vmul.f32 0.2, %v1400_v55 }
 0x475   :  { %v1390_v49 = vpop.permute.xlu1 %1389 }
 0x476   :  { %v1407_v30 = vmax.f32 %v1399_v45, %v1403_v35  ;;  %v1397_v24 = vadd.f32 %v1390_v49, %v1383_v9  ;;  %v1398_v32 = vadd.f32 %v1390_v49, %v1384_v41  ;;  %v1408_v37 = vmax.f32 %v1400_v55, %v1404_v47 }
 0x478   :  { %v1401_v42 = vmul.f32 0.2, %v1397_v24  ;;  %v1402_v28 = vmul.f32 0.2, %v1398_v32  ;;  %1470 = vmatprep.subr.mxu0 %v1408_v37 }
 0x479   :  { %1471 = vmatpush1.msra.mxu0 %v1407_v30 }
 0x47a   :  { %v1405_v52 = vmax.f32 %v1397_v24, %v1401_v42  ;;  %v1406_v51 = vmax.f32 %v1398_v32, %v1402_v28 }
 0x47c   :  { %1472 = vmatprep.subr.mxu0 %v1406_v51 }
 0x47d   :  { %1473 = vmatpush1.msra.mxu0 %v1405_v52 }
 0x47e   :  { %4379 = vmatmul.mubr.msk.f32.vlgmr.msra.gmra.mxu0 %vm1417_vm4, %v1409_v48 }
 0x47f   :  { %1512 = vmatprep.mubr.f32.mxu0 %v4753_v23 }
 0x482   :  { %4380 = vmatmul.mubr.msk.f32.gmra.mxu0 %vm1417_vm4, %v1410_v58 }
 0x483   :  { %1518 = vmatprep.mubr.f32.mxu0 %v4753_v23 }
 0x486   :  { %4381 = vmatmul.mubr.msk.f32.gmra.mxu0 %vm1417_vm4, %v1411_v18 }
 0x487   :  { %1524 = vmatprep.mubr.f32.mxu0 %v4753_v23 }
 0x48a   :  { %4382 = vmatmul.mubr.msk.f32.gmra.mxu0 %vm1417_vm4, %v1412_v5 }
 0x48b   :  { %1530 = vmatprep.mubr.f32.mxu0 %v4753_v23 }
 0x48e   :  { %4383 = vmatmul.mubr.msk.f32.gmra.mxu0 %vm1417_vm4, %v1413_v62 }
 0x48f   :  { %1536 = vmatprep.mubr.f32.mxu0 %v4753_v23 }
 0x492   :  { %4384 = vmatmul.mubr.msk.f32.gmra.mxu0 %vm1417_vm4, %v1414_v20 }
 0x493   :  { %1542 = vmatprep.mubr.f32.mxu0 %v4753_v23 }
 0x496   :  { %4385 = vmatmul.mubr.msk.f32.gmra.mxu0 %vm1417_vm4, %v1415_v8 }
 0x497   :  { %1548 = vmatprep.mubr.f32.mxu0 %v4753_v23 }
 0x49a   :  { %4386 = vmatmul.mubr.msk.f32.gmra.mxu0 %vm1417_vm4, %v1416_v26 }
 0x53e   :  { %v5306_v46 = vpop.f32.mrf.mxu0 }
 0x53f   :  { %v1579_v63 = vmul.f32 %v5306_v46, %v5306_v46 }
 0x540   :  { %v5308_v4 = vpop.f32.mrf.mxu0 }
 0x541   :  { %v1555_v16 = vadd.f32 %v5308_v4, %v5306_v46  ;;  %v1580_v31 = vmul.f32 %v5308_v4, %v5308_v4 }
 0x542   :  { %v5310_v21 = vpop.f32.mrf.mxu0 }
 0x543   :  { %v1595_v13 = vadd.f32 %v1580_v31, %v1579_v63  ;;  %v1581_v49 = vmul.f32 %v5310_v21, %v5310_v21 }
 0x544   :  { %v5312_v40 = vpop.f32.mrf.mxu0 }
 0x545   :  { %v1558_v3 = vadd.f32 %v5312_v40, %v5310_v21  ;;  %v1582_v9 = vmul.f32 %v5312_v40, %v5312_v40 }
 0x546   :  { %v5314_v57 = vpop.f32.mrf.mxu0 }
 0x547   :  { %v1583_v47 = vmul.f32 %v5314_v57, %v5314_v57  ;;  %v1598_v30 = vadd.f32 %v1582_v9, %v1581_v49 }
 0x548   :  { %v5316_v34 = vpop.f32.mrf.mxu0 }
 0x549   :  { %v1561_v22 = vadd.f32 %v5316_v34, %v5314_v57  ;;  %v1584_v55 = vmul.f32 %v5316_v34, %v5316_v34 }
 0x54a   :  { %v5318_v15 = vpop.f32.mrf.mxu0 }
 0x54b   :  { %v1585_v45 = vmul.f32 %v5318_v15, %v5318_v15  ;;  %v1601_v41 = vadd.f32 %v1584_v55, %v1583_v47 }
 0x54c   :  { %v5320_v7 = vpop.f32.mrf.mxu0 }
 0x54d   :  { %v1564_v10 = vadd.f32 %v5320_v7, %v5318_v15  ;;  %v1586_v50 = vmul.f32 %v5320_v7, %v5320_v7 }
 0x54e   :  { %v5324_v6 = vpop.f32.mrf.mxu0 }
 0x54f   :  { %1565 = vadd.xlane.f32.xlu0 %v1564_v10  ;;  %v1587_v59 = vmul.f32 %v5324_v6, %v5324_v6  ;;  %v1604_v35 = vadd.f32 %v1586_v50, %v1585_v45 }
 0x550   :  { %v5326_v19 = vpop.f32.mrf.mxu0 }
 0x551   :  { %v1567_v27 = vadd.f32 %v5326_v19, %v5324_v6  ;;  %v1588_v36 = vmul.f32 %v5326_v19, %v5326_v19 }
 0x552   :  { %v5332_v56 = vpop.f32.mrf.mxu0 }
 0x553   :  { %1568 = vadd.xlane.f32.xlu1 %v1567_v27  ;;  %v1607_v60 = vadd.f32 %v1588_v36, %v1587_v59  ;;  %v1589_v12 = vmul.f32 %v5332_v56, %v5332_v56 }
 0x554   :  { %v5336_v61 = vpop.f32.mrf.mxu0 }
 0x555   :  { %v1570_v54 = vadd.f32 %v5336_v61, %v5332_v56  ;;  %v1590_v2 = vmul.f32 %v5336_v61, %v5336_v61 }
 0x556   :  { %v5338_v14 = vpop.f32.mrf.mxu0 }
 0x557   :  { %1608 = vadd.xlane.f32.xlu1 %v1607_v60  ;;  %v1610_v0 = vadd.f32 %v1590_v2, %v1589_v12  ;;  %v1591_v29 = vmul.f32 %v5338_v14, %v5338_v14 }
 0x558   :  { %v5340_v33 = vpop.f32.mrf.mxu0 }
 0x559   :  { %v1573_v1 = vadd.f32 %v5340_v33, %v5338_v14  ;;  %v1592_v38 = vmul.f32 %v5340_v33, %v5340_v33 }
 0x55a   :  { %v5356_v25 = vpop.f32.mrf.mxu0 }
 0x55b   :  { %1571 = vadd.xlane.f32.xlu1 %v1570_v54  ;;  %1574 = vadd.xlane.f32.xlu0 %v1573_v1  ;;  %v1613_v43 = vadd.f32 %v1592_v38, %v1591_v29  ;;  %v1593_v44 = vmul.f32 %v5356_v25, %v5356_v25 }
 0x55c   :  { %v5360_v53 = vpop.f32.mrf.mxu0 }
 0x55d   :  { %v1576_v39 = vadd.f32 %v5360_v53, %v5356_v25  ;;  %v1594_v11 = vmul.f32 %v5360_v53, %v5360_v53 }
 0x55f   :  { %1611 = vadd.xlane.f32.xlu1 %v1610_v0  ;;  %1562 = vadd.xlane.f32.xlu0 %v1561_v22  ;;  %v1616_v17 = vadd.f32 %v1594_v11, %v1593_v44 }
 0x563   :  { %1614 = vadd.xlane.f32.xlu1 %v1613_v43  ;;  %1559 = vadd.xlane.f32.xlu0 %v1558_v3  ;;  %v1663_v3 = vld [vmem:[%s6989_s5 + $0x20] sm:$0xff] }
 0x567   :  { %1556 = vadd.xlane.f32.xlu0 %v1555_v16  ;;  %1577 = vadd.xlane.f32.xlu1 %v1576_v39 }
 0x56b   :  { %1596 = vadd.xlane.f32.xlu0 %v1595_v13  ;;  %1617 = vadd.xlane.f32.xlu1 %v1616_v17  ;;  %v1695_v13 = vld [vmem:[%s6990_s6 + $0x20] sm:$0xff] }
 0x56f   :  { %1605 = vadd.xlane.f32.xlu1 %v1604_v35 }
 0x573   :  { %1602 = vadd.xlane.f32.xlu1 %v1601_v41 }
 0x577   :  { %1599 = vadd.xlane.f32.xlu1 %v1598_v30  ;;  %v1664_v30 = vld [vmem:[%s6989_s5 + $0x28] sm:$0xff] }
 0x5d8   :  { %v1566_v51 = vpop.xlane.xlu0 %1565 }
 0x5d9   :  { %v5399_v16 = vmul.f32 0.00390625, %v1566_v51 }
 0x5db   :  { %v1638_v17 = vmul.f32 %v5399_v16, %v5399_v16 }
 0x5dc   :  { %v1569_v24 = vpop.xlane.xlu1 %1568 }
 0x5dd   :  { %v1623_v32 = vmul.f32 0.00390625, %v1569_v24 }
 0x5df   :  { %v1639_v42 = vmul.f32 %v1623_v32, %v1623_v32 }
 0x5e0   :  { %v1609_v37 = vpop.xlane.xlu1 %1608 }
 0x5e1   :  { %v1631_v28 = vmul.f32 0.00390625, %v1609_v37 }
 0x5e3   :  { %v1647_v52 = vsub.f32 %v1631_v28, %v1639_v42 }
 0x5e4   :  { %v1572_v48 = vpop.xlane.xlu1 %1571  ;;  %v1575_v62 = vpop.xlane.xlu0 %1574 }
 0x5e5   :  { %v1655_v58 = vmax.f32 %v1647_v52, 0.0  ;;  %v5386_v18 = vmul.f32 0.00390625, %v1572_v48  ;;  %v5390_v26 = vmul.f32 0.00390625, %v1575_v62 }
 0x5e7   :  { %v1671_v5 = vadd.f32 1e-05, %v1655_v58  ;;  %v1640_v8 = vmul.f32 %v5386_v18, %v5386_v18  ;;  %v1641_v59 = vmul.f32 %v5390_v26, %v5390_v26 }
 0x5e8   :  { %v1612_v20 = vpop.xlane.xlu1 %1611  ;;  %v1563_v0 = vpop.xlane.xlu0 %1562 }
 0x5e9   :  { %4615 = vrsqrt.f32 %v1671_v5  ;;  %v1632_v10 = vmul.f32 0.00390625, %v1612_v20  ;;  %v5410_v45 = vmul.f32 0.00390625, %v1563_v0  ;;  %v1665_v20 = vld [vmem:[%s6989_s5 + $0x30] sm:$0xff]  ;;  %v1696_v0 = vld [vmem:[%s6990_s6 + $0x28] sm:$0xff] }
 0x5eb   :  { %v1648_v27 = vsub.f32 %v1632_v10, %v1640_v8  ;;  %v1637_v24 = vmul.f32 %v5410_v45, %v5410_v45 }
 0x5ec   :  { %v1615_v36 = vpop.xlane.xlu1 %1614  ;;  %v1560_v44 = vpop.xlane.xlu0 %1559 }
 0x5ed   :  { %v1656_v60 = vmax.f32 %v1648_v27, 0.0  ;;  %v1633_v54 = vmul.f32 0.00390625, %v1615_v36  ;;  %v5418_v37 = vmul.f32 0.00390625, %v1560_v44  ;;  %v1697_v44 = vld [vmem:[%s6990_s6 + $0x30] sm:$0xff] }
 0x5ef   :  { %v1672_v1 = vadd.f32 1e-05, %v1656_v60  ;;  %v1649_v12 = vsub.f32 %v1633_v54, %v1641_v59  ;;  %v1636_v8 = vmul.f32 %v5418_v37, %v5418_v37 }
 0x5f0   :  { %v1578_v2 = vpop.xlane.xlu1 %1577  ;;  %v1557_v42 = vpop.xlane.xlu0 %1556 }
 0x5f1   :  { %4617 = vrsqrt.f32 %v1672_v1  ;;  %v1657_v22 = vmax.f32 %v1649_v12, 0.0  ;;  %v5394_v38 = vmul.f32 0.00390625, %v1578_v2 }
 0x5f3   :  { %v1673_v29 = vadd.f32 1e-05, %v1657_v22  ;;  %v1642_v63 = vmul.f32 %v5394_v38, %v5394_v38  ;;  %v1619_v22 = vmul.f32 0.00390625, %v1557_v42 }
 0x5f4   :  { %v1618_v43 = vpop.xlane.xlu1 %1617  ;;  %v1597_v60 = vpop.xlane.xlu0 %1596 }
 0x5f5   :  { %4619 = vrsqrt.f32 %v1673_v29  ;;  %v1634_v31 = vmul.f32 0.00390625, %v1618_v43  ;;  %v1627_v43 = vmul.f32 0.00390625, %v1597_v60 }
 0x5f6   :  { %v4616_v39 = vpop.eup %4615 }
 0x5f7   :  { %v5401_v11 = vmul.f32 %v4616_v39, %v1663_v3  ;;  %v1650_v47 = vsub.f32 %v1634_v31, %v1642_v63  ;;  %v1635_v63 = vmul.f32 %v1619_v22, %v1619_v22 }
 0x5f8   :  { %v1606_v50 = vpop.xlane.xlu1 %1605 }
 0x5f9   :  { %v1630_v55 = vmul.f32 0.00390625, %v1606_v50  ;;  %v1703_v35 = vmul.f32 %v5401_v11, %v1623_v32  ;;  %v1658_v48 = vmax.f32 %v1650_v47, 0.0  ;;  %v1661_v47 = vld [vmem:[%s6989_s5 + $0x10] sm:$0xff] }
 0x5fb   :  { %v1646_v9 = vsub.f32 %v1630_v55, %v1638_v17  ;;  %v1711_v41 = vsub.f32 %v1695_v13, %v1703_v35  ;;  %v1674_v59 = vadd.f32 1e-05, %v1658_v48  ;;  %v1662_v13 = vld [vmem:[%s6989_s5 + $0x18] sm:$0xff] }
 0x5fc   :  { %v1603_v49 = vpop.xlane.xlu1 %1602 }
 0x5fd   :  { %v1654_v28 = vmax.f32 %v1646_v9, 0.0  ;;  %v1629_v52 = vmul.f32 0.00390625, %v1603_v49  ;;  %1793 = vperm.xlu0 %4606, %v1711_v41  }
 0x5fe   :  { %v4618_v51 = vpop.eup %4617 }
 0x5ff   :  { %v1670_v32 = vadd.f32 1e-05, %v1654_v28  ;;  %v1645_v58 = vsub.f32 %v1629_v52, %v1637_v24  ;;  %v1688_v5 = vmul.f32 %v4618_v51, %v1664_v30  ;;  %v1693_v28 = vld [vmem:[%s6990_s6 + $0x10] sm:$0xff]  ;;  %v1666_v52 = vld [vmem:[%s6989_s5 + $0x38] sm:$0xff]  ;;  %v1660_v51 = vld [vmem:[%s6989_s5 + $0x8] sm:$0xff] }
 0x600   :  { %v1600_v62 = vpop.xlane.xlu1 %1599 }
 0x601   :  { %4621 = vrsqrt.f32 %v1670_v32  ;;  %v1653_v10 = vmax.f32 %v1645_v58, 0.0  ;;  %v1628_v27 = vmul.f32 0.00390625, %v1600_v62  ;;  %v1704_v2 = vmul.f32 %v1688_v5, %v5386_v18 }
 0x602   :  { %v4620_v36 = vpop.eup %4619  ;;  %v1643_v18 = vsub.f32 %v1627_v43, %v1635_v63 }
 0x603   :  { %v1669_v54 = vadd.f32 1e-05, %v1653_v10  ;;  %v1644_v1 = vsub.f32 %v1628_v27, %v1636_v8  ;;  %v1689_v12 = vmul.f32 %v4620_v36, %v1665_v20  ;;  %v1712_v31 = vsub.f32 %v1696_v0, %v1704_v2  ;;  %v1692_v20 = vld [vmem:[%s6990_s6 + $0x8] sm:$0xff] }
 0x604   :  { %v1651_v55 = vmax.f32 %v1643_v18, 0.0 }
 0x605   :  { %4623 = vrsqrt.f32 %v1669_v54  ;;  %v1652_v29 = vmax.f32 %v1644_v1, 0.0  ;;  %1747 = vperm.xlu0 %4606, %v1689_v12   ;;  %v1705_v39 = vmul.f32 %v1689_v12, %v5390_v26  ;;  %v1694_v26 = vld [vmem:[%s6990_s6 + $0x18] sm:$0xff] }
 0x606   :  { %4625 = vrsqrt.f32 %v1674_v59  ;;  %v1667_v49 = vadd.f32 1e-05, %v1651_v55  ;;  %v1659_v59 = vld [vmem:[%s6989_s5] sm:$0xff] }
 0x607   :  { %v1668_v3 = vadd.f32 1e-05, %v1652_v29  ;;  %v1713_v50 = vsub.f32 %v1697_v44, %v1705_v39 }
 0x609   :  { %4627 = vrsqrt.f32 %v1668_v3  ;;  %1798 = vperm.xlu0 %4606, %v1712_v31  }
 0x60a   :  { %4629 = vrsqrt.f32 %v1667_v49 }
 0x60d   :  { %1803 = vperm.xlu0 %4606, %v1713_v50  }
 0x60e   :  { %v4622_v17 = vpop.eup %4621 }
 0x60f   :  { %v1686_v35 = vmul.f32 %v4622_v17, %v1662_v13 }
 0x611   :  { %1732 = vperm.xlu1 %4605, %v1686_v35   ;;  %v1702_v9 = vmul.f32 %v1686_v35, %v5399_v16 }
 0x612   :  { %v4624_v41 = vpop.eup %4623 }
 0x613   :  { %v1710_v30 = vsub.f32 %v1694_v26, %v1702_v9  ;;  %v1685_v24 = vmul.f32 %v4624_v41, %v1661_v47  ;;  %v4626_v42 = vpop.eup %4625 }
 0x614   :  { %v1690_v58 = vmul.f32 %v4626_v42, %v1666_v52 }
 0x615   :  { %1737 = vperm.xlu1 %4605, %v5401_v11   ;;  %1788 = vperm.xlu0 %4606, %v1710_v30   ;;  %v1701_v16 = vmul.f32 %v1685_v24, %v5410_v45  ;;  %v1698_v11 = vld [vmem:[%s6990_s6 + $0x38] sm:$0xff] }
 0x616   :  { %v4628_v48 = vpop.eup %4627  ;;  %v1706_v27 = vmul.f32 %v1690_v58, %v5394_v38  ;;  %v1691_v38 = vld [vmem:[%s6990_s6] sm:$0xff] }
 0x617   :  { %v1709_v32 = vsub.f32 %v1693_v28, %v1701_v16  ;;  %v1684_v62 = vmul.f32 %v4628_v48, %v1660_v51  ;;  %v4630_v36 = vpop.eup %4629 }
 0x618   :  { %v1714_v45 = vsub.f32 %v1698_v11, %v1706_v27 }
 0x619   :  { %1742 = vperm.xlu1 %4605, %v1688_v5   ;;  %1783 = vperm.xlu0 %4606, %v1709_v32   ;;  %v1700_v8 = vmul.f32 %v1684_v62, %v5418_v37  ;;  %v1683_v5 = vmul.f32 %v4630_v36, %v1659_v59 }
 0x61b   :  { %v1708_v10 = vsub.f32 %v1692_v20, %v1700_v8  ;;  %v1699_v37 = vmul.f32 %v1683_v5, %v1619_v22 }
 0x61d   :  { %1752 = vperm.xlu1 %4605, %v1690_v58   ;;  %1778 = vperm.xlu0 %4606, %v1708_v10   ;;  %v1707_v60 = vsub.f32 %v1691_v38, %v1699_v37 }
 0x621   :  { %1808 = vperm.xlu1 %4605, %v1714_v45  }
 0x625   :  { %1727 = vperm.xlu1 %4605, %v1685_v24  }
 0x629   :  { %1722 = vperm.xlu1 %4605, %v1684_v62  }
 0x62d   :  { %1717 = vperm.xlu1 %4605, %v1683_v5  }
 0x631   :  { %1773 = vperm.xlu1 %4605, %v1707_v60  }
 0x678   :  { %v1794_v54 = vpop.permute.xlu0 %1793 }
 0x680   :  { %v1748_v1 = vpop.permute.xlu0 %1747 }
 0x681   :  { %v1767_v3 = vmul.f32 %v1748_v1, %v5338_v14  ;;  %v1768_v22 = vmul.f32 %v1748_v1, %v5340_v33 }
 0x684   :  { %v1799_v2 = vpop.permute.xlu0 %1798 }
 0x688   :  { %v1804_v43 = vpop.permute.xlu0 %1803 }
 0x689   :  { %v1823_v44 = vadd.f32 %v1804_v43, %v1767_v3  ;;  %v1824_v50 = vadd.f32 %v1804_v43, %v1768_v22 }
 0x68b   :  { %v1839_v9 = vmul.f32 0.2, %v1823_v44  ;;  %v1840_v49 = vmul.f32 0.2, %v1824_v50 }
 0x68c   :  { %v1733_v12 = vpop.permute.xlu1 %1732 }
 0x68d   :  { %v1762_v33 = vmul.f32 %v1733_v12, %v5320_v7  ;;  %v1856_v62 = vmax.f32 %v1824_v50, %v1840_v49  ;;  %v1855_v8 = vmax.f32 %v1823_v44, %v1839_v9  ;;  %v1865_v9 = vld [vmem:[%s6991_s7 + $0x30] sm:$0xff]  ;;  %v1868_v49 = vld [vmem:[%s6991_s7 + $0x48] sm:$0xff] }
 0x690   :  { %v1738_v0 = vpop.permute.xlu1 %1737  ;;  %v1789_v63 = vpop.permute.xlu0 %1788 }
 0x691   :  { %v1764_v13 = vmul.f32 %v1738_v0, %v5326_v19  ;;  %v1763_v35 = vmul.f32 %v1738_v0, %v5324_v6  ;;  %v1761_v19 = vmul.f32 %v1733_v12, %v5318_v15  ;;  %v1818_v42 = vadd.f32 %v1789_v63, %v1762_v33  ;;  %v1866_v33 = vld [vmem:[%s6991_s7 + $0x38] sm:$0xff] }
 0x693   :  { %v1820_v30 = vadd.f32 %v1794_v54, %v1764_v13  ;;  %v1817_v32 = vadd.f32 %v1789_v63, %v1761_v19  ;;  %v1834_v11 = vmul.f32 0.2, %v1818_v42  ;;  %v1872_v19 = vld [vmem:[%s6991_s7 + $0x68] sm:$0xff] }
 0x694   :  { %v1743_v29 = vpop.permute.xlu1 %1742  ;;  %v1784_v28 = vpop.permute.xlu0 %1783 }
 0x695   :  { %v1766_v39 = vmul.f32 %v1743_v29, %v5336_v61  ;;  %v1765_v18 = vmul.f32 %v1743_v29, %v5332_v56  ;;  %v1836_v20 = vmul.f32 0.2, %v1820_v30  ;;  %v1850_v0 = vmax.f32 %v1818_v42, %v1834_v11  ;;  %v1873_v42 = vld [vmem:[%s6991_s7 + $0x70] sm:$0xff] }
 0x697   :  { %v1822_v26 = vadd.f32 %v1799_v2, %v1766_v39  ;;  %v1821_v41 = vadd.f32 %v1799_v2, %v1765_v18  ;;  %v1852_v60 = vmax.f32 %v1820_v30, %v1836_v20  ;;  %v1869_v30 = vld [vmem:[%s6991_s7 + $0x50] sm:$0xff]  ;;  %v1886_v20 = vld [vmem:[%s6991_s7 + $0xd8] sm:$0xff] }
 0x698   :  { %v1753_v31 = vpop.permute.xlu1 %1752  ;;  %v1779_v59 = vpop.permute.xlu0 %1778 }
 0x699   :  { %v1769_v17 = vmul.f32 %v1753_v31, %v5356_v25  ;;  %v1770_v55 = vmul.f32 %v1753_v31, %v5360_v53  ;;  %v1819_v25 = vadd.f32 %v1794_v54, %v1763_v35  ;;  %v1838_v52 = vmul.f32 0.2, %v1822_v26 }
 0x69a   :  { %v1837_v7 = vmul.f32 0.2, %v1821_v41 }
 0x69b   :  { %v1835_v10 = vmul.f32 0.2, %v1819_v25 }
 0x69c   :  { %v1809_v14 = vpop.permute.xlu1 %1808  ;;  %v1853_v5 = vmax.f32 %v1821_v41, %v1837_v7  ;;  %v1867_v41 = vld [vmem:[%s6991_s7 + $0x40] sm:$0xff] }
 0x69d   :  { %v1825_v47 = vadd.f32 %v1809_v14, %v1769_v17  ;;  %v1826_v61 = vadd.f32 %v1809_v14, %v1770_v55  ;;  %v1851_v2 = vmax.f32 %v1819_v25, %v1835_v10  ;;  %v1862_v14 = vld [vmem:[%s6991_s7 + $0x18] sm:$0xff]  ;;  %v1883_v7 = vld [vmem:[%s6991_s7 + $0xc0] sm:$0xff]  ;;  %v1888_v10 = vld [vmem:[%s6991_s7 + $0xe8] sm:$0xff] }
 0x69e   :  { %v1874_v25 = vld [vmem:[%s6991_s7 + $0x78] sm:$0xff] }
 0x69f   :  { %v1841_v56 = vmul.f32 0.2, %v1825_v47  ;;  %v1842_v24 = vmul.f32 0.2, %v1826_v61 }
 0x6a0   :  { %v1728_v53 = vpop.permute.xlu1 %1727 }
 0x6a1   :  { %v1857_v6 = vmax.f32 %v1825_v47, %v1841_v56  ;;  %v1759_v51 = vmul.f32 %v1728_v53, %v5314_v57  ;;  %v1760_v16 = vmul.f32 %v1728_v53, %v5316_v34  ;;  %v1858_v48 = vmax.f32 %v1826_v61, %v1842_v24  ;;  %v1863_v47 = vld [vmem:[%s6991_s7 + $0x20] sm:$0xff]  ;;  %v1864_v61 = vld [vmem:[%s6991_s7 + $0x28] sm:$0xff]  ;;  %v1870_v56 = vld [vmem:[%s6991_s7 + $0x58] sm:$0xff] }
 0x6a2   :  { %v1854_v57 = vmax.f32 %v1822_v26, %v1838_v52  ;;  %v1833_v34 = vmul.f32 0.2, %v1817_v32  ;;  %v1861_v26 = vld [vmem:[%s6991_s7 + $0x10] sm:$0xff]  ;;  %v1871_v24 = vld [vmem:[%s6991_s7 + $0x60] sm:$0xff]  ;;  %v1876_v53 = vld [vmem:[%s6991_s7 + $0x88] sm:$0xff] }
 0x6a3   :  { %v1816_v58 = vadd.f32 %v1784_v28, %v1760_v16  ;;  %2004 = vmatprep.subr.mxu1 %v1858_v48  ;;  %v1815_v15 = vadd.f32 %v1784_v28, %v1759_v51  ;;  %v1875_v28 = vld [vmem:[%s6991_s7 + $0x80] sm:$0xff]  ;;  %v1877_v52 = vld [vmem:[%s6991_s7 + $0x90] sm:$0xff]  ;;  %v1880_v16 = vld [vmem:[%s6991_s7 + $0xa8] sm:$0xff] }
 0x6a4   :  { %2005 = vmatpush1.msra.mxu1 %v1857_v6  ;;  %v1723_v27 = vpop.permute.xlu1 %1722  ;;  %v1849_v29 = vmax.f32 %v1817_v32, %v1833_v34  ;;  %v1878_v6 = vld [vmem:[%s6991_s7 + $0x98] sm:$0xff]  ;;  %v1879_v51 = vld [vmem:[%s6991_s7 + $0xa0] sm:$0xff]  ;;  %v1881_v48 = vld [vmem:[%s6991_s7 + $0xb0] sm:$0xff] }
 0x6a5   :  { %v1757_v45 = vmul.f32 %v1723_v27, %v5310_v21  ;;  %v1758_v36 = vmul.f32 %v1723_v27, %v5312_v40  ;;  %2006 = vmatprep.subr.mxu1 %v1856_v62  ;;  %v1832_v54 = vmul.f32 0.2, %v1816_v58  ;;  %v1831_v1 = vmul.f32 0.2, %v1815_v15  ;;  %v1882_v32 = vld [vmem:[%s6991_s7 + $0xb8] sm:$0xff]  ;;  %v1885_v62 = vld [vmem:[%s6991_s7 + $0xd0] sm:$0xff] }
 0x6a6   :  { %2007 = vmatpush1.msra.mxu1 %v1855_v8  ;;  %v1887_v8 = vld [vmem:[%s6991_s7 + $0xe0] sm:$0xff]  ;;  %v1890_v27 = vld [vmem:[%s6991_s7 + $0xf8] sm:$0xff] }
 0x6a7   :  { %v1813_v37 = vadd.f32 %v1779_v59, %v1757_v45  ;;  %v1814_v38 = vadd.f32 %v1779_v59, %v1758_v36  ;;  %2008 = vmatprep.subr.mxu1 %v1854_v57  ;;  %v1848_v39 = vmax.f32 %v1816_v58, %v1832_v54  ;;  %v1847_v22 = vmax.f32 %v1815_v15, %v1831_v1  ;;  %v1884_v58 = vld [vmem:[%s6991_s7 + $0xc8] sm:$0xff]  ;;  %v1889_v15 = vld [vmem:[%s6991_s7 + $0xf0] sm:$0xff] }
 0x6a8   :  { %2009 = vmatpush1.msra.mxu1 %v1853_v5  ;;  %v1718_v12 = vpop.permute.xlu1 %1717 }
 0x6a9   :  { %2010 = vmatprep.subr.mxu1 %v1852_v60  ;;  %v1830_v21 = vmul.f32 0.2, %v1814_v38  ;;  %v1829_v40 = vmul.f32 0.2, %v1813_v37  ;;  %v1755_v43 = vmul.f32 %v1718_v12, %v5306_v46  ;;  %v1756_v3 = vmul.f32 %v1718_v12, %v5308_v4  ;;  %v1859_v46 = vld [vmem:[%s6991_s7] sm:$0xff]  ;;  %v1860_v4 = vld [vmem:[%s6991_s7 + $0x8] sm:$0xff] }
 0x6aa   :  { %2011 = vmatpush1.msra.mxu1 %v1851_v2 }
 0x6ab   :  { %2012 = vmatprep.subr.mxu1 %v1850_v0  ;;  %v1846_v18 = vmax.f32 %v1814_v38, %v1830_v21  ;;  %v1845_v50 = vmax.f32 %v1813_v37, %v1829_v40 }
 0x6ac   :  { %2013 = vmatpush1.msra.mxu1 %v1849_v29  ;;  %v1774_v31 = vpop.permute.xlu1 %1773 }
 0x6ad   :  { %v1811_v44 = vadd.f32 %v1774_v31, %v1755_v43  ;;  %v1812_v63 = vadd.f32 %v1774_v31, %v1756_v3  ;;  %2014 = vmatprep.subr.mxu1 %v1848_v39 }
 0x6ae   :  { %2015 = vmatpush1.msra.mxu1 %v1847_v22 }
 0x6af   :  { %v1827_v13 = vmul.f32 0.2, %v1811_v44  ;;  %v1828_v17 = vmul.f32 0.2, %v1812_v63  ;;  %2016 = vmatprep.subr.mxu1 %v1846_v18 }
 0x6b0   :  { %2017 = vmatpush1.msra.mxu1 %v1845_v50 }
 0x6b1   :  { %v1843_v55 = vmax.f32 %v1811_v44, %v1827_v13  ;;  %v1844_v35 = vmax.f32 %v1812_v63, %v1828_v17 }
 0x6b3   :  { %2018 = vmatprep.subr.mxu1 %v1844_v35 }
 0x6b4   :  { %2019 = vmatpush1.msra.mxu1 %v1843_v55 }
 0x6b5   :  { %4387 = vmatmul.mubr.msk.f32.vlgmr.msra.gmra.mxu1 %vm1891_vm5, %v1859_v46 }
 0x6b6   :  { %2058 = vmatprep.mubr.f32.mxu1 %v4753_v23 }
 0x6b9   :  { %4388 = vmatmul.mubr.msk.f32.gmra.mxu1 %vm1891_vm5, %v1860_v4 }
 0x6ba   :  { %2064 = vmatprep.mubr.f32.mxu1 %v4753_v23 }
 0x6bd   :  { %4389 = vmatmul.mubr.msk.f32.gmra.mxu1 %vm1891_vm5, %v1861_v26 }
 0x6be   :  { %2070 = vmatprep.mubr.f32.mxu1 %v4753_v23 }
 0x6c1   :  { %4390 = vmatmul.mubr.msk.f32.gmra.mxu1 %vm1891_vm5, %v1862_v14 }
 0x6c2   :  { %2076 = vmatprep.mubr.f32.mxu1 %v4753_v23 }
 0x6c5   :  { %4391 = vmatmul.mubr.msk.f32.gmra.mxu1 %vm1891_vm5, %v1863_v47 }
 0x6c6   :  { %2082 = vmatprep.mubr.f32.mxu1 %v4753_v23 }
 0x6c9   :  { %4392 = vmatmul.mubr.msk.f32.gmra.mxu1 %vm1891_vm5, %v1864_v61 }
 0x6ca   :  { %2088 = vmatprep.mubr.f32.mxu1 %v4753_v23 }
 0x6cd   :  { %4393 = vmatmul.mubr.msk.f32.gmra.mxu1 %vm1891_vm5, %v1865_v9 }
 0x6ce   :  { %2094 = vmatprep.mubr.f32.mxu1 %v4753_v23 }
 0x6d1   :  { %4394 = vmatmul.mubr.msk.f32.gmra.mxu1 %vm1891_vm5, %v1866_v33 }
 0x6d2   :  { %2100 = vmatprep.mubr.f32.mxu1 %v4753_v23 }
 0x6d5   :  { %4395 = vmatmul.mubr.msk.f32.gmra.mxu1 %vm1891_vm5, %v1867_v41 }
 0x6d6   :  { %2106 = vmatprep.mubr.f32.mxu1 %v4753_v23 }
 0x6d9   :  { %4396 = vmatmul.mubr.msk.f32.gmra.mxu1 %vm1891_vm5, %v1868_v49 }
 0x6da   :  { %2112 = vmatprep.mubr.f32.mxu1 %v4753_v23 }
 0x6dd   :  { %4397 = vmatmul.mubr.msk.f32.gmra.mxu1 %vm1891_vm5, %v1869_v30 }
 0x6de   :  { %2118 = vmatprep.mubr.f32.mxu1 %v4753_v23 }
 0x6e1   :  { %4398 = vmatmul.mubr.msk.f32.gmra.mxu1 %vm1891_vm5, %v1870_v56 }
 0x6e2   :  { %2124 = vmatprep.mubr.f32.mxu1 %v4753_v23 }
 0x6e5   :  { %4399 = vmatmul.mubr.msk.f32.gmra.mxu1 %vm1891_vm5, %v1871_v24 }
 0x6e6   :  { %2130 = vmatprep.mubr.f32.mxu1 %v4753_v23 }
 0x6e9   :  { %4400 = vmatmul.mubr.msk.f32.gmra.mxu1 %vm1891_vm5, %v1872_v19 }
 0x6ea   :  { %2136 = vmatprep.mubr.f32.mxu1 %v4753_v23 }
 0x6ed   :  { %4401 = vmatmul.mubr.msk.f32.gmra.mxu1 %vm1891_vm5, %v1873_v42 }
 0x6ee   :  { %2142 = vmatprep.mubr.f32.mxu1 %v4753_v23 }
 0x6f1   :  { %4402 = vmatmul.mubr.msk.f32.gmra.mxu1 %vm1891_vm5, %v1874_v25 }
 0x6f2   :  { %2148 = vmatprep.mubr.f32.mxu1 %v4753_v23 }
 0x6f5   :  { %4403 = vmatmul.mubr.msk.f32.gmra.mxu1 %vm1891_vm5, %v1875_v28 }
 0x6f6   :  { %2154 = vmatprep.mubr.f32.mxu1 %v4753_v23 }
 0x6f9   :  { %4404 = vmatmul.mubr.msk.f32.gmra.mxu1 %vm1891_vm5, %v1876_v53 }
 0x6fa   :  { %2160 = vmatprep.mubr.f32.mxu1 %v4753_v23 }
 0x6fd   :  { %4405 = vmatmul.mubr.msk.f32.gmra.mxu1 %vm1891_vm5, %v1877_v52 }
 0x6fe   :  { %2166 = vmatprep.mubr.f32.mxu1 %v4753_v23 }
 0x701   :  { %4406 = vmatmul.mubr.msk.f32.gmra.mxu1 %vm1891_vm5, %v1878_v6 }
 0x702   :  { %2172 = vmatprep.mubr.f32.mxu1 %v4753_v23 }
 0x705   :  { %4407 = vmatmul.mubr.msk.f32.gmra.mxu1 %vm1891_vm5, %v1879_v51 }
 0x706   :  { %2178 = vmatprep.mubr.f32.mxu1 %v4753_v23 }
 0x709   :  { %4408 = vmatmul.mubr.msk.f32.gmra.mxu1 %vm1891_vm5, %v1880_v16 }
 0x70a   :  { %2184 = vmatprep.mubr.f32.mxu1 %v4753_v23 }
 0x70d   :  { %4409 = vmatmul.mubr.msk.f32.gmra.mxu1 %vm1891_vm5, %v1881_v48 }
 0x70e   :  { %2190 = vmatprep.mubr.f32.mxu1 %v4753_v23 }
 0x711   :  { %4410 = vmatmul.mubr.msk.f32.gmra.mxu1 %vm1891_vm5, %v1882_v32 }
 0x712   :  { %2196 = vmatprep.mubr.f32.mxu1 %v4753_v23 }
 0x715   :  { %4411 = vmatmul.mubr.msk.f32.gmra.mxu1 %vm1891_vm5, %v1883_v7 }
 0x716   :  { %2202 = vmatprep.mubr.f32.mxu1 %v4753_v23 }
 0x719   :  { %4412 = vmatmul.mubr.msk.f32.gmra.mxu1 %vm1891_vm5, %v1884_v58 }
 0x71a   :  { %2208 = vmatprep.mubr.f32.mxu1 %v4753_v23 }
 0x71d   :  { %4413 = vmatmul.mubr.msk.f32.gmra.mxu1 %vm1891_vm5, %v1885_v62 }
 0x71e   :  { %2214 = vmatprep.mubr.f32.mxu1 %v4753_v23 }
 0x721   :  { %4414 = vmatmul.mubr.msk.f32.gmra.mxu1 %vm1891_vm5, %v1886_v20 }
 0x722   :  { %2220 = vmatprep.mubr.f32.mxu1 %v4753_v23 }
 0x725   :  { %4415 = vmatmul.mubr.msk.f32.gmra.mxu1 %vm1891_vm5, %v1887_v8 }
 0x726   :  { %2226 = vmatprep.mubr.f32.mxu1 %v4753_v23 }
 0x729   :  { %4416 = vmatmul.mubr.msk.f32.gmra.mxu1 %vm1891_vm5, %v1888_v10 }
 0x72a   :  { %2232 = vmatprep.mubr.f32.mxu1 %v4753_v23 }
 0x72d   :  { %4417 = vmatmul.mubr.msk.f32.gmra.mxu1 %vm1891_vm5, %v1889_v15 }
 0x72e   :  { %2238 = vmatprep.mubr.f32.mxu1 %v4753_v23 }
 0x731   :  { %4418 = vmatmul.mubr.msk.f32.gmra.mxu1 %vm1891_vm5, %v1890_v27 }
 0x775   :  { %v5643_v11 = vpop.f32.mrf.mxu1 }
 0x776   :  { %7046 = vst [vmem:[#allocation5_spill] sm:$0xff] %v5643_v11  ;;  %v2341_v36 = vmul.f32 %v5643_v11, %v5643_v11 }
 0x777   :  { %v5645_v45 = vpop.f32.mrf.mxu1 }
 0x778   :  { %7047 = vst [vmem:[#allocation6_spill] sm:$0xff] %v5645_v45  ;;  %v2245_v57 = vadd.f32 %v5645_v45, %v5643_v11  ;;  %v2342_v34 = vmul.f32 %v5645_v45, %v5645_v45 }
 0x779   :  { %v5653_v23 = vpop.f32.mrf.mxu1 }
 0x77a   :  { %7048 = vst [vmem:[#allocation7_spill] sm:$0xff] %v5653_v23  ;;  %2246 = vadd.xlane.f32.xlu0 %v2245_v57  ;;  %v2405_v59 = vadd.f32 %v2342_v34, %v2341_v36  ;;  %v2343_v37 = vmul.f32 %v5653_v23, %v5653_v23 }
 0x77b   :  { %v5655_v5 = vpop.f32.mrf.mxu1 }
 0x77c   :  { %7049 = vst [vmem:[#allocation8_spill] sm:$0xff] %v5655_v5  ;;  %v2248_v38 = vadd.f32 %v5655_v5, %v5653_v23  ;;  %v2344_v60 = vmul.f32 %v5655_v5, %v5655_v5  ;;  %2406 = vadd.xlane.f32.xlu1 %v2405_v59 }
 0x77d   :  { %v5663_v54 = vpop.f32.mrf.mxu1 }
 0x77e   :  { %7050 = vst [vmem:[#allocation9_spill] sm:$0xff] %v5663_v54  ;;  %2249 = vadd.xlane.f32.xlu0 %v2248_v38  ;;  %v2408_v1 = vadd.f32 %v2344_v60, %v2343_v37  ;;  %v2345_v2 = vmul.f32 %v5663_v54, %v5663_v54 }
 0x77f   :  { %v5665_v12 = vpop.f32.mrf.mxu1 }
 0x780   :  { %7051 = vst [vmem:[#allocation10_spill] sm:$0xff] %v5665_v12  ;;  %v2251_v0 = vadd.f32 %v5665_v12, %v5663_v54  ;;  %v2346_v21 = vmul.f32 %v5665_v12, %v5665_v12  ;;  %2409 = vadd.xlane.f32.xlu1 %v2408_v1 }
 0x781   :  { %v5673_v29 = vpop.f32.mrf.mxu1 }
 0x782   :  { %7052 = vst [vmem:[#allocation11_spill] sm:$0xff] %v5673_v29  ;;  %2252 = vadd.xlane.f32.xlu0 %v2251_v0  ;;  %v2411_v40 = vadd.f32 %v2346_v21, %v2345_v2  ;;  %v2347_v3 = vmul.f32 %v5673_v29, %v5673_v29 }
 0x783   :  { %v5675_v43 = vpop.f32.mrf.mxu1 }
 0x784   :  { %7053 = vst [vmem:[#allocation12_spill] sm:$0xff] %v5675_v43  ;;  %v2254_v39 = vadd.f32 %v5675_v43, %v5673_v29  ;;  %v2348_v31 = vmul.f32 %v5675_v43, %v5675_v43  ;;  %2412 = vadd.xlane.f32.xlu1 %v2411_v40 }
 0x785   :  { %v5683_v22 = vpop.f32.mrf.mxu1 }
 0x786   :  { %7054 = vst [vmem:[#allocation13_spill] sm:$0xff] %v5683_v22  ;;  %2255 = vadd.xlane.f32.xlu0 %v2254_v39  ;;  %v2414_v44 = vadd.f32 %v2348_v31, %v2347_v3  ;;  %v2349_v18 = vmul.f32 %v5683_v22, %v5683_v22 }
 0x787   :  { %v5685_v63 = vpop.f32.mrf.mxu1 }
 0x788   :  { %7055 = vst [vmem:[#allocation14_spill] sm:$0xff] %v5685_v63  ;;  %v2257_v50 = vadd.f32 %v5685_v63, %v5683_v22  ;;  %v2350_v13 = vmul.f32 %v5685_v63, %v5685_v63  ;;  %2415 = vadd.xlane.f32.xlu1 %v2414_v44 }
 0x789   :  { %v5693_v17 = vpop.f32.mrf.mxu1 }
 0x78a   :  { %7056 = vst [vmem:[#allocation15_spill] sm:$0xff] %v5693_v17  ;;  %2258 = vadd.xlane.f32.xlu0 %v2257_v50  ;;  %v2417_v55 = vadd.f32 %v2350_v13, %v2349_v18  ;;  %v2351_v46 = vmul.f32 %v5693_v17, %v5693_v17 }
 0x78b   :  { %v5695_v35 = vpop.f32.mrf.mxu1 }
 0x78c   :  { %7057 = vst [vmem:[#allocation16_spill] sm:$0xff] %v5695_v35  ;;  %v2260_v4 = vadd.f32 %v5695_v35, %v5693_v17  ;;  %v2352_v26 = vmul.f32 %v5695_v35, %v5695_v35  ;;  %2418 = vadd.xlane.f32.xlu1 %v2417_v55 }
 0x78d   :  { %v5703_v14 = vpop.f32.mrf.mxu1 }
 0x78e   :  { %2261 = vadd.xlane.f32.xlu0 %v2260_v4  ;;  %v2420_v47 = vadd.f32 %v2352_v26, %v2351_v46  ;;  %v2353_v9 = vmul.f32 %v5703_v14, %v5703_v14 }
 0x78f   :  { %v5705_v61 = vpop.f32.mrf.mxu1 }
 0x790   :  { %v2263_v33 = vadd.f32 %v5705_v61, %v5703_v14  ;;  %v2354_v41 = vmul.f32 %v5705_v61, %v5705_v61  ;;  %2421 = vadd.xlane.f32.xlu1 %v2420_v47 }
 0x791   :  { %v5713_v49 = vpop.f32.mrf.mxu1 }
 0x792   :  { %2264 = vadd.xlane.f32.xlu0 %v2263_v33  ;;  %v2423_v30 = vadd.f32 %v2354_v41, %v2353_v9  ;;  %v2355_v24 = vmul.f32 %v5713_v49, %v5713_v49 }
 0x793   :  { %v5715_v56 = vpop.f32.mrf.mxu1 }
 0x794   :  { %v2266_v19 = vadd.f32 %v5715_v56, %v5713_v49  ;;  %v2356_v42 = vmul.f32 %v5715_v56, %v5715_v56  ;;  %2424 = vadd.xlane.f32.xlu1 %v2423_v30 }
 0x795   :  { %v5723_v25 = vpop.f32.mrf.mxu1 }
 0x796   :  { %2267 = vadd.xlane.f32.xlu0 %v2266_v19  ;;  %v2426_v28 = vadd.f32 %v2356_v42, %v2355_v24  ;;  %v2357_v52 = vmul.f32 %v5723_v25, %v5723_v25 }
 0x797   :  { %v5725_v53 = vpop.f32.mrf.mxu1 }
 0x798   :  { %v2269_v6 = vadd.f32 %v5725_v53, %v5723_v25  ;;  %v2358_v51 = vmul.f32 %v5725_v53, %v5725_v53  ;;  %2427 = vadd.xlane.f32.xlu1 %v2426_v28 }
 0x799   :  { %v5733_v16 = vpop.f32.mrf.mxu1 }
 0x79a   :  { %2270 = vadd.xlane.f32.xlu0 %v2269_v6  ;;  %v2429_v48 = vadd.f32 %v2358_v51, %v2357_v52  ;;  %v2359_v7 = vmul.f32 %v5733_v16, %v5733_v16 }
 0x79b   :  { %v5735_v32 = vpop.f32.mrf.mxu1 }
 0x79c   :  { %v2272_v58 = vadd.f32 %v5735_v32, %v5733_v16  ;;  %v2360_v62 = vmul.f32 %v5735_v32, %v5735_v32  ;;  %2430 = vadd.xlane.f32.xlu1 %v2429_v48 }
 0x79d   :  { %v5743_v20 = vpop.f32.mrf.mxu1 }
 0x79e   :  { %2273 = vadd.xlane.f32.xlu0 %v2272_v58  ;;  %v2432_v8 = vadd.f32 %v2360_v62, %v2359_v7  ;;  %v2361_v15 = vmul.f32 %v5743_v20, %v5743_v20 }
 0x79f   :  { %v5745_v10 = vpop.f32.mrf.mxu1 }
 0x7a0   :  { %v2275_v27 = vadd.f32 %v5745_v10, %v5743_v20  ;;  %v2362_v36 = vmul.f32 %v5745_v10, %v5745_v10  ;;  %2433 = vadd.xlane.f32.xlu1 %v2432_v8 }
 0x7a1   :  { %v5753_v57 = vpop.f32.mrf.mxu1 }
 0x7a2   :  { %2276 = vadd.xlane.f32.xlu0 %v2275_v27  ;;  %v2435_v34 = vadd.f32 %v2362_v36, %v2361_v15  ;;  %v2363_v37 = vmul.f32 %v5753_v57, %v5753_v57 }
 0x7a3   :  { %v5755_v59 = vpop.f32.mrf.mxu1 }
 0x7a4   :  { %v2278_v38 = vadd.f32 %v5755_v59, %v5753_v57  ;;  %v2364_v60 = vmul.f32 %v5755_v59, %v5755_v59  ;;  %2436 = vadd.xlane.f32.xlu1 %v2435_v34 }
 0x7a5   :  { %v5763_v1 = vpop.f32.mrf.mxu1 }
 0x7a6   :  { %2279 = vadd.xlane.f32.xlu0 %v2278_v38  ;;  %v2438_v2 = vadd.f32 %v2364_v60, %v2363_v37  ;;  %v2365_v21 = vmul.f32 %v5763_v1, %v5763_v1 }
 0x7a7   :  { %v5765_v0 = vpop.f32.mrf.mxu1 }
 0x7a8   :  { %v2281_v40 = vadd.f32 %v5765_v0, %v5763_v1  ;;  %v2366_v3 = vmul.f32 %v5765_v0, %v5765_v0  ;;  %2439 = vadd.xlane.f32.xlu1 %v2438_v2 }
 0x7a9   :  { %v5773_v39 = vpop.f32.mrf.mxu1 }
 0x7aa   :  { %2282 = vadd.xlane.f32.xlu0 %v2281_v40  ;;  %v2441_v31 = vadd.f32 %v2366_v3, %v2365_v21  ;;  %v2367_v18 = vmul.f32 %v5773_v39, %v5773_v39 }
 0x7ab   :  { %v5775_v44 = vpop.f32.mrf.mxu1 }
 0x7ac   :  { %v2284_v50 = vadd.f32 %v5775_v44, %v5773_v39  ;;  %v2368_v13 = vmul.f32 %v5775_v44, %v5775_v44  ;;  %2442 = vadd.xlane.f32.xlu1 %v2441_v31 }
 0x7ad   :  { %v5783_v55 = vpop.f32.mrf.mxu1 }
 0x7ae   :  { %2285 = vadd.xlane.f32.xlu0 %v2284_v50  ;;  %v2444_v46 = vadd.f32 %v2368_v13, %v2367_v18  ;;  %v2369_v41 = vmul.f32 %v5783_v55, %v5783_v55 }
 0x7af   :  { %v5785_v4 = vpop.f32.mrf.mxu1 }
 0x7b0   :  { %2445 = vadd.xlane.f32.xlu1 %v2444_v46  ;;  %v2287_v47 = vadd.f32 %v5785_v4, %v5783_v55  ;;  %v2370_v9 = vmul.f32 %v5785_v4, %v5785_v4 }
 0x7b1   :  { %v5787_v26 = vpop.f32.mrf.mxu1 }
 0x7b2   :  { %v2371_v42 = vmul.f32 %v5787_v26, %v5787_v26  ;;  %v2447_v28 = vadd.f32 %v2370_v9, %v2369_v41 }
 0x7b3   :  { %v5793_v33 = vpop.f32.mrf.mxu1 }
 0x7b4   :  { %v2290_v30 = vadd.f32 %v5793_v33, %v5787_v26  ;;  %v2372_v24 = vmul.f32 %v5793_v33, %v5793_v33  ;;  %2288 = vadd.xlane.f32.xlu1 %v2287_v47 }
 0x7b5   :  { %v5801_v19 = vpop.f32.mrf.mxu1 }
 0x7b6   :  { %7058 = vst [vmem:[#allocation17_spill] sm:$0xff] %v5801_v19  ;;  %2291 = vadd.xlane.f32.xlu0 %v2290_v30  ;;  %v2450_v6 = vadd.f32 %v2372_v24, %v2371_v42  ;;  %v2373_v58 = vmul.f32 %v5801_v19, %v5801_v19 }
 0x7b7   :  { %v5805_v52 = vpop.f32.mrf.mxu1 }
 0x7b8   :  { %7059 = vst [vmem:[#allocation18_spill] sm:$0xff] %v5805_v52  ;;  %2448 = vadd.xlane.f32.xlu1 %v2447_v28  ;;  %v2293_v62 = vadd.f32 %v5805_v52, %v5801_v19  ;;  %v2374_v8 = vmul.f32 %v5805_v52, %v5805_v52 }
 0x7b9   :  { %v5807_v51 = vpop.f32.mrf.mxu1 }
 0x7ba   :  { %7060 = vst [vmem:[#allocation19_spill] sm:$0xff] %v5807_v51  ;;  %2451 = vadd.xlane.f32.xlu0 %v2450_v6  ;;  %v2375_v48 = vmul.f32 %v5807_v51, %v5807_v51  ;;  %v2453_v38 = vadd.f32 %v2374_v8, %v2373_v58 }
 0x7bb   :  { %v5811_v7 = vpop.f32.mrf.mxu1 }
 0x7bc   :  { %7061 = vst [vmem:[#allocation20_spill] sm:$0xff] %v5811_v7  ;;  %v2376_v15 = vmul.f32 %v5811_v7, %v5811_v7  ;;  %v2296_v31 = vadd.f32 %v5811_v7, %v5807_v51 }
 0x7bd   :  { %v5821_v27 = vpop.f32.mrf.mxu1 }
 0x7be   :  { %7062 = vst [vmem:[#allocation21_spill] sm:$0xff] %v5821_v27  ;;  %2294 = vadd.xlane.f32.xlu0 %v2293_v62  ;;  %v2377_v36 = vmul.f32 %v5821_v27, %v5821_v27  ;;  %v2456_v34 = vadd.f32 %v2376_v15, %v2375_v48 }
 0x7bf   :  { %v5825_v37 = vpop.f32.mrf.mxu1 }
 0x7c0   :  { %7063 = vst [vmem:[#allocation22_spill] sm:$0xff] %v5825_v37  ;;  %v2378_v60 = vmul.f32 %v5825_v37, %v5825_v37  ;;  %2457 = vadd.xlane.f32.xlu1 %v2456_v34  ;;  %v2299_v9 = vadd.f32 %v5825_v37, %v5821_v27 }
 0x7c1   :  { %v5829_v2 = vpop.f32.mrf.mxu1 }
 0x7c2   :  { %7064 = vst [vmem:[#allocation23_spill] sm:$0xff] %v5829_v2  ;;  %2454 = vadd.xlane.f32.xlu0 %v2453_v38  ;;  %v2379_v21 = vmul.f32 %v5829_v2, %v5829_v2  ;;  %v2459_v40 = vadd.f32 %v2378_v60, %v2377_v36 }
 0x7c3   :  { %v5833_v3 = vpop.f32.mrf.mxu1 }
 0x7c4   :  { %7065 = vst [vmem:[#allocation24_spill] sm:$0xff] %v5833_v3  ;;  %v2380_v18 = vmul.f32 %v5833_v3, %v5833_v3  ;;  %2460 = vadd.xlane.f32.xlu1 %v2459_v40  ;;  %v2302_v6 = vadd.f32 %v5833_v3, %v5829_v2 }
 0x7c5   :  { %v5839_v50 = vpop.f32.mrf.mxu1 }
 0x7c6   :  { %7066 = vst [vmem:[#allocation25_spill] sm:$0xff] %v5839_v50  ;;  %2297 = vadd.xlane.f32.xlu0 %v2296_v31  ;;  %v2381_v13 = vmul.f32 %v5839_v50, %v5839_v50  ;;  %v2462_v46 = vadd.f32 %v2380_v18, %v2379_v21 }
 0x7c7   :  { %v5843_v47 = vpop.f32.mrf.mxu1 }
 0x7c8   :  { %7067 = vst [vmem:[#allocation26_spill] sm:$0xff] %v5843_v47  ;;  %v2382_v41 = vmul.f32 %v5843_v47, %v5843_v47  ;;  %2463 = vadd.xlane.f32.xlu1 %v2462_v46  ;;  %v2305_v36 = vadd.f32 %v5843_v47, %v5839_v50 }
 0x7c9   :  { %v5849_v30 = vpop.f32.mrf.mxu1 }
 0x7ca   :  { %7068 = vst [vmem:[#allocation27_spill] sm:$0xff] %v5849_v30  ;;  %2300 = vadd.xlane.f32.xlu0 %v2299_v9  ;;  %v2383_v24 = vmul.f32 %v5849_v30, %v5849_v30  ;;  %v2465_v42 = vadd.f32 %v2382_v41, %v2381_v13 }
 0x7cb   :  { %v5853_v28 = vpop.f32.mrf.mxu1 }
 0x7cc   :  { %7069 = vst [vmem:[#allocation28_spill] sm:$0xff] %v5853_v28  ;;  %v2384_v48 = vmul.f32 %v5853_v28, %v5853_v28  ;;  %2466 = vadd.xlane.f32.xlu1 %v2465_v42  ;;  %v2308_v31 = vadd.f32 %v5853_v28, %v5849_v30 }
 0x7cd   :  { %v5859_v58 = vpop.f32.mrf.mxu1 }
 0x7ce   :  { %7070 = vst [vmem:[#allocation29_spill] sm:$0xff] %v5859_v58  ;;  %2303 = vadd.xlane.f32.xlu0 %v2302_v6  ;;  %v2385_v62 = vmul.f32 %v5859_v58, %v5859_v58  ;;  %v2468_v8 = vadd.f32 %v2384_v48, %v2383_v24 }
 0x7cf   :  { %v5863_v15 = vpop.f32.mrf.mxu1 }
 0x7d0   :  { %7071 = vst [vmem:[#allocation30_spill] sm:$0xff] %v5863_v15  ;;  %v2386_v34 = vmul.f32 %v5863_v15, %v5863_v15  ;;  %2469 = vadd.xlane.f32.xlu1 %v2468_v8  ;;  %v2311_v24 = vadd.f32 %v5863_v15, %v5859_v58 }
 0x7d1   :  { %v5869_v38 = vpop.f32.mrf.mxu1 }
 0x7d2   :  { %7072 = vst [vmem:[#allocation31_spill] sm:$0xff] %v5869_v38  ;;  %2306 = vadd.xlane.f32.xlu0 %v2305_v36  ;;  %v2387_v60 = vmul.f32 %v5869_v38, %v5869_v38  ;;  %v2471_v21 = vadd.f32 %v2386_v34, %v2385_v62 }
 0x7d3   :  { %v5873_v40 = vpop.f32.mrf.mxu1 }
 0x7d4   :  { %7073 = vst [vmem:[#allocation32_spill] sm:$0xff] %v5873_v40  ;;  %v2388_v18 = vmul.f32 %v5873_v40, %v5873_v40  ;;  %2472 = vadd.xlane.f32.xlu1 %v2471_v21  ;;  %v2314_v36 = vadd.f32 %v5873_v40, %v5869_v38 }
 0x7d5   :  { %v5879_v13 = vpop.f32.mrf.mxu1 }
 0x7d6   :  { %7074 = vst [vmem:[#allocation33_spill] sm:$0xff] %v5879_v13  ;;  %2309 = vadd.xlane.f32.xlu0 %v2308_v31  ;;  %v2389_v46 = vmul.f32 %v5879_v13, %v5879_v13  ;;  %v2474_v9 = vadd.f32 %v2388_v18, %v2387_v60 }
 0x7d7   :  { %v5883_v41 = vpop.f32.mrf.mxu1 }
 0x7d8   :  { %7075 = vst [vmem:[#allocation34_spill] sm:$0xff] %v5883_v41  ;;  %v2390_v42 = vmul.f32 %v5883_v41, %v5883_v41  ;;  %2475 = vadd.xlane.f32.xlu1 %v2474_v9 }
 0x7d9   :  { %v5889_v6 = vpop.f32.mrf.mxu1 }
 0x7da   :  { %7076 = vst [vmem:[#allocation35_spill] sm:$0xff] %v5889_v6  ;;  %2312 = vadd.xlane.f32.xlu0 %v2311_v24  ;;  %v2391_v48 = vmul.f32 %v5889_v6, %v5889_v6  ;;  %v2477_v62 = vadd.f32 %v2390_v42, %v2389_v46  ;;  %v2317_v46 = vadd.f32 %v5883_v41, %v5879_v13 }
 0x7db   :  { %v5893_v8 = vpop.f32.mrf.mxu1 }
 0x7dc   :  { %7077 = vst [vmem:[#allocation36_spill] sm:$0xff] %v5893_v8  ;;  %v2392_v34 = vmul.f32 %v5893_v8, %v5893_v8  ;;  %2478 = vadd.xlane.f32.xlu1 %v2477_v62 }
 0x7dd   :  { %v5899_v60 = vpop.f32.mrf.mxu1 }
 0x7de   :  { %7078 = vst [vmem:[#allocation37_spill] sm:$0xff] %v5899_v60  ;;  %2315 = vadd.xlane.f32.xlu0 %v2314_v36  ;;  %v2393_v21 = vmul.f32 %v5899_v60, %v5899_v60  ;;  %v2480_v31 = vadd.f32 %v2392_v34, %v2391_v48  ;;  %v2320_v48 = vadd.f32 %v5893_v8, %v5889_v6 }
 0x7df   :  { %v5903_v18 = vpop.f32.mrf.mxu1 }
 0x7e0   :  { %7079 = vst [vmem:[#allocation38_spill] sm:$0xff] %v5903_v18  ;;  %v2394_v9 = vmul.f32 %v5903_v18, %v5903_v18  ;;  %2481 = vadd.xlane.f32.xlu1 %v2480_v31 }
 0x7e1   :  { %v5909_v24 = vpop.f32.mrf.mxu1 }
 0x7e2   :  { %7080 = vst [vmem:[#allocation39_spill] sm:$0xff] %v5909_v24  ;;  %2318 = vadd.xlane.f32.xlu0 %v2317_v46  ;;  %v2395_v42 = vmul.f32 %v5909_v24, %v5909_v24  ;;  %v2483_v62 = vadd.f32 %v2394_v9, %v2393_v21  ;;  %v2323_v21 = vadd.f32 %v5903_v18, %v5899_v60 }
 0x7e3   :  { %v5913_v36 = vpop.f32.mrf.mxu1 }
 0x7e4   :  { %7081 = vst [vmem:[#allocation40_spill] sm:$0xff] %v5913_v36  ;;  %v2396_v34 = vmul.f32 %v5913_v36, %v5913_v36  ;;  %2484 = vadd.xlane.f32.xlu1 %v2483_v62 }
 0x7e5   :  { %v5919_v7 = vpop.f32.mrf.mxu1 }
 0x7e6   :  { %7082 = vst [vmem:[#allocation41_spill] sm:$0xff] %v5919_v7  ;;  %2321 = vadd.xlane.f32.xlu0 %v2320_v48  ;;  %v2397_v31 = vmul.f32 %v5919_v7, %v5919_v7  ;;  %v2486_v46 = vadd.f32 %v2396_v34, %v2395_v42  ;;  %v2326_v42 = vadd.f32 %v5913_v36, %v5909_v24 }
 0x7e7   :  { %v5923_v51 = vpop.f32.mrf.mxu1 }
 0x7e8   :  { %7083 = vst [vmem:[#allocation42_spill] sm:$0xff] %v5923_v51  ;;  %v2398_v9 = vmul.f32 %v5923_v51, %v5923_v51  ;;  %2487 = vadd.xlane.f32.xlu1 %v2486_v46 }
 0x7e9   :  { %v5929_v52 = vpop.f32.mrf.mxu1 }
 0x7ea   :  { %7084 = vst [vmem:[#allocation43_spill] sm:$0xff] %v5929_v52  ;;  %2324 = vadd.xlane.f32.xlu0 %v2323_v21  ;;  %v2399_v62 = vmul.f32 %v5929_v52, %v5929_v52  ;;  %v2489_v48 = vadd.f32 %v2398_v9, %v2397_v31  ;;  %v2329_v31 = vadd.f32 %v5923_v51, %v5919_v7 }
 0x7eb   :  { %v5933_v19 = vpop.f32.mrf.mxu1 }
 0x7ec   :  { %7085 = vst [vmem:[#allocation44_spill] sm:$0xff] %v5933_v19  ;;  %v2400_v34 = vmul.f32 %v5933_v19, %v5933_v19  ;;  %2490 = vadd.xlane.f32.xlu1 %v2489_v48 }
 0x7ed   :  { %v5939_v37 = vpop.f32.mrf.mxu1 }
 0x7ee   :  { %7086 = vst [vmem:[#allocation45_spill] sm:$0xff] %v5939_v37  ;;  %2327 = vadd.xlane.f32.xlu0 %v2326_v42  ;;  %v2401_v46 = vmul.f32 %v5939_v37, %v5939_v37  ;;  %v2492_v21 = vadd.f32 %v2400_v34, %v2399_v62  ;;  %v2332_v62 = vadd.f32 %v5933_v19, %v5929_v52 }
 0x7ef   :  { %v5943_v27 = vpop.f32.mrf.mxu1 }
 0x7f0   :  { %7087 = vst [vmem:[#allocation46_spill] sm:$0xff] %v5943_v27  ;;  %v2402_v9 = vmul.f32 %v5943_v27, %v5943_v27  ;;  %2493 = vadd.xlane.f32.xlu1 %v2492_v21  ;;  %v2335_v21 = vadd.f32 %v5943_v27, %v5939_v37 }
 0x7f1   :  { %v5949_v2 = vpop.f32.mrf.mxu1 }
 0x7f2   :  { %7088 = vst [vmem:[#allocation47_spill] sm:$0xff] %v5949_v2  ;;  %2330 = vadd.xlane.f32.xlu0 %v2329_v31  ;;  %v2403_v48 = vmul.f32 %v5949_v2, %v5949_v2  ;;  %v2495_v42 = vadd.f32 %v2402_v9, %v2401_v46 }
 0x7f3   :  { %v5953_v3 = vpop.f32.mrf.mxu1 }
 0x7f4   :  { %7089 = vst [vmem:[#allocation48_spill] sm:$0xff] %v5953_v3  ;;  %v2404_v34 = vmul.f32 %v5953_v3, %v5953_v3  ;;  %2496 = vadd.xlane.f32.xlu1 %v2495_v42  ;;  %v2338_v31 = vadd.f32 %v5953_v3, %v5949_v2 }
 0x7f6   :  { %2333 = vadd.xlane.f32.xlu0 %v2332_v62  ;;  %v2498_v50 = vadd.f32 %v2404_v34, %v2403_v48 }
 0x7f8   :  { %2499 = vadd.xlane.f32.xlu1 %v2498_v50 }
 0x7fa   :  { %2336 = vadd.xlane.f32.xlu0 %v2335_v21 }
 0x7fe   :  { %2339 = vadd.xlane.f32.xlu0 %v2338_v31 }
 0x803   :  { %v2247_v46 = vpop.xlane.xlu0 %2246 }
 0x804   :  { %v5963_v9 = vmul.f32 0.00390625, %v2247_v46 }
 0x805   :  { %v2407_v47 = vpop.xlane.xlu1 %2406 }
 0x806   :  { %v2565_v30 = vmul.f32 %v5963_v9, %v5963_v9  ;;  %v2533_v28 = vmul.f32 0.00390625, %v2407_v47 }
 0x807   :  { %v2250_v42 = vpop.xlane.xlu0 %2249 }
 0x808   :  { %v2597_v62 = vsub.f32 %v2533_v28, %v2565_v30  ;;  %v5967_v48 = vmul.f32 0.00390625, %v2250_v42 }
 0x809   :  { %v2410_v34 = vpop.xlane.xlu1 %2409 }
 0x80a   :  { %v2629_v58 = vmax.f32 %v2597_v62, 0.0  ;;  %v2566_v50 = vmul.f32 %v5967_v48, %v5967_v48  ;;  %v2534_v21 = vmul.f32 0.00390625, %v2410_v34 }
 0x80b   :  { %v2253_v15 = vpop.xlane.xlu0 %2252 }
 0x80c   :  { %v2693_v31 = vadd.f32 1e-05, %v2629_v58  ;;  %v2598_v38 = vsub.f32 %v2534_v21, %v2566_v50  ;;  %v5971_v46 = vmul.f32 0.00390625, %v2253_v15 }
 0x80d   :  { %v2413_v40 = vpop.xlane.xlu1 %2412 }
 0x80e   :  { %4631 = vrsqrt.f32 %v2693_v31  ;;  %v2630_v13 = vmax.f32 %v2598_v38, 0.0  ;;  %v2567_v47 = vmul.f32 %v5971_v46, %v5971_v46  ;;  %v2535_v30 = vmul.f32 0.00390625, %v2413_v40 }
 0x80f   :  { %v2256_v28 = vpop.xlane.xlu0 %2255 }
 0x810   :  { %v2694_v42 = vadd.f32 1e-05, %v2630_v13  ;;  %v2599_v41 = vsub.f32 %v2535_v30, %v2567_v47  ;;  %v5975_v62 = vmul.f32 0.00390625, %v2256_v28 }
 0x811   :  { %v2416_v6 = vpop.xlane.xlu1 %2415 }
 0x812   :  { %4633 = vrsqrt.f32 %v2694_v42  ;;  %v2631_v34 = vmax.f32 %v2599_v41, 0.0  ;;  %v2568_v58 = vmul.f32 %v5975_v62, %v5975_v62  ;;  %v2536_v15 = vmul.f32 0.00390625, %v2416_v6  ;;  %v2661_v6 = vld [vmem:[%s6992_s8] sm:$0xff] }
 0x813   :  { %v2259_v50 = vpop.xlane.xlu0 %2258 }
 0x814   :  { %v2695_v21 = vadd.f32 1e-05, %v2631_v34  ;;  %v2600_v31 = vsub.f32 %v2536_v15, %v2568_v58  ;;  %v5979_v38 = vmul.f32 0.00390625, %v2259_v50 }
 0x815   :  { %v2419_v8 = vpop.xlane.xlu1 %2418 }
 0x816   :  { %4635 = vrsqrt.f32 %v2695_v21  ;;  %v2632_v40 = vmax.f32 %v2600_v31, 0.0  ;;  %v2569_v13 = vmul.f32 %v5979_v38, %v5979_v38  ;;  %v2537_v47 = vmul.f32 0.00390625, %v2419_v8 }
 0x817   :  { %v2262_v30 = vpop.xlane.xlu0 %2261 }
 0x818   :  { %v2696_v28 = vadd.f32 1e-05, %v2632_v40  ;;  %v2601_v42 = vsub.f32 %v2537_v47, %v2569_v13  ;;  %v5983_v41 = vmul.f32 0.00390625, %v2262_v30  ;;  %v2662_v47 = vld [vmem:[%s6992_s8 + $0x8] sm:$0xff] }
 0x819   :  { %v2422_v60 = vpop.xlane.xlu1 %2421 }
 0x81a   :  { %4637 = vrsqrt.f32 %v2696_v28  ;;  %v2633_v34 = vmax.f32 %v2601_v42, 0.0  ;;  %v2570_v58 = vmul.f32 %v5983_v41, %v5983_v41  ;;  %v2538_v15 = vmul.f32 0.00390625, %v2422_v60  ;;  %v2789_v60 = vld [vmem:[%s6993_s9] sm:$0xff] }
 0x81b   :  { %v4632_v50 = vpop.eup %4631  ;;  %v2265_v21 = vpop.xlane.xlu0 %2264 }
 0x81c   :  { %v2697_v31 = vadd.f32 1e-05, %v2633_v34  ;;  %v2602_v8 = vsub.f32 %v2538_v15, %v2570_v58  ;;  %v5990_v24 = vmul.f32 0.00390625, %v2265_v21  ;;  %v2757_v40 = vmul.f32 %v4632_v50, %v2661_v6 }
 0x81d   :  { %v2425_v13 = vpop.xlane.xlu1 %2424 }
 0x81e   :  { %4639 = vrsqrt.f32 %v2697_v31  ;;  %v2634_v30 = vmax.f32 %v2602_v8, 0.0  ;;  %v2571_v28 = vmul.f32 %v5990_v24, %v5990_v24  ;;  %v2539_v42 = vmul.f32 0.00390625, %v2425_v13  ;;  %2887 = vperm.xlu1 %4605, %v2757_v40   ;;  %v2663_v13 = vld [vmem:[%s6992_s8 + $0x10] sm:$0xff] }
 0x81f   :  { %v4634_v34 = vpop.eup %4633  ;;  %v2268_v58 = vpop.xlane.xlu0 %2267  ;;  %v2821_v6 = vmul.f32 %v2757_v40, %v5963_v9  ;;  %v2790_v9 = vld [vmem:[%s6993_s9 + $0x8] sm:$0xff] }
 0x820   :  { %v2698_v15 = vadd.f32 1e-05, %v2634_v30  ;;  %v2603_v50 = vsub.f32 %v2539_v42, %v2571_v28  ;;  %v6001_v21 = vmul.f32 0.00390625, %v2268_v58  ;;  %v2758_v18 = vmul.f32 %v4634_v34, %v2662_v47 }
 0x821   :  { %v2428_v31 = vpop.xlane.xlu1 %2427  ;;  %v2853_v8 = vsub.f32 %v2789_v60, %v2821_v6 }
 0x822   :  { %4641 = vrsqrt.f32 %v2698_v15  ;;  %v2635_v7 = vmax.f32 %v2603_v50, 0.0  ;;  %v2572_v36 = vmul.f32 %v6001_v21, %v6001_v21  ;;  %v2540_v51 = vmul.f32 0.00390625, %v2428_v31  ;;  %2892 = vperm.xlu1 %4605, %v2758_v18   ;;  %v2664_v15 = vld [vmem:[%s6992_s8 + $0x18] sm:$0xff] }
 0x823   :  { %v4636_v40 = vpop.eup %4635  ;;  %3111 = vperm.xlu0 %4606, %v2853_v8   ;;  %v2271_v47 = vpop.xlane.xlu0 %2270  ;;  %v2822_v30 = vmul.f32 %v2758_v18, %v5967_v48 }
 0x824   :  { %v2699_v28 = vadd.f32 1e-05, %v2635_v7  ;;  %v2604_v42 = vsub.f32 %v2540_v51, %v2572_v36  ;;  %v6012_v60 = vmul.f32 0.00390625, %v2271_v47  ;;  %v2759_v34 = vmul.f32 %v4636_v40, %v2663_v13  ;;  %v2791_v51 = vld [vmem:[%s6993_s9 + $0x10] sm:$0xff] }
 0x825   :  { %v2431_v58 = vpop.xlane.xlu1 %2430  ;;  %v2854_v6 = vsub.f32 %v2790_v9, %v2822_v30 }
 0x826   :  { %4643 = vrsqrt.f32 %v2699_v28  ;;  %v2636_v50 = vmax.f32 %v2604_v42, 0.0  ;;  %v2573_v31 = vmul.f32 %v6012_v60, %v6012_v60  ;;  %v2541_v8 = vmul.f32 0.00390625, %v2431_v58  ;;  %2897 = vperm.xlu1 %4605, %v2759_v34   ;;  %v2665_v28 = vld [vmem:[%s6992_s8 + $0x20] sm:$0xff] }
 0x827   :  { %v4638_v7 = vpop.eup %4637  ;;  %3116 = vperm.xlu0 %4606, %v2854_v6   ;;  %v2274_v18 = vpop.xlane.xlu0 %2273  ;;  %v2823_v36 = vmul.f32 %v2759_v34, %v5971_v46  ;;  %v2792_v46 = vld [vmem:[%s6993_s9 + $0x18] sm:$0xff] }
 0x828   :  { %v2700_v48 = vadd.f32 1e-05, %v2636_v50  ;;  %v2605_v13 = vsub.f32 %v2541_v8, %v2573_v31  ;;  %v6023_v9 = vmul.f32 0.00390625, %v2274_v18  ;;  %v2760_v40 = vmul.f32 %v4638_v7, %v2664_v15 }
 0x829   :  { %v2434_v47 = vpop.xlane.xlu1 %2433  ;;  %v2855_v30 = vsub.f32 %v2791_v51, %v2823_v36 }
 0x82a   :  { %4645 = vrsqrt.f32 %v2700_v48  ;;  %v2637_v42 = vmax.f32 %v2605_v13, 0.0  ;;  %v2574_v58 = vmul.f32 %v6023_v9, %v6023_v9  ;;  %v2542_v6 = vmul.f32 0.00390625, %v2434_v47  ;;  %2902 = vperm.xlu1 %4605, %v2760_v40   ;;  %v2666_v48 = vld [vmem:[%s6992_s8 + $0x28] sm:$0xff] }
 0x82b   :  { %v4640_v34 = vpop.eup %4639  ;;  %3121 = vperm.xlu0 %4606, %v2855_v30   ;;  %v2277_v15 = vpop.xlane.xlu0 %2276  ;;  %v2824_v50 = vmul.f32 %v2760_v40, %v5975_v62  ;;  %v2793_v62 = vld [vmem:[%s6993_s9 + $0x20] sm:$0xff] }
 0x82c   :  { %v2701_v31 = vadd.f32 1e-05, %v2637_v42  ;;  %v2606_v8 = vsub.f32 %v2542_v6, %v2574_v58  ;;  %v6034_v51 = vmul.f32 0.00390625, %v2277_v15  ;;  %v2761_v7 = vmul.f32 %v4640_v34, %v2665_v28 }
 0x82d   :  { %v2437_v18 = vpop.xlane.xlu1 %2436  ;;  %v2856_v36 = vsub.f32 %v2792_v46, %v2824_v50 }
 0x82e   :  { %4647 = vrsqrt.f32 %v2701_v31  ;;  %v2638_v13 = vmax.f32 %v2606_v8, 0.0  ;;  %v2575_v47 = vmul.f32 %v6034_v51, %v6034_v51  ;;  %v2543_v30 = vmul.f32 0.00390625, %v2437_v18  ;;  %2907 = vperm.xlu1 %4605, %v2761_v7   ;;  %v2667_v31 = vld [vmem:[%s6992_s8 + $0x30] sm:$0xff] }
 0x82f   :  { %v4642_v40 = vpop.eup %4641  ;;  %3126 = vperm.xlu0 %4606, %v2856_v36   ;;  %v2280_v28 = vpop.xlane.xlu0 %2279  ;;  %v2825_v42 = vmul.f32 %v2761_v7, %v5979_v38  ;;  %v2794_v38 = vld [vmem:[%s6993_s9 + $0x28] sm:$0xff] }
 0x830   :  { %v2702_v58 = vadd.f32 1e-05, %v2638_v13  ;;  %v2607_v6 = vsub.f32 %v2543_v30, %v2575_v47  ;;  %v6045_v46 = vmul.f32 0.00390625, %v2280_v28  ;;  %v2762_v34 = vmul.f32 %v4642_v40, %v2666_v48 }
 0x831   :  { %v2440_v15 = vpop.xlane.xlu1 %2439  ;;  %v2857_v50 = vsub.f32 %v2793_v62, %v2825_v42 }
 0x832   :  { %4649 = vrsqrt.f32 %v2702_v58  ;;  %v2639_v8 = vmax.f32 %v2607_v6, 0.0  ;;  %v2576_v18 = vmul.f32 %v6045_v46, %v6045_v46  ;;  %v2544_v36 = vmul.f32 0.00390625, %v2440_v15  ;;  %2912 = vperm.xlu1 %4605, %v2762_v34   ;;  %v2668_v58 = vld [vmem:[%s6992_s8 + $0x38] sm:$0xff] }
 0x833   :  { %v4644_v7 = vpop.eup %4643  ;;  %3131 = vperm.xlu0 %4606, %v2857_v50   ;;  %v2283_v48 = vpop.xlane.xlu0 %2282  ;;  %v2826_v13 = vmul.f32 %v2762_v34, %v5983_v41  ;;  %v2795_v41 = vld [vmem:[%s6993_s9 + $0x30] sm:$0xff] }
 0x834   :  { %v2703_v47 = vadd.f32 1e-05, %v2639_v8  ;;  %v2608_v30 = vsub.f32 %v2544_v36, %v2576_v18  ;;  %v6056_v62 = vmul.f32 0.00390625, %v2283_v48  ;;  %v2763_v40 = vmul.f32 %v4644_v7, %v2667_v31 }
 0x835   :  { %v2443_v28 = vpop.xlane.xlu1 %2442  ;;  %v2858_v42 = vsub.f32 %v2794_v38, %v2826_v13 }
 0x836   :  { %4651 = vrsqrt.f32 %v2703_v47  ;;  %v2640_v6 = vmax.f32 %v2608_v30, 0.0  ;;  %v2577_v15 = vmul.f32 %v6056_v62, %v6056_v62  ;;  %v2545_v50 = vmul.f32 0.00390625, %v2443_v28  ;;  %2917 = vperm.xlu1 %4605, %v2763_v40   ;;  %v2669_v47 = vld [vmem:[%s6992_s8 + $0x40] sm:$0xff] }
 0x837   :  { %v4646_v34 = vpop.eup %4645  ;;  %3136 = vperm.xlu0 %4606, %v2858_v42   ;;  %v2286_v31 = vpop.xlane.xlu0 %2285  ;;  %v2827_v8 = vmul.f32 %v2763_v40, %v5990_v24  ;;  %v2796_v24 = vld [vmem:[%s6993_s9 + $0x38] sm:$0xff] }
 0x838   :  { %v2704_v18 = vadd.f32 1e-05, %v2640_v6  ;;  %v2609_v36 = vsub.f32 %v2545_v50, %v2577_v15  ;;  %v6067_v38 = vmul.f32 0.00390625, %v2286_v31  ;;  %v2764_v7 = vmul.f32 %v4646_v34, %v2668_v58  ;;  %v2670_v31 = vld [vmem:[%s6992_s8 + $0x48] sm:$0xff] }
 0x839   :  { %v2446_v48 = vpop.xlane.xlu1 %2445  ;;  %v2859_v13 = vsub.f32 %v2795_v41, %v2827_v8 }
 0x83a   :  { %4653 = vrsqrt.f32 %v2704_v18  ;;  %v2641_v30 = vmax.f32 %v2609_v36, 0.0  ;;  %v2578_v28 = vmul.f32 %v6067_v38, %v6067_v38  ;;  %v2546_v42 = vmul.f32 0.00390625, %v2446_v48  ;;  %2922 = vperm.xlu1 %4605, %v2764_v7   ;;  %v2797_v36 = vld [vmem:[%s6993_s9 + $0x40] sm:$0xff] }
 0x83b   :  { %v4648_v40 = vpop.eup %4647  ;;  %3141 = vperm.xlu0 %4606, %v2859_v13   ;;  %v2828_v58 = vmul.f32 %v2764_v7, %v6001_v21 }
 0x83c   :  { %v2705_v6 = vadd.f32 1e-05, %v2641_v30  ;;  %v2610_v15 = vsub.f32 %v2546_v42, %v2578_v28  ;;  %v2765_v50 = vmul.f32 %v4648_v40, %v2669_v47  ;;  %v2798_v40 = vld [vmem:[%s6993_s9 + $0x48] sm:$0xff] }
 0x83d   :  { %v2289_v41 = vpop.xlane.xlu1 %2288  ;;  %v2860_v34 = vsub.f32 %v2796_v24, %v2828_v58  ;;  %v2671_v24 = vld [vmem:[%s6992_s8 + $0x50] sm:$0xff] }
 0x83e   :  { %4655 = vrsqrt.f32 %v2705_v6  ;;  %v2642_v8 = vmax.f32 %v2610_v15, 0.0  ;;  %v6081_v18 = vmul.f32 0.00390625, %v2289_v41  ;;  %2927 = vperm.xlu1 %4605, %v2765_v50   ;;  %v2829_v21 = vmul.f32 %v2765_v50, %v6012_v60 }
 0x83f   :  { %v4650_v7 = vpop.eup %4649  ;;  %3146 = vperm.xlu0 %4606, %v2860_v34   ;;  %v2292_v48 = vpop.xlane.xlu0 %2291 }
 0x840   :  { %v2706_v13 = vadd.f32 1e-05, %v2642_v8  ;;  %v6087_v47 = vmul.f32 0.00390625, %v2292_v48  ;;  %v2766_v30 = vmul.f32 %v4650_v7, %v2670_v31  ;;  %v2861_v42 = vsub.f32 %v2797_v36, %v2829_v21  ;;  %v2672_v21 = vld [vmem:[%s6992_s8 + $0x58] sm:$0xff] }
 0x841   :  { %v2449_v28 = vpop.xlane.xlu1 %2448  ;;  %v2579_v60 = vmul.f32 %v6081_v18, %v6081_v18 }
 0x842   :  { %4657 = vrsqrt.f32 %v2706_v13  ;;  %v2547_v58 = vmul.f32 0.00390625, %v2449_v28  ;;  %2932 = vperm.xlu1 %4605, %v2766_v30   ;;  %v2830_v6 = vmul.f32 %v2766_v30, %v6023_v9  ;;  %v2580_v50 = vmul.f32 %v6087_v47, %v6087_v47  ;;  %v2799_v9 = vld [vmem:[%s6993_s9 + $0x50] sm:$0xff] }
 0x843   :  { %v4652_v15 = vpop.eup %4651  ;;  %3151 = vperm.xlu0 %4606, %v2861_v42   ;;  %v2452_v41 = vpop.xlane.xlu0 %2451 }
 0x844   :  { %v2611_v34 = vsub.f32 %v2547_v58, %v2579_v60  ;;  %v2548_v31 = vmul.f32 0.00390625, %v2452_v41  ;;  %v2767_v8 = vmul.f32 %v4652_v15, %v2671_v24  ;;  %v2862_v36 = vsub.f32 %v2798_v40, %v2830_v6  ;;  %v2673_v58 = vld [vmem:[%s6992_s8 + $0x60] sm:$0xff]  ;;  %v2800_v6 = vld [vmem:[%s6993_s9 + $0x58] sm:$0xff] }
 0x846   :  { %v2643_v7 = vmax.f32 %v2611_v34, 0.0  ;;  %v2612_v48 = vsub.f32 %v2548_v31, %v2580_v50  ;;  %2937 = vperm.xlu1 %4605, %v2767_v8   ;;  %v2831_v13 = vmul.f32 %v2767_v8, %v6034_v51 }
 0x847   :  { %v4654_v30 = vpop.eup %4653  ;;  %3156 = vperm.xlu0 %4606, %v2862_v36   ;;  %v6107_v28 = vpop.xlane.xlu0 %2294  ;;  %v2674_v36 = vld [vmem:[%s6992_s8 + $0x68] sm:$0xff] }
 0x848   :  { %v2707_v42 = vadd.f32 1e-05, %v2643_v7  ;;  %v2644_v24 = vmax.f32 %v2612_v48, 0.0  ;;  %v2768_v40 = vmul.f32 %v4654_v30, %v2672_v21  ;;  %v2863_v60 = vsub.f32 %v2799_v9, %v2831_v13  ;;  %v2801_v21 = vld [vmem:[%s6993_s9 + $0x60] sm:$0xff] }
 0x849   :  { %v6115_v15 = vpop.xlane.xlu1 %2457 }
 0x84a   :  { %4659 = vrsqrt.f32 %v2707_v42  ;;  %v2708_v51 = vadd.f32 1e-05, %v2644_v24  ;;  %2942 = vperm.xlu1 %4605, %v2768_v40   ;;  %v2832_v50 = vmul.f32 %v2768_v40, %v6045_v46  ;;  %v2675_v40 = vld [vmem:[%s6992_s8 + $0x70] sm:$0xff] }
 0x84b   :  { %v4656_v41 = vpop.eup %4655  ;;  %3161 = vperm.xlu0 %4606, %v2863_v60   ;;  %v6118_v34 = vpop.xlane.xlu0 %2454 }
 0x84c   :  { %4661 = vrsqrt.f32 %v2708_v51  ;;  %v2769_v31 = vmul.f32 %v4656_v41, %v2673_v58  ;;  %v2864_v8 = vsub.f32 %v2800_v6, %v2832_v50  ;;  %v2676_v6 = vld [vmem:[%s6992_s8 + $0x78] sm:$0xff] }
 0x84d   :  { %v6126_v7 = vpop.xlane.xlu1 %2460 }
 0x84e   :  { %2947 = vperm.xlu1 %4605, %v2769_v31   ;;  %v2833_v46 = vmul.f32 %v2769_v31, %v6056_v62  ;;  %v2802_v31 = vld [vmem:[%s6993_s9 + $0x68] sm:$0xff] }
 0x84f   :  { %v4658_v48 = vpop.eup %4657  ;;  %3166 = vperm.xlu0 %4606, %v2864_v8   ;;  %v6129_v9 = vpop.xlane.xlu0 %2297 }
 0x850   :  { %v2770_v13 = vmul.f32 %v4658_v48, %v2674_v36  ;;  %v2865_v30 = vsub.f32 %v2801_v21, %v2833_v46  ;;  %v2804_v46 = vld [vmem:[%s6993_s9 + $0x78] sm:$0xff] }
 0x851   :  { %v6131_v42 = vpop.xlane.xlu1 %2463 }
 0x852   :  { %2952 = vperm.xlu1 %4605, %v2770_v13   ;;  %v2834_v50 = vmul.f32 %v2770_v13, %v6067_v38  ;;  %v2803_v13 = vld [vmem:[%s6993_s9 + $0x70] sm:$0xff] }
 0x853   :  { %3171 = vperm.xlu0 %4606, %v2865_v30   ;;  %v6133_v24 = vpop.xlane.xlu0 %2300 }
 0x854   :  { %v2866_v48 = vsub.f32 %v2802_v31, %v2834_v50 }
 0x855   :  { %v6138_v60 = vpop.xlane.xlu1 %2466 }
 0x857   :  { %v4660_v58 = vpop.eup %4659  ;;  %v6140_v62 = vpop.xlane.xlu0 %2303 }
 0x858   :  { %v2771_v51 = vmul.f32 %v4660_v58, %v2675_v40 }
 0x859   :  { %v4662_v41 = vpop.eup %4661  ;;  %v6149_v8 = vpop.xlane.xlu1 %2469 }
 0x85a   :  { %2957 = vperm.xlu0 %4606, %v2771_v51   ;;  %v2772_v36 = vmul.f32 %v4662_v41, %v2676_v6  ;;  %v2835_v38 = vmul.f32 %v2771_v51, %v6081_v18  ;;  %v2554_v63 = vmul.f32 0.00390625, %v6149_v8 }
 0x85b   :  { %v6151_v21 = vpop.xlane.xlu0 %2306 }
 0x85c   :  { %2962 = vperm.xlu1 %4605, %v2772_v36   ;;  %v2836_v30 = vmul.f32 %v2772_v36, %v6087_v47  ;;  %v2867_v41 = vsub.f32 %v2803_v13, %v2835_v38 }
 0x85d   :  { %v6161_v40 = vpop.xlane.xlu1 %2472 }
 0x85e   :  { %3176 = vperm.xlu0 %4606, %v2866_v48   ;;  %v2868_v58 = vsub.f32 %v2804_v46, %v2836_v30 }
 0x85f   :  { %v6163_v6 = vpop.xlane.xlu0 %2309 }
 0x860   :  { %3186 = vperm.xlu1 %4605, %v2868_v58  }
 0x861   :  { %v2476_v52 = vpop.xlane.xlu1 %2475 }
 0x862   :  { %3181 = vperm.xlu0 %4606, %v2867_v41   ;;  %v2556_v36 = vmul.f32 0.00390625, %v2476_v52 }
 0x863   :  { %v2313_v3 = vpop.xlane.xlu0 %2312 }
 0x865   :  { %v2479_v50 = vpop.xlane.xlu1 %2478 }
 0x866   :  { %v2557_v13 = vmul.f32 0.00390625, %v2479_v50 }
 0x867   :  { %v2316_v31 = vpop.xlane.xlu0 %2315 }
 0x868   :  { %v6165_v47 = vmul.f32 0.00390625, %v2316_v31 }
 0x869   :  { %v2482_v18 = vpop.xlane.xlu1 %2481 }
 0x86a   :  { %v2588_v51 = vmul.f32 %v6165_v47, %v6165_v47 }
 0x86b   :  { %v2319_v2 = vpop.xlane.xlu0 %2318 }
 0x86c   :  { %v2620_v19 = vsub.f32 %v2556_v36, %v2588_v51  ;;  %v6169_v48 = vmul.f32 0.00390625, %v2319_v2  ;;  %v2558_v51 = vmul.f32 0.00390625, %v2482_v18 }
 0x86d   :  { %v2485_v46 = vpop.xlane.xlu1 %2484 }
 0x86e   :  { %v2652_v30 = vmax.f32 %v2620_v19, 0.0  ;;  %v2589_v38 = vmul.f32 %v6169_v48, %v6169_v48 }
 0x86f   :  { %v2322_v58 = vpop.xlane.xlu0 %2321 }
 0x870   :  { %v2716_v41 = vadd.f32 1e-05, %v2652_v30  ;;  %v2621_v37 = vsub.f32 %v2557_v13, %v2589_v38  ;;  %v6173_v31 = vmul.f32 0.00390625, %v2322_v58  ;;  %v2559_v38 = vmul.f32 0.00390625, %v2485_v46  ;;  %v2684_v46 = vld [vmem:[%s6992_s8 + $0xb8] sm:$0xff] }
 0x871   :  { %v2488_v27 = vpop.xlane.xlu1 %2487 }
 0x872   :  { %4663 = vrsqrt.f32 %v2716_v41  ;;  %v2653_v11 = vmax.f32 %v2621_v37, 0.0  ;;  %v2590_v52 = vmul.f32 %v6173_v31, %v6173_v31  ;;  %v2560_v18 = vmul.f32 0.00390625, %v2488_v27 }
 0x873   :  { %v2325_v2 = vpop.xlane.xlu0 %2324 }
 0x874   :  { %v2717_v36 = vadd.f32 1e-05, %v2653_v11  ;;  %v2622_v45 = vsub.f32 %v2558_v51, %v2590_v52  ;;  %v6177_v19 = vmul.f32 0.00390625, %v2325_v2 }
 0x875   :  { %v2491_v23 = vpop.xlane.xlu1 %2490 }
 0x876   :  { %4665 = vrsqrt.f32 %v2717_v36  ;;  %v2654_v50 = vmax.f32 %v2622_v45, 0.0  ;;  %v2591_v30 = vmul.f32 %v6177_v19, %v6177_v19 }
 0x877   :  { %v2328_v13 = vpop.xlane.xlu0 %2327 }
 0x878   :  { %v2718_v58 = vadd.f32 1e-05, %v2654_v50  ;;  %v2623_v41 = vsub.f32 %v2559_v38, %v2591_v30  ;;  %v6181_v37 = vmul.f32 0.00390625, %v2328_v13  ;;  %v2561_v38 = vmul.f32 0.00390625, %v2491_v23 }
 0x879   :  { %v2494_v52 = vpop.xlane.xlu1 %2493 }
 0x87a   :  { %4667 = vrsqrt.f32 %v2718_v58  ;;  %v2655_v5 = vmax.f32 %v2623_v41, 0.0  ;;  %v2592_v11 = vmul.f32 %v6181_v37, %v6181_v37  ;;  %v6192_v58 = vmul.f32 0.00390625, %v2313_v3 }
 0x87b   :  { %v2331_v51 = vpop.xlane.xlu0 %2330 }
 0x87c   :  { %v2719_v2 = vadd.f32 1e-05, %v2655_v5  ;;  %v2624_v36 = vsub.f32 %v2560_v18, %v2592_v11  ;;  %v6185_v45 = vmul.f32 0.00390625, %v2331_v51  ;;  %v2685_v51 = vld [vmem:[%s6992_s8 + $0xc0] sm:$0xff] }
 0x87d   :  { %v2497_v18 = vpop.xlane.xlu1 %2496 }
 0x87e   :  { %4669 = vrsqrt.f32 %v2719_v2  ;;  %v2656_v50 = vmax.f32 %v2624_v36, 0.0  ;;  %v2593_v30 = vmul.f32 %v6185_v45, %v6185_v45  ;;  %v2562_v36 = vmul.f32 0.00390625, %v2494_v52  ;;  %v2686_v52 = vld [vmem:[%s6992_s8 + $0xc8] sm:$0xff] }
 0x87f   :  { %v4664_v13 = vpop.eup %4663  ;;  %v2334_v27 = vpop.xlane.xlu0 %2333  ;;  %v2563_v12 = vmul.f32 0.00390625, %v2497_v18 }
 0x880   :  { %v2720_v41 = vadd.f32 1e-05, %v2656_v50  ;;  %v2625_v54 = vsub.f32 %v2561_v38, %v2593_v30  ;;  %v6194_v5 = vmul.f32 0.00390625, %v2334_v27  ;;  %v6196_v11 = vmul.f32 %v4664_v13, %v2684_v46 }
 0x881   :  { %v6205_v50 = vmul.f32 0.00390625, %v6163_v6  ;;  %v2587_v46 = vmul.f32 %v6192_v58, %v6192_v58  ;;  %v2500_v43 = vpop.xlane.xlu1 %2499 }
 0x882   :  { %4671 = vrsqrt.f32 %v2720_v41  ;;  %v2657_v2 = vmax.f32 %v2625_v54, 0.0  ;;  %v2594_v23 = vmul.f32 %v6194_v5, %v6194_v5  ;;  %3002 = vperm.xlu1 %4605, %v6196_v11   ;;  %v2555_v54 = vmul.f32 0.00390625, %v6161_v40 }
 0x883   :  { %v4666_v3 = vpop.eup %4665  ;;  %v2337_v30 = vpop.xlane.xlu0 %2336  ;;  %v6222_v40 = vmul.f32 0.00390625, %v6151_v21  ;;  %v2586_v18 = vmul.f32 %v6205_v50, %v6205_v50  ;;  %v2564_v17 = vmul.f32 0.00390625, %v2500_v43  ;;  %v2814_v21 = vld [vmem:[%s6993_s9 + $0xc8] sm:$0xff]  ;;  %v6239_v43 = vmul.f32 0.00390625, %v6140_v62  ;;  %v2815_v62 = vld [vmem:[%s6993_s9 + $0xd0] sm:$0xff] }
 0x884   :  { %v2721_v38 = vadd.f32 1e-05, %v2657_v2  ;;  %v2626_v13 = vsub.f32 %v2562_v36, %v2594_v23  ;;  %v6209_v27 = vmul.f32 0.00390625, %v2337_v30  ;;  %v2781_v41 = vmul.f32 %v4666_v3, %v2685_v51  ;;  %v2813_v2 = vld [vmem:[%s6993_s9 + $0xc0] sm:$0xff] }
 0x885   :  { %v2619_v36 = vsub.f32 %v2555_v54, %v2587_v46  ;;  %v2585_v8 = vmul.f32 %v6222_v40, %v6222_v40  ;;  %v2618_v54 = vsub.f32 %v2554_v63, %v2586_v18 }
 0x886   :  { %4673 = vrsqrt.f32 %v2721_v38  ;;  %v2658_v29 = vmax.f32 %v2626_v13, 0.0  ;;  %v2595_v6 = vmul.f32 %v6209_v27, %v6209_v27  ;;  %3007 = vperm.xlu1 %4605, %v2781_v41   ;;  %v2845_v51 = vmul.f32 %v2781_v41, %v6169_v48  ;;  %v2687_v48 = vld [vmem:[%s6992_s8 + $0xd0] sm:$0xff] }
 0x887   :  { %v4668_v23 = vpop.eup %4667  ;;  %v2340_v3 = vpop.xlane.xlu0 %2339 }
 0x888   :  { %v2722_v30 = vadd.f32 1e-05, %v2658_v29  ;;  %v2627_v38 = vsub.f32 %v2563_v12, %v2595_v6  ;;  %v6226_v13 = vmul.f32 0.00390625, %v2340_v3  ;;  %v2782_v22 = vmul.f32 %v4668_v23, %v2686_v52 }
 0x889   :  { %v2877_v35 = vsub.f32 %v2813_v2, %v2845_v51  ;;  %v2651_v52 = vmax.f32 %v2619_v36, 0.0  ;;  %v2553_v3 = vmul.f32 0.00390625, %v6138_v60  ;;  %v2584_v60 = vmul.f32 %v6239_v43, %v6239_v43 }
 0x88a   :  { %4675 = vrsqrt.f32 %v2722_v30  ;;  %v2659_v46 = vmax.f32 %v2627_v38, 0.0  ;;  %v2596_v12 = vmul.f32 %v6226_v13, %v6226_v13  ;;  %3012 = vperm.xlu1 %4605, %v2782_v22   ;;  %v2846_v29 = vmul.f32 %v2782_v22, %v6173_v31  ;;  %v2688_v22 = vld [vmem:[%s6992_s8 + $0xd8] sm:$0xff] }
 0x88b   :  { %v4670_v41 = vpop.eup %4669  ;;  %3231 = vperm.xlu0 %4606, %v2877_v35   ;;  %v2617_v18 = vsub.f32 %v2553_v3, %v2585_v8  ;;  %v2650_v36 = vmax.f32 %v2618_v54, 0.0  ;;  %v2715_v30 = vadd.f32 1e-05, %v2651_v52 }
 0x88c   :  { %v2723_v6 = vadd.f32 1e-05, %v2659_v46  ;;  %v2628_v2 = vsub.f32 %v2564_v17, %v2596_v12  ;;  %v2783_v51 = vmul.f32 %v4670_v41, %v2687_v48  ;;  %v2878_v23 = vsub.f32 %v2814_v21, %v2846_v29 }
 0x88d   :  { %v6252_v17 = vmul.f32 0.00390625, %v6133_v24  ;;  %v2552_v46 = vmul.f32 0.00390625, %v6131_v42  ;;  %v2816_v24 = vld [vmem:[%s6993_s9 + $0xd8] sm:$0xff]  ;;  %v6265_v41 = vmul.f32 0.00390625, %v6129_v9  ;;  %v2649_v54 = vmax.f32 %v2617_v18, 0.0  ;;  %v2690_v9 = vld [vmem:[%s6992_s8 + $0xe8] sm:$0xff] }
 0x88e   :  { %4677 = vrsqrt.f32 %v2723_v6  ;;  %v2660_v31 = vmax.f32 %v2628_v2, 0.0  ;;  %3017 = vperm.xlu1 %4605, %v2783_v51   ;;  %v2847_v63 = vmul.f32 %v2783_v51, %v6177_v19  ;;  %v2689_v19 = vld [vmem:[%s6992_s8 + $0xe0] sm:$0xff]  ;;  %v2714_v52 = vadd.f32 1e-05, %v2650_v36 }
 0x88f   :  { %v4672_v35 = vpop.eup %4671  ;;  %3236 = vperm.xlu0 %4606, %v2878_v23   ;;  %v2583_v8 = vmul.f32 %v6252_v17, %v6252_v17  ;;  %v2616_v42 = vsub.f32 %v2552_v46, %v2584_v60  ;;  %v6270_v51 = vmul.f32 0.00390625, %v6107_v28  ;;  %v2551_v23 = vmul.f32 0.00390625, %v6126_v7 }
 0x890   :  { %v2724_v38 = vadd.f32 1e-05, %v2660_v31  ;;  %v2784_v48 = vmul.f32 %v4672_v35, %v2688_v22  ;;  %v2879_v21 = vsub.f32 %v2815_v62, %v2847_v63  ;;  %v2549_v62 = vmul.f32 0.00390625, %v6118_v34  ;;  %v2691_v34 = vld [vmem:[%s6992_s8 + $0xf0] sm:$0xff] }
 0x891   :  { %v2582_v28 = vmul.f32 %v6265_v41, %v6265_v41  ;;  %v2615_v31 = vsub.f32 %v2551_v23, %v2583_v8  ;;  %v2648_v63 = vmax.f32 %v2616_v42, 0.0  ;;  %v2713_v7 = vadd.f32 1e-05, %v2649_v54  ;;  %v2819_v8 = vld [vmem:[%s6993_s9 + $0xf0] sm:$0xff]  ;;  %v2692_v42 = vld [vmem:[%s6992_s8 + $0xf8] sm:$0xff] }
 0x892   :  { %4679 = vrsqrt.f32 %v2724_v38  ;;  %3022 = vperm.xlu1 %4605, %v2784_v48   ;;  %v2848_v12 = vmul.f32 %v2784_v48, %v6181_v37  ;;  %v2817_v37 = vld [vmem:[%s6993_s9 + $0xe0] sm:$0xff]  ;;  %v2581_v18 = vmul.f32 %v6270_v51, %v6270_v51  ;;  %v2550_v36 = vmul.f32 0.00390625, %v6115_v15 }
 0x893   :  { %v4674_v29 = vpop.eup %4673  ;;  %3241 = vperm.xlu0 %4606, %v2879_v21   ;;  %4681 = vrsqrt.f32 %v2715_v30 }
 0x894   :  { %v2785_v6 = vmul.f32 %v4674_v29, %v2689_v19  ;;  %v2880_v2 = vsub.f32 %v2816_v24, %v2848_v12  ;;  %4683 = vrsqrt.f32 %v2714_v52  ;;  %v2613_v21 = vsub.f32 %v2549_v62, %v2581_v18  ;;  %v2683_v62 = vld [vmem:[%s6992_s8 + $0xb0] sm:$0xff] }
 0x895   :  { %v2614_v46 = vsub.f32 %v2550_v36, %v2582_v28  ;;  %v2647_v19 = vmax.f32 %v2615_v31, 0.0  ;;  %v2712_v24 = vadd.f32 1e-05, %v2648_v63  ;;  %4685 = vrsqrt.f32 %v2713_v7  ;;  %v2820_v28 = vld [vmem:[%s6993_s9 + $0xf8] sm:$0xff] }
 0x896   :  { %3027 = vperm.xlu1 %4605, %v2785_v6   ;;  %v2849_v3 = vmul.f32 %v2785_v6, %v6185_v45  ;;  %v2818_v45 = vld [vmem:[%s6993_s9 + $0xe8] sm:$0xff]  ;;  %v2645_v6 = vmax.f32 %v2613_v21, 0.0 }
 0x897   :  { %v4676_v22 = vpop.eup %4675  ;;  %3246 = vperm.xlu0 %4606, %v2880_v2   ;;  %v2646_v2 = vmax.f32 %v2614_v46, 0.0  ;;  %v2711_v23 = vadd.f32 1e-05, %v2647_v19  ;;  %4687 = vrsqrt.f32 %v2712_v24  ;;  %v2681_v24 = vld [vmem:[%s6992_s8 + $0xa0] sm:$0xff] }
 0x898   :  { %v2786_v35 = vmul.f32 %v4676_v22, %v2690_v9  ;;  %v2881_v60 = vsub.f32 %v2817_v37, %v2849_v3  ;;  %v2709_v63 = vadd.f32 1e-05, %v2645_v6 }
 0x899   :  { %v6286_v30 = vpop.permute.xlu1 %2887  ;;  %v2710_v7 = vadd.f32 1e-05, %v2646_v2  ;;  %4689 = vrsqrt.f32 %v2711_v23  ;;  %v2810_v2 = vld [vmem:[%s6993_s9 + $0xa8] sm:$0xff] }
 0x89a   :  { %3032 = vperm.xlu1 %4605, %v2786_v35   ;;  %v2850_v38 = vmul.f32 %v2786_v35, %v6194_v5  ;;  %4691 = vrsqrt.f32 %v2709_v63 }
 0x89b   :  { %v4678_v48 = vpop.eup %4677  ;;  %3251 = vperm.xlu0 %4606, %v2881_v60   ;;  %4693 = vrsqrt.f32 %v2710_v7 }
 0x89c   :  { %v2787_v15 = vmul.f32 %v4678_v48, %v2691_v34  ;;  %v2882_v12 = vsub.f32 %v2818_v45, %v2850_v38  ;;  %v2682_v34 = vld [vmem:[%s6992_s8 + $0xa8] sm:$0xff]  ;;  %v2844_v45 = vmul.f32 %v6196_v11, %v6165_v47 }
 0x89d   :  { %v6295_v29 = vpop.permute.xlu1 %2892 }
 0x89e   :  { %v6303_v5 = vpop.permute.xlu0 %3111  ;;  %3037 = vperm.xlu1 %4605, %v2787_v15   ;;  %v2851_v54 = vmul.f32 %v2787_v15, %v6209_v27  ;;  %v2811_v15 = vld [vmem:[%s6993_s9 + $0xb0] sm:$0xff] }
 0x89f   :  { %7090 = vst [vmem:[#allocation49_spill] sm:$0xff] %v6303_v5  ;;  %v4680_v52 = vpop.eup %4679  ;;  %3256 = vperm.xlu0 %4606, %v2882_v12  }
 0x8a0   :  { %v2883_v9 = vsub.f32 %v2819_v8, %v2851_v54  ;;  %v2788_v37 = vmul.f32 %v4680_v52, %v2692_v42  ;;  %v4682_v3 = vpop.eup %4681  ;;  %v2680_v52 = vld [vmem:[%s6992_s8 + $0x98] sm:$0xff] }
 0x8a1   :  { %v6306_v22 = vpop.permute.xlu1 %2897  ;;  %v2779_v35 = vmul.f32 %v4682_v3, %v2683_v62  ;;  %v4684_v18 = vpop.eup %4683  ;;  %v2679_v62 = vld [vmem:[%s6992_s8 + $0x90] sm:$0xff] }
 0x8a2   :  { %v6314_v27 = vpop.permute.xlu0 %3116  ;;  %3042 = vperm.xlu1 %4605, %v2788_v37   ;;  %v2852_v31 = vmul.f32 %v2788_v37, %v6226_v13  ;;  %v2812_v13 = vld [vmem:[%s6993_s9 + $0xb8] sm:$0xff]  ;;  %v2778_v48 = vmul.f32 %v4684_v18, %v2682_v34  ;;  %v4686_v21 = vpop.eup %4685  ;;  %v2678_v34 = vld [vmem:[%s6992_s8 + $0x88] sm:$0xff] }
 0x8a3   :  { %3261 = vperm.xlu0 %4606, %v2883_v9   ;;  %v2876_v19 = vsub.f32 %v2812_v13, %v2844_v45  ;;  %v2843_v47 = vmul.f32 %v2779_v35, %v6192_v58  ;;  %v2777_v12 = vmul.f32 %v4686_v21, %v2681_v24  ;;  %v2677_v45 = vld [vmem:[%s6992_s8 + $0x80] sm:$0xff] }
 0x8a4   :  { %v2884_v60 = vsub.f32 %v2820_v28, %v2852_v31  ;;  %v4688_v8 = vpop.eup %4687  ;;  %v2842_v6 = vmul.f32 %v2778_v48, %v6205_v50  ;;  %v2809_v31 = vld [vmem:[%s6993_s9 + $0xa0] sm:$0xff] }
 0x8a5   :  { %v6317_v36 = vpop.permute.xlu1 %2902  ;;  %v2875_v54 = vsub.f32 %v2811_v15, %v2843_v47  ;;  %v2776_v23 = vmul.f32 %v4688_v8, %v2680_v52  ;;  %v2841_v28 = vmul.f32 %v2777_v12, %v6222_v40 }
 0x8a6   :  { %v6324_v38 = vpop.permute.xlu0 %3121  ;;  %2997 = vperm.xlu1 %4605, %v2779_v35   ;;  %v4690_v9 = vpop.eup %4689  ;;  %v2874_v3 = vsub.f32 %v2810_v2, %v2842_v6  ;;  %v2805_v6 = vld [vmem:[%s6993_s9 + $0x80] sm:$0xff] }
 0x8a7   :  { %3266 = vperm.xlu0 %4606, %v2884_v60   ;;  %v4692_v63 = vpop.eup %4691  ;;  %v2775_v7 = vmul.f32 %v4690_v9, %v2679_v62  ;;  %v2873_v18 = vsub.f32 %v2809_v31, %v2841_v28  ;;  %v2840_v40 = vmul.f32 %v2776_v23, %v6239_v43 }
 0x8a8   :  { %v4694_v35 = vpop.eup %4693 }
 0x8a9   :  { %v6329_v46 = vpop.permute.xlu1 %2907  ;;  %v2774_v21 = vmul.f32 %v4694_v35, %v2678_v34  ;;  %v2839_v15 = vmul.f32 %v2775_v7, %v6252_v17 }
 0x8aa   :  { %v6335_v11 = vpop.permute.xlu0 %3126  ;;  %2992 = vperm.xlu1 %4605, %v2778_v48   ;;  %v2808_v48 = vld [vmem:[%s6993_s9 + $0x98] sm:$0xff] }
 0x8ab   :  { %3226 = vperm.xlu0 %4606, %v2876_v19   ;;  %v2773_v19 = vmul.f32 %v4692_v63, %v2677_v45  ;;  %v2872_v47 = vsub.f32 %v2808_v48, %v2840_v40  ;;  %v2838_v2 = vmul.f32 %v2774_v21, %v6265_v41  ;;  %v3462_v41 = vld [vmem:[%s6994_s10 + $0x8] sm:$0xff] }
 0x8ac   :  { %3557 = vmatprep.mubr.f32.mxu0 %v3462_v41 }
 0x8ad   :  { %v6340_v42 = vpop.permute.xlu1 %2912  ;;  %v2837_v8 = vmul.f32 %v2773_v19, %v6270_v51 }
 0x8ae   :  { %v6346_v58 = vpop.permute.xlu0 %3131  ;;  %2987 = vperm.xlu1 %4605, %v2777_v12   ;;  %v2807_v12 = vld [vmem:[%s6993_s9 + $0x90] sm:$0xff] }
 0x8af   :  { %3221 = vperm.xlu0 %4606, %v2875_v54   ;;  %v2871_v52 = vsub.f32 %v2807_v12, %v2839_v15  ;;  %v2869_v9 = vsub.f32 %v2805_v6, %v2837_v8 }
 0x8b1   :  { %v6351_v37 = vpop.permute.xlu1 %2917 }
 0x8b2   :  { %v6357_v50 = vpop.permute.xlu0 %3136  ;;  %2982 = vperm.xlu1 %4605, %v2776_v23   ;;  %v2806_v23 = vld [vmem:[%s6993_s9 + $0x88] sm:$0xff] }
 0x8b3   :  { %3216 = vperm.xlu0 %4606, %v2874_v3   ;;  %v2870_v51 = vsub.f32 %v2806_v23, %v2838_v2 }
 0x8b5   :  { %v6362_v60 = vpop.permute.xlu1 %2922 }
 0x8b6   :  { %v6371_v13 = vpop.permute.xlu0 %3141  ;;  %2977 = vperm.xlu1 %4605, %v2775_v7  }
 0x8b7   :  { %3211 = vperm.xlu0 %4606, %v2873_v18  }
 0x8b9   :  { %v6376_v24 = vpop.permute.xlu1 %2927 }
 0x8ba   :  { %v6379_v43 = vpop.permute.xlu0 %3146  ;;  %2972 = vperm.xlu1 %4605, %v2774_v21  }
 0x8bb   :  { %3206 = vperm.xlu0 %4606, %v2872_v47  }
 0x8bd   :  { %v6385_v54 = vpop.permute.xlu1 %2932 }
 0x8be   :  { %v6391_v17 = vpop.permute.xlu0 %3151  ;;  %2967 = vperm.xlu1 %4605, %v2773_v19  }
 0x8bf   :  { %3201 = vperm.xlu0 %4606, %v2871_v52  }
 0x8c1   :  { %v2938_v3 = vpop.permute.xlu1 %2937 }
 0x8c2   :  { %v3157_v62 = vpop.permute.xlu0 %3156  ;;  %3191 = vperm.xlu1 %4605, %v2869_v9   ;;  %v3066_v15 = vmul.f32 %v2938_v3, %v5745_v10 }
 0x8c3   :  { %3196 = vperm.xlu0 %4606, %v2870_v51  }
 0x8c5   :  { %v2943_v31 = vpop.permute.xlu1 %2942 }
 0x8c6   :  { %v3162_v28 = vpop.permute.xlu0 %3161 }
 0x8c9   :  { %v2948_v7 = vpop.permute.xlu1 %2947 }
 0x8ca   :  { %v3167_v63 = vpop.permute.xlu0 %3166  ;;  %v3070_v6 = vmul.f32 %v2948_v7, %v5765_v0 }
 0x8cd   :  { %v2953_v18 = vpop.permute.xlu1 %2952 }
 0x8ce   :  { %v3172_v35 = vpop.permute.xlu0 %3171  ;;  %v3072_v19 = vmul.f32 %v2953_v18, %v5775_v44  ;;  %v3071_v12 = vmul.f32 %v2953_v18, %v5773_v39  ;;  %v3067_v18 = vmul.f32 %v2943_v31, %v5753_v57  ;;  %v3063_v57 = vmul.f32 %v6385_v54, %v5733_v16 }
 0x8cf   :  { %v3294_v10 = vadd.f32 %v3172_v35, %v3070_v6 }
 0x8d5   :  { %v2958_v34 = vpop.permute.xlu0 %2957 }
 0x8d6   :  { %v3073_v2 = vmul.f32 %v2958_v34, %v5783_v55  ;;  %v3074_v23 = vmul.f32 %v2958_v34, %v5785_v4 }
 0x8d7   :  { %v2963_v40 = vpop.permute.xlu1 %2962 }
 0x8d8   :  { %v3075_v48 = vmul.f32 %v2963_v40, %v5787_v26  ;;  %v3076_v21 = vmul.f32 %v2963_v40, %v5793_v33  ;;  %v3069_v26 = vmul.f32 %v2948_v7, %v5763_v1  ;;  %v3068_v40 = vmul.f32 %v2943_v31, %v5755_v59 }
 0x8d9   :  { %v3177_v45 = vpop.permute.xlu0 %3176  ;;  %v3064_v1 = vmul.f32 %v6385_v54, %v5735_v32  ;;  %v3065_v7 = vmul.f32 %v2938_v3, %v5743_v20  ;;  %v3290_v59 = vadd.f32 %v3162_v28, %v3066_v15  ;;  %v3061_v20 = vmul.f32 %v6376_v24, %v5723_v25 }
 0x8da   :  { %v3296_v9 = vadd.f32 %v3177_v45, %v3072_v19  ;;  %v3295_v33 = vadd.f32 %v3177_v45, %v3071_v12  ;;  %v3292_v55 = vadd.f32 %v3167_v63, %v3068_v40  ;;  %v3291_v45 = vadd.f32 %v3167_v63, %v3067_v18 }
 0x8db   :  { %v3187_v47 = vpop.permute.xlu1 %3186  ;;  %v3358_v12 = vmul.f32 0.2, %v3294_v10  ;;  %v3289_v31 = vadd.f32 %v3162_v28, %v3065_v7  ;;  %v3287_v3 = vadd.f32 %v3157_v62, %v3063_v57  ;;  %v3060_v15 = vmul.f32 %v6362_v60, %v5715_v56 }
 0x8dc   :  { %v3299_v8 = vadd.f32 %v3187_v47, %v3075_v48  ;;  %v3300_v52 = vadd.f32 %v3187_v47, %v3076_v21  ;;  %v3293_v48 = vadd.f32 %v3172_v35, %v3069_v26  ;;  %v3360_v47 = vmul.f32 0.2, %v3296_v9 }
 0x8dd   :  { %v3182_v51 = vpop.permute.xlu0 %3181  ;;  %v3359_v19 = vmul.f32 0.2, %v3295_v33  ;;  %v3356_v32 = vmul.f32 0.2, %v3292_v55  ;;  %v3355_v63 = vmul.f32 0.2, %v3291_v45  ;;  %v3422_v28 = vmax.f32 %v3294_v10, %v3358_v12 }
 0x8de   :  { %v3363_v41 = vmul.f32 0.2, %v3299_v8  ;;  %v3364_v44 = vmul.f32 0.2, %v3300_v52  ;;  %v3297_v5 = vadd.f32 %v3182_v51, %v3073_v2  ;;  %v3298_v39 = vadd.f32 %v3182_v51, %v3074_v23 }
 0x8df   :  { %v3357_v35 = vmul.f32 0.2, %v3293_v48  ;;  %v3424_v23 = vmax.f32 %v3296_v9, %v3360_v47  ;;  %v3354_v54 = vmul.f32 0.2, %v3290_v59  ;;  %v3285_v9 = vadd.f32 %v6391_v17, %v3061_v20 }
 0x8e0   :  { %v3427_v0 = vmax.f32 %v3299_v8, %v3363_v41  ;;  %v3428_v21 = vmax.f32 %v3300_v52, %v3364_v44  ;;  %v3361_v4 = vmul.f32 0.2, %v3297_v5  ;;  %v3362_v34 = vmul.f32 0.2, %v3298_v39 }
 0x8e1   :  { %v3062_v8 = vmul.f32 %v6376_v24, %v5725_v53  ;;  %v3288_v52 = vadd.f32 %v3157_v62, %v3064_v1  ;;  %v3059_v53 = vmul.f32 %v6362_v60, %v5713_v49  ;;  %v3353_v51 = vmul.f32 0.2, %v3289_v31  ;;  %v7091_v60 = vld [vmem:[#allocation16_spill] sm:$0xff] }
 0x8e2   :  { %3493 = vmatprep.subr.mxu0 %v3428_v21  ;;  %v3425_v6 = vmax.f32 %v3297_v5, %v3361_v4  ;;  %v3426_v2 = vmax.f32 %v3298_v39, %v3362_v34  ;;  %v3423_v5 = vmax.f32 %v3295_v33, %v3359_v19  ;;  %v3421_v26 = vmax.f32 %v3293_v48, %v3357_v35  ;;  %v7092_v39 = vld [vmem:[#allocation15_spill] sm:$0xff]  ;;  %v7094_v4 = vld [vmem:[#allocation13_spill] sm:$0xff] }
 0x8e3   :  { %3494 = vmatpush1.msra.mxu0 %v3427_v0  ;;  %v3286_v16 = vadd.f32 %v6391_v17, %v3062_v8  ;;  %v3058_v25 = vmul.f32 %v6351_v37, %v5705_v61  ;;  %v3284_v24 = vadd.f32 %v6379_v43, %v3060_v15  ;;  %v3352_v62 = vmul.f32 0.2, %v3288_v52 }
 0x8e4   :  { %3495 = vmatprep.subr.mxu0 %v3426_v2  ;;  %v3420_v56 = vmax.f32 %v3292_v55, %v3356_v32  ;;  %v3057_v33 = vmul.f32 %v6351_v37, %v5703_v14  ;;  %v3283_v41 = vadd.f32 %v6379_v43, %v3059_v53  ;;  %v3351_v44 = vmul.f32 0.2, %v3287_v3  ;;  %v7093_v37 = vld [vmem:[#allocation14_spill] sm:$0xff] }
 0x8e5   :  { %3496 = vmatpush1.msra.mxu0 %v3425_v6  ;;  %v3419_v49 = vmax.f32 %v3291_v45, %v3355_v63  ;;  %v3056_v17 = vmul.f32 %v6340_v42, %v7091_v60  ;;  %v3282_v40 = vadd.f32 %v6371_v13, %v3058_v25  ;;  %v3350_v10 = vmul.f32 0.2, %v3286_v16  ;;  %v7096_v6 = vld [vmem:[#allocation11_spill] sm:$0xff] }
 0x8e6   :  { %3497 = vmatprep.subr.mxu0 %v3424_v23  ;;  %v3418_v61 = vmax.f32 %v3290_v59, %v3354_v54  ;;  %v3055_v18 = vmul.f32 %v6340_v42, %v7092_v39  ;;  %v3281_v48 = vadd.f32 %v6371_v13, %v3057_v33  ;;  %v3349_v0 = vmul.f32 0.2, %v3285_v9  ;;  %v7095_v13 = vld [vmem:[#allocation12_spill] sm:$0xff]  ;;  %v7098_v23 = vld [vmem:[#allocation9_spill] sm:$0xff] }
 0x8e7   :  { %3498 = vmatpush1.msra.mxu0 %v3423_v5  ;;  %v3417_v14 = vmax.f32 %v3289_v31, %v3353_v51  ;;  %v3054_v43 = vmul.f32 %v6329_v46, %v7093_v37  ;;  %v3280_v21 = vadd.f32 %v6357_v50, %v3056_v17  ;;  %v3348_v55 = vmul.f32 0.2, %v3284_v24 }
 0x8e8   :  { %3499 = vmatprep.subr.mxu0 %v3422_v28  ;;  %v3416_v47 = vmax.f32 %v3288_v52, %v3352_v62  ;;  %v3053_v34 = vmul.f32 %v6329_v46, %v7094_v4  ;;  %v3279_v1 = vadd.f32 %v6357_v50, %v3055_v18  ;;  %v3347_v7 = vmul.f32 0.2, %v3283_v41  ;;  %v7097_v50 = vld [vmem:[#allocation10_spill] sm:$0xff]  ;;  %v7100_v28 = vld [vmem:[#allocation7_spill] sm:$0xff] }
 0x8e9   :  { %3500 = vmatpush1.msra.mxu0 %v3421_v26  ;;  %v3415_v42 = vmax.f32 %v3287_v3, %v3351_v44  ;;  %v3052_v45 = vmul.f32 %v6317_v36, %v7095_v13  ;;  %v3278_v19 = vadd.f32 %v6346_v58, %v3054_v43  ;;  %v3346_v59 = vmul.f32 0.2, %v3282_v40 }
 0x8ea   :  { %3501 = vmatprep.subr.mxu0 %v3420_v56  ;;  %v3414_v12 = vmax.f32 %v3286_v16, %v3350_v10  ;;  %v3051_v2 = vmul.f32 %v6317_v36, %v7096_v6  ;;  %v3277_v57 = vadd.f32 %v6346_v58, %v3053_v34  ;;  %v3345_v31 = vmul.f32 0.2, %v3281_v48  ;;  %v7099_v58 = vld [vmem:[#allocation8_spill] sm:$0xff]  ;;  %v7102_v56 = vld [vmem:[#allocation5_spill] sm:$0xff] }
 0x8eb   :  { %3502 = vmatpush1.msra.mxu0 %v3419_v49  ;;  %v3413_v46 = vmax.f32 %v3285_v9, %v3349_v0  ;;  %v3050_v35 = vmul.f32 %v6306_v22, %v7097_v50  ;;  %v3276_v8 = vadd.f32 %v6335_v11, %v3052_v45  ;;  %v3344_v52 = vmul.f32 0.2, %v3280_v21 }
 0x8ec   :  { %3503 = vmatprep.subr.mxu0 %v3418_v61  ;;  %v3412_v32 = vmax.f32 %v3284_v24, %v3348_v55  ;;  %v3049_v20 = vmul.f32 %v6306_v22, %v7098_v23  ;;  %v3275_v3 = vadd.f32 %v6335_v11, %v3051_v2  ;;  %v3343_v63 = vmul.f32 0.2, %v3279_v1  ;;  %v7101_v11 = vld [vmem:[#allocation6_spill] sm:$0xff]  ;;  %v7106_v23 = vld [vmem:[#allocation44_spill] sm:$0xff] }
 0x8ed   :  { %3504 = vmatpush1.msra.mxu0 %v3417_v14  ;;  %v3411_v36 = vmax.f32 %v3283_v41, %v3347_v7  ;;  %v3048_v5 = vmul.f32 %v6295_v29, %v7099_v58  ;;  %v3274_v15 = vadd.f32 %v6324_v38, %v3050_v35  ;;  %v3342_v16 = vmul.f32 0.2, %v3278_v19  ;;  %v7104_v35 = vld [vmem:[#allocation46_spill] sm:$0xff] }
 0x8ee   :  { %3505 = vmatprep.subr.mxu0 %v3416_v47  ;;  %v3410_v54 = vmax.f32 %v3282_v40, %v3346_v59  ;;  %v3047_v53 = vmul.f32 %v6295_v29, %v7100_v28  ;;  %v3273_v9 = vadd.f32 %v6324_v38, %v3049_v20  ;;  %v3341_v51 = vmul.f32 0.2, %v3277_v57  ;;  %v7103_v38 = vld [vmem:[#allocation49_spill] sm:$0xff] }
 0x8ef   :  { %3506 = vmatpush1.msra.mxu0 %v3415_v42  ;;  %v3409_v22 = vmax.f32 %v3281_v48, %v3345_v31  ;;  %v3046_v26 = vmul.f32 %v6286_v30, %v7101_v11  ;;  %v3272_v25 = vadd.f32 %v6314_v27, %v3048_v5  ;;  %v3340_v24 = vmul.f32 0.2, %v3276_v8 }
 0x8f0   :  { %3507 = vmatprep.subr.mxu0 %v3414_v12  ;;  %v3408_v62 = vmax.f32 %v3280_v21, %v3344_v52  ;;  %v3045_v33 = vmul.f32 %v6286_v30, %v7102_v56  ;;  %v3271_v41 = vadd.f32 %v6314_v27, %v3047_v53  ;;  %v3339_v44 = vmul.f32 0.2, %v3275_v3  ;;  %v7105_v52 = vld [vmem:[#allocation45_spill] sm:$0xff] }
 0x8f1   :  { %3508 = vmatpush1.msra.mxu0 %v3413_v46  ;;  %v3407_v29 = vmax.f32 %v3279_v1, %v3343_v63  ;;  %v3270_v49 = vadd.f32 %v7103_v38, %v3046_v26  ;;  %v3338_v60 = vmul.f32 0.2, %v3274_v15  ;;  %v3406_v17 = vmax.f32 %v3278_v19, %v3342_v16  ;;  %v7109_v16 = vld [vmem:[#allocation43_spill] sm:$0xff] }
 0x8f2   :  { %3509 = vmatprep.subr.mxu0 %v3412_v32  ;;  %v3269_v40 = vadd.f32 %v7103_v38, %v3045_v33  ;;  %v3337_v10 = vmul.f32 0.2, %v3273_v9  ;;  %v3405_v61 = vmax.f32 %v3277_v57, %v3341_v51  ;;  %v3336_v39 = vmul.f32 0.2, %v3272_v25 }
 0x8f3   :  { %3510 = vmatpush1.msra.mxu0 %v3411_v36  ;;  %v3404_v18 = vmax.f32 %v3276_v8, %v3340_v24  ;;  %v3335_v48 = vmul.f32 0.2, %v3271_v41  ;;  %v3403_v30 = vmax.f32 %v3275_v3, %v3339_v44  ;;  %v3334_v27 = vmul.f32 0.2, %v3270_v49  ;;  %v7107_v3 = vld [vmem:[#allocation47_spill] sm:$0xff]  ;;  %v7108_v36 = vld [vmem:[#allocation48_spill] sm:$0xff] }
 0x8f4   :  { %3511 = vmatprep.subr.mxu0 %v3410_v54  ;;  %v3402_v0 = vmax.f32 %v3274_v15, %v3338_v60  ;;  %v3333_v14 = vmul.f32 0.2, %v3269_v40  ;;  %v3401_v37 = vmax.f32 %v3273_v9, %v3337_v10  ;;  %v3400_v21 = vmax.f32 %v3272_v25, %v3336_v39  ;;  %v7110_v9 = vld [vmem:[#allocation42_spill] sm:$0xff]  ;;  %v7111_v25 = vld [vmem:[#allocation40_spill] sm:$0xff] }
 0x8f5   :  { %3512 = vmatpush1.msra.mxu0 %v3409_v22  ;;  %v3399_v55 = vmax.f32 %v3271_v41, %v3335_v48  ;;  %v3398_v47 = vmax.f32 %v3270_v49, %v3334_v27  ;;  %v7113_v60 = vld [vmem:[#allocation38_spill] sm:$0xff] }
 0x8f6   :  { %3513 = vmatprep.subr.mxu0 %v3408_v62  ;;  %v3397_v4 = vmax.f32 %v3269_v40, %v3333_v14  ;;  %v7112_v62 = vld [vmem:[#allocation41_spill] sm:$0xff]  ;;  %v7114_v40 = vld [vmem:[#allocation39_spill] sm:$0xff] }
 0x8f7   :  { %3514 = vmatpush1.msra.mxu0 %v3407_v29  ;;  %v7115_v14 = vld [vmem:[#allocation37_spill] sm:$0xff] }
 0x8f8   :  { %3515 = vmatprep.subr.mxu0 %v3406_v17 }
 0x8f9   :  { %3516 = vmatpush1.msra.mxu0 %v3405_v61 }
 0x8fa   :  { %3517 = vmatprep.subr.mxu0 %v3404_v18 }
 0x8fb   :  { %3518 = vmatpush1.msra.mxu0 %v3403_v30 }
 0x8fc   :  { %3519 = vmatprep.subr.mxu0 %v3402_v0 }
 0x8fd   :  { %v6469_v43 = vpop.permute.xlu1 %3002  ;;  %3520 = vmatpush1.msra.mxu0 %v3401_v37 }
 0x8fe   :  { %3521 = vmatprep.subr.mxu0 %v3400_v21 }
 0x8ff   :  { %3522 = vmatpush1.msra.mxu0 %v3399_v55 }
 0x900   :  { %3523 = vmatprep.subr.mxu0 %v3398_v47  ;;  %v7116_v47 = vld [vmem:[#allocation36_spill] sm:$0xff] }
 0x901   :  { %v6471_v34 = vpop.permute.xlu1 %3007  ;;  %3524 = vmatpush1.msra.mxu0 %v3397_v4 }
 0x905   :  { %v3013_v1 = vpop.permute.xlu1 %3012 }
 0x906   :  { %v6473_v7 = vpop.permute.xlu0 %3231  ;;  %v3096_v4 = vmul.f32 %v3013_v1, %v7116_v47  ;;  %v7127_v47 = vld [vmem:[#allocation25_spill] sm:$0xff] }
 0x909   :  { %v3018_v42 = vpop.permute.xlu1 %3017 }
 0x90a   :  { %v6475_v13 = vpop.permute.xlu0 %3236  ;;  %v3098_v17 = vmul.f32 %v3018_v42, %v7113_v60  ;;  %v3097_v37 = vmul.f32 %v3018_v42, %v7115_v14 }
 0x90b   :  { %v3320_v42 = vadd.f32 %v6475_v13, %v3096_v4 }
 0x90d   :  { %v3023_v45 = vpop.permute.xlu1 %3022 }
 0x90e   :  { %v3242_v19 = vpop.permute.xlu0 %3241  ;;  %v3100_v24 = vmul.f32 %v3023_v45, %v7111_v25  ;;  %v3099_v10 = vmul.f32 %v3023_v45, %v7114_v40  ;;  %v7122_v25 = vld [vmem:[#allocation30_spill] sm:$0xff] }
 0x911   :  { %v3028_v59 = vpop.permute.xlu1 %3027 }
 0x912   :  { %v3247_v12 = vpop.permute.xlu0 %3246  ;;  %v3102_v51 = vmul.f32 %v3028_v59, %v7110_v9  ;;  %v3101_v56 = vmul.f32 %v3028_v59, %v7112_v62  ;;  %v3322_v59 = vadd.f32 %v3242_v19, %v3098_v17 }
 0x913   :  { %v3324_v48 = vadd.f32 %v3247_v12, %v3100_v24  ;;  %v3323_v21 = vadd.f32 %v3247_v12, %v3099_v10 }
 0x915   :  { %v3033_v6 = vpop.permute.xlu1 %3032  ;;  %v3388_v12 = vmul.f32 0.2, %v3324_v48 }
 0x916   :  { %v3252_v2 = vpop.permute.xlu0 %3251  ;;  %v3104_v20 = vmul.f32 %v3033_v6, %v7106_v23  ;;  %v3103_v54 = vmul.f32 %v3033_v6, %v7109_v16  ;;  %v3386_v16 = vmul.f32 0.2, %v3322_v59 }
 0x917   :  { %v3326_v41 = vadd.f32 %v3252_v2, %v3102_v51  ;;  %v3325_v61 = vadd.f32 %v3252_v2, %v3101_v56  ;;  %v3321_v2 = vadd.f32 %v3242_v19, %v3097_v37  ;;  %v7120_v19 = vld [vmem:[#allocation32_spill] sm:$0xff] }
 0x919   :  { %v3038_v57 = vpop.permute.xlu1 %3037  ;;  %v3390_v6 = vmul.f32 0.2, %v3326_v41 }
 0x91a   :  { %v3257_v31 = vpop.permute.xlu0 %3256  ;;  %v3106_v8 = vmul.f32 %v3038_v57, %v7104_v35  ;;  %v3105_v32 = vmul.f32 %v3038_v57, %v7105_v52  ;;  %v7118_v52 = vld [vmem:[#allocation34_spill] sm:$0xff] }
 0x91b   :  { %v3328_v22 = vadd.f32 %v3257_v31, %v3104_v20  ;;  %v3327_v33 = vadd.f32 %v3257_v31, %v3103_v54  ;;  %v7119_v20 = vld [vmem:[#allocation33_spill] sm:$0xff]  ;;  %v3454_v54 = vmax.f32 %v3326_v41, %v3390_v6 }
 0x91c   :  { %v7123_v41 = vld [vmem:[#allocation29_spill] sm:$0xff] }
 0x91d   :  { %v3043_v46 = vpop.permute.xlu1 %3042  ;;  %v3392_v30 = vmul.f32 0.2, %v3328_v22  ;;  %v3391_v55 = vmul.f32 0.2, %v3327_v33 }
 0x91e   :  { %v3262_v50 = vpop.permute.xlu0 %3261  ;;  %v3107_v63 = vmul.f32 %v3043_v46, %v7107_v3  ;;  %v3108_v58 = vmul.f32 %v3043_v46, %v7108_v36  ;;  %v7117_v46 = vld [vmem:[#allocation35_spill] sm:$0xff]  ;;  %v3093_v3 = vmul.f32 %v6471_v34, %v7119_v20  ;;  %v3387_v36 = vmul.f32 0.2, %v3323_v21 }
 0x91f   :  { %v3330_v5 = vadd.f32 %v3262_v50, %v3106_v8  ;;  %v3329_v28 = vadd.f32 %v3262_v50, %v3105_v32  ;;  %v3095_v45 = vmul.f32 %v3013_v1, %v7117_v46  ;;  %v3389_v50 = vmul.f32 0.2, %v3325_v61  ;;  %v7128_v46 = vld [vmem:[#allocation24_spill] sm:$0xff] }
 0x920   :  { %v3094_v32 = vmul.f32 %v6471_v34, %v7118_v52  ;;  %v3456_v23 = vmax.f32 %v3328_v22, %v3392_v30  ;;  %v3455_v1 = vmax.f32 %v3327_v33, %v3391_v55  ;;  %v3317_v51 = vadd.f32 %v6473_v7, %v3093_v3 }
 0x921   :  { %v6482_v15 = vpop.permute.xlu1 %2997  ;;  %v3394_v44 = vmul.f32 0.2, %v3330_v5  ;;  %v3393_v39 = vmul.f32 0.2, %v3329_v28  ;;  %v3385_v34 = vmul.f32 0.2, %v3321_v2  ;;  %v3453_v22 = vmax.f32 %v3325_v61, %v3389_v50 }
 0x922   :  { %v3267_v53 = vpop.permute.xlu0 %3266  ;;  %v3090_v24 = vmul.f32 %v6482_v15, %v7122_v25  ;;  %v3451_v33 = vmax.f32 %v3323_v21, %v3387_v36  ;;  %v3381_v10 = vmul.f32 0.2, %v3317_v51  ;;  %v7132_v25 = vld [vmem:[#allocation17_spill] sm:$0xff] }
 0x923   :  { %v3331_v11 = vadd.f32 %v3267_v53, %v3107_v63  ;;  %v3332_v26 = vadd.f32 %v3267_v53, %v3108_v58  ;;  %v3458_v57 = vmax.f32 %v3330_v5, %v3394_v44  ;;  %v3457_v35 = vmax.f32 %v3329_v28, %v3393_v39  ;;  %v7121_v53 = vld [vmem:[#allocation31_spill] sm:$0xff] }
 0x924   :  { %v3319_v63 = vadd.f32 %v6475_v13, %v3095_v45  ;;  %v3092_v58 = vmul.f32 %v6469_v43, %v7120_v19  ;;  %v3318_v5 = vadd.f32 %v6473_v7, %v3094_v32  ;;  %v3091_v9 = vmul.f32 %v6469_v43, %v7121_v53  ;;  %v7125_v39 = vld [vmem:[#allocation27_spill] sm:$0xff] }
 0x925   :  { %v3395_v29 = vmul.f32 0.2, %v3331_v11  ;;  %v3396_v38 = vmul.f32 0.2, %v3332_v26  ;;  %v6488_v49 = vpop.permute.xlu1 %2992  ;;  %v3089_v44 = vmul.f32 %v6482_v15, %v7123_v41  ;;  %v3450_v7 = vmax.f32 %v3322_v59, %v3386_v16  ;;  %v7134_v41 = vld [vmem:[#allocation19_spill] sm:$0xff] }
 0x926   :  { %v3227_v18 = vpop.permute.xlu0 %3226  ;;  %v3383_v56 = vmul.f32 0.2, %v3319_v63  ;;  %v3382_v43 = vmul.f32 0.2, %v3318_v5  ;;  %v3449_v61 = vmax.f32 %v3321_v2, %v3385_v34  ;;  %v3445_v50 = vmax.f32 %v3317_v51, %v3381_v10 }
 0x927   :  { %v3459_v27 = vmax.f32 %v3331_v11, %v3395_v29  ;;  %v3460_v0 = vmax.f32 %v3332_v26, %v3396_v38  ;;  %v3384_v11 = vmul.f32 0.2, %v3320_v42  ;;  %v3452_v26 = vmax.f32 %v3324_v48, %v3388_v12  ;;  %v7124_v38 = vld [vmem:[#allocation28_spill] sm:$0xff] }
 0x928   :  { %v3316_v62 = vadd.f32 %v3227_v18, %v3092_v58  ;;  %v3315_v29 = vadd.f32 %v3227_v18, %v3091_v9  ;;  %v3088_v60 = vmul.f32 %v6488_v49, %v7124_v38  ;;  %v3087_v48 = vmul.f32 %v6488_v49, %v7125_v39  ;;  %v7126_v18 = vld [vmem:[#allocation26_spill] sm:$0xff] }
 0x929   :  { %3525 = vmatprep.subr.mxu0 %v3460_v0  ;;  %v2988_v31 = vpop.permute.xlu1 %2987  ;;  %v3448_v0 = vmax.f32 %v3320_v42, %v3384_v11  ;;  %v3447_v21 = vmax.f32 %v3319_v63, %v3383_v56  ;;  %v3446_v6 = vmax.f32 %v3318_v5, %v3382_v43  ;;  %v7131_v58 = vld [vmem:[#allocation22_spill] sm:$0xff] }
 0x92a   :  { %3526 = vmatpush2.msra.mxu0 %v3459_v27  ;;  %v3222_v8 = vpop.permute.xlu0 %3221  ;;  %v3380_v15 = vmul.f32 0.2, %v3316_v62  ;;  %v3086_v14 = vmul.f32 %v2988_v31, %v7126_v18  ;;  %v3379_v55 = vmul.f32 0.2, %v3315_v29  ;;  %v3085_v4 = vmul.f32 %v2988_v31, %v7127_v47 }
 0x92b   :  { %3527 = vmatprep.subr.mxu0 %v3458_v57  ;;  %v3314_v17 = vadd.f32 %v3222_v8, %v3090_v24  ;;  %v3313_v30 = vadd.f32 %v3222_v8, %v3089_v44  ;;  %v7129_v8 = vld [vmem:[#allocation23_spill] sm:$0xff] }
 0x92c   :  { %3528 = vmatpush2.msra.mxu0 %v3457_v35  ;;  %v3444_v12 = vmax.f32 %v3316_v62, %v3380_v15  ;;  %v3443_v31 = vmax.f32 %v3315_v29, %v3379_v55  ;;  %v7133_v62 = vld [vmem:[#allocation18_spill] sm:$0xff]  ;;  %v7135_v29 = vld [vmem:[#allocation20_spill] sm:$0xff] }
 0x92d   :  { %3529 = vmatprep.subr.mxu0 %v3456_v23  ;;  %v2983_v28 = vpop.permute.xlu1 %2982  ;;  %v3378_v57 = vmul.f32 0.2, %v3314_v17  ;;  %v3377_v35 = vmul.f32 0.2, %v3313_v30 }
 0x92e   :  { %3530 = vmatpush2.msra.mxu0 %v3455_v1  ;;  %v3217_v13 = vpop.permute.xlu0 %3216  ;;  %v3084_v45 = vmul.f32 %v2983_v28, %v7128_v46  ;;  %v3083_v52 = vmul.f32 %v2983_v28, %v7129_v8  ;;  %v7130_v1 = vld [vmem:[#allocation21_spill] sm:$0xff]  ;;  %v3463_v46 = vld [vmem:[%s6994_s10 + $0x10] sm:$0xff] }
 0x92f   :  { %3531 = vmatprep.subr.mxu0 %v3454_v54  ;;  %v3312_v37 = vadd.f32 %v3217_v13, %v3088_v60  ;;  %v3311_v59 = vadd.f32 %v3217_v13, %v3087_v48  ;;  %v3442_v36 = vmax.f32 %v3314_v17, %v3378_v57  ;;  %v3441_v28 = vmax.f32 %v3313_v30, %v3377_v35  ;;  %v3464_v57 = vld [vmem:[%s6994_s10 + $0x18] sm:$0xff]  ;;  %v3470_v35 = vld [vmem:[%s6994_s10 + $0x48] sm:$0xff]  ;;  %v3469_v8 = vld [vmem:[%s6994_s10 + $0x40] sm:$0xff] }
 0x930   :  { %3532 = vmatpush2.msra.mxu0 %v3453_v22 }
 0x931   :  { %3533 = vmatprep.subr.mxu0 %v3452_v26  ;;  %v2978_v40 = vpop.permute.xlu1 %2977  ;;  %v3376_v23 = vmul.f32 0.2, %v3312_v37  ;;  %v3375_v3 = vmul.f32 0.2, %v3311_v59 }
 0x932   :  { %3534 = vmatpush2.msra.mxu0 %v3451_v33  ;;  %v3212_v27 = vpop.permute.xlu0 %3211  ;;  %v3081_v19 = vmul.f32 %v2978_v40, %v7130_v1  ;;  %v3082_v5 = vmul.f32 %v2978_v40, %v7131_v58  ;;  %v3482_v1 = vld [vmem:[%s6994_s10 + $0xa8] sm:$0xff]  ;;  %v3484_v58 = vld [vmem:[%s6994_s10 + $0xb8] sm:$0xff] }
 0x933   :  { %3535 = vmatprep.subr.mxu0 %v3450_v7  ;;  %v3310_v49 = vadd.f32 %v3212_v27, %v3086_v14  ;;  %v3309_v32 = vadd.f32 %v3212_v27, %v3085_v4  ;;  %v3440_v51 = vmax.f32 %v3312_v37, %v3376_v23  ;;  %v3439_v11 = vmax.f32 %v3311_v59, %v3375_v3  ;;  %v3476_v23 = vld [vmem:[%s6994_s10 + $0x78] sm:$0xff]  ;;  %v3477_v3 = vld [vmem:[%s6994_s10 + $0x80] sm:$0xff] }
 0x934   :  { %3536 = vmatpush2.msra.mxu0 %v3449_v61 }
 0x935   :  { %3537 = vmatprep.subr.mxu0 %v3448_v0  ;;  %v2973_v2 = vpop.permute.xlu1 %2972  ;;  %v3374_v16 = vmul.f32 0.2, %v3310_v49  ;;  %v3373_v53 = vmul.f32 0.2, %v3309_v32 }
 0x936   :  { %3538 = vmatpush2.msra.mxu0 %v3447_v21  ;;  %v3207_v42 = vpop.permute.xlu0 %3206  ;;  %v3079_v44 = vmul.f32 %v2973_v2, %v7134_v41  ;;  %v3080_v43 = vmul.f32 %v2973_v2, %v7135_v29  ;;  %v3468_v2 = vld [vmem:[%s6994_s10 + $0x38] sm:$0xff] }
 0x937   :  { %v3308_v20 = vadd.f32 %v3207_v42, %v3084_v45  ;;  %3539 = vmatprep.subr.mxu0 %v3446_v6  ;;  %v3307_v63 = vadd.f32 %v3207_v42, %v3083_v52  ;;  %v3438_v33 = vmax.f32 %v3310_v49, %v3374_v16  ;;  %v3437_v60 = vmax.f32 %v3309_v32, %v3373_v53  ;;  %v3461_v6 = vld [vmem:[%s6994_s10] sm:$0xff]  ;;  %v3466_v45 = vld [vmem:[%s6994_s10 + $0x28] sm:$0xff]  ;;  %v3472_v52 = vld [vmem:[%s6994_s10 + $0x58] sm:$0xff] }
 0x938   :  { %3540 = vmatpush2.msra.mxu0 %v3445_v50  ;;  %v3465_v49 = vld [vmem:[%s6994_s10 + $0x20] sm:$0xff]  ;;  %v3467_v50 = vld [vmem:[%s6994_s10 + $0x30] sm:$0xff]  ;;  %v3474_v42 = vld [vmem:[%s6994_s10 + $0x68] sm:$0xff] }
 0x939   :  { %3541 = vmatprep.subr.mxu0 %v3444_v12  ;;  %v2968_v54 = vpop.permute.xlu1 %2967  ;;  %v3372_v34 = vmul.f32 0.2, %v3308_v20  ;;  %v3371_v26 = vmul.f32 0.2, %v3307_v63  ;;  %v3471_v32 = vld [vmem:[%s6994_s10 + $0x50] sm:$0xff]  ;;  %v3473_v12 = vld [vmem:[%s6994_s10 + $0x60] sm:$0xff] }
 0x93a   :  { %3542 = vmatpush2.msra.mxu0 %v3443_v31  ;;  %v3202_v9 = vpop.permute.xlu0 %3201  ;;  %v3077_v24 = vmul.f32 %v2968_v54, %v7132_v25  ;;  %v3078_v56 = vmul.f32 %v2968_v54, %v7133_v62  ;;  %v3478_v31 = vld [vmem:[%s6994_s10 + $0x88] sm:$0xff]  ;;  %v3485_v54 = vld [vmem:[%s6994_s10 + $0xc0] sm:$0xff]  ;;  %v3487_v53 = vld [vmem:[%s6994_s10 + $0xd0] sm:$0xff] }
 0x93b   :  { %v3305_v22 = vadd.f32 %v3202_v9, %v3081_v19  ;;  %v3306_v13 = vadd.f32 %v3202_v9, %v3082_v5  ;;  %3543 = vmatprep.subr.mxu0 %v3442_v36  ;;  %v3436_v39 = vmax.f32 %v3308_v20, %v3372_v34  ;;  %v3435_v27 = vmax.f32 %v3307_v63, %v3371_v26  ;;  %v3475_v20 = vld [vmem:[%s6994_s10 + $0x70] sm:$0xff]  ;;  %v3480_v63 = vld [vmem:[%s6994_s10 + $0x98] sm:$0xff]  ;;  %v3481_v19 = vld [vmem:[%s6994_s10 + $0xa0] sm:$0xff] }
 0x93c   :  { %3544 = vmatpush2.msra.mxu0 %v3441_v28  ;;  %v3479_v36 = vld [vmem:[%s6994_s10 + $0x90] sm:$0xff]  ;;  %v3486_v16 = vld [vmem:[%s6994_s10 + $0xc8] sm:$0xff]  ;;  %v3488_v28 = vld [vmem:[%s6994_s10 + $0xd8] sm:$0xff] }
 0x93d   :  { %v3370_v7 = vmul.f32 0.2, %v3306_v13  ;;  %3545 = vmatprep.subr.mxu0 %v3440_v51  ;;  %v3192_v38 = vpop.permute.xlu1 %3191  ;;  %v3369_v17 = vmul.f32 0.2, %v3305_v22  ;;  %v3483_v5 = vld [vmem:[%s6994_s10 + $0xb0] sm:$0xff]  ;;  %v3490_v9 = vld [vmem:[%s6994_s10 + $0xe8] sm:$0xff] }
 0x93e   :  { %v3301_v40 = vadd.f32 %v3192_v38, %v3077_v24  ;;  %v3302_v10 = vadd.f32 %v3192_v38, %v3078_v56  ;;  %3546 = vmatpush2.msra.mxu0 %v3439_v11  ;;  %v3197_v61 = vpop.permute.xlu0 %3196  ;;  %v3489_v51 = vld [vmem:[%s6994_s10 + $0xe0] sm:$0xff]  ;;  %v3492_v34 = vld [vmem:[%s6994_s10 + $0xf8] sm:$0xff] }
 0x93f   :  { %v3303_v48 = vadd.f32 %v3197_v61, %v3079_v44  ;;  %v3304_v30 = vadd.f32 %v3197_v61, %v3080_v43  ;;  %3547 = vmatprep.subr.mxu0 %v3438_v33  ;;  %v3434_v0 = vmax.f32 %v3306_v13, %v3370_v7  ;;  %v3433_v37 = vmax.f32 %v3305_v22, %v3369_v17  ;;  %v3491_v22 = vld [vmem:[%s6994_s10 + $0xf0] sm:$0xff] }
 0x940   :  { %3548 = vmatpush2.msra.mxu0 %v3437_v60  ;;  %v3366_v15 = vmul.f32 0.2, %v3302_v10  ;;  %v3365_v21 = vmul.f32 0.2, %v3301_v40 }
 0x941   :  { %v3367_v18 = vmul.f32 0.2, %v3303_v48  ;;  %v3368_v14 = vmul.f32 0.2, %v3304_v30  ;;  %3549 = vmatprep.subr.mxu0 %v3436_v39 }
 0x942   :  { %3550 = vmatpush2.msra.mxu0 %v3435_v27  ;;  %v3430_v4 = vmax.f32 %v3302_v10, %v3366_v15  ;;  %v3429_v59 = vmax.f32 %v3301_v40, %v3365_v21 }
 0x943   :  { %v3431_v55 = vmax.f32 %v3303_v48, %v3367_v18  ;;  %v3432_v47 = vmax.f32 %v3304_v30, %v3368_v14  ;;  %3551 = vmatprep.subr.mxu0 %v3434_v0 }
 0x944   :  { %3552 = vmatpush2.msra.mxu0 %v3433_v37 }
 0x945   :  { %3553 = vmatprep.subr.mxu0 %v3432_v47 }
 0x946   :  { %3554 = vmatpush2.msra.mxu0 %v3431_v55 }
 0x947   :  { %3555 = vmatprep.subr.mxu0 %v3430_v4 }
 0x948   :  { %3556 = vmatpush2.msra.mxu0 %v3429_v59 }
 0x949   :  { %3558 = vmatmul.mubr.f32.vlgmr.msra.gmra.mxu0 %v3461_v6 }
 0x94a   :  { %3563 = vmatprep.mubr.f32.mxu0 %v3464_v57 }
 0x94d   :  { %3564 = vmatmul.mubr.f32.gmra.mxu0 %v3463_v46 }
 0x94e   :  { %3569 = vmatprep.mubr.f32.mxu0 %v3466_v45 }
 0x951   :  { %3570 = vmatmul.mubr.f32.gmra.mxu0 %v3465_v49 }
 0x952   :  { %3575 = vmatprep.mubr.f32.mxu0 %v3468_v2 }
 0x955   :  { %3576 = vmatmul.mubr.f32.gmra.mxu0 %v3467_v50 }
 0x956   :  { %3581 = vmatprep.mubr.f32.mxu0 %v3470_v35 }
 0x959   :  { %3582 = vmatmul.mubr.f32.gmra.mxu0 %v3469_v8 }
 0x95a   :  { %3587 = vmatprep.mubr.f32.mxu0 %v3472_v52 }
 0x95d   :  { %3588 = vmatmul.mubr.f32.gmra.mxu0 %v3471_v32 }
 0x95e   :  { %3593 = vmatprep.mubr.f32.mxu0 %v3474_v42 }
 0x961   :  { %3594 = vmatmul.mubr.f32.gmra.mxu0 %v3473_v12 }
 0x962   :  { %3599 = vmatprep.mubr.f32.mxu0 %v3476_v23 }
 0x965   :  { %3600 = vmatmul.mubr.f32.gmra.mxu0 %v3475_v20 }
 0x966   :  { %3605 = vmatprep.mubr.f32.mxu0 %v3478_v31 }
 0x969   :  { %3606 = vmatmul.mubr.f32.gmra.mxu0 %v3477_v3 }
 0x96a   :  { %3611 = vmatprep.mubr.f32.mxu0 %v3480_v63 }
 0x96d   :  { %3612 = vmatmul.mubr.f32.gmra.mxu0 %v3479_v36 }
 0x96e   :  { %3617 = vmatprep.mubr.f32.mxu0 %v3482_v1 }
 0x971   :  { %3618 = vmatmul.mubr.f32.gmra.mxu0 %v3481_v19 }
 0x972   :  { %3623 = vmatprep.mubr.f32.mxu0 %v3484_v58 }
 0x975   :  { %3624 = vmatmul.mubr.f32.gmra.mxu0 %v3483_v5 }
 0x976   :  { %3629 = vmatprep.mubr.f32.mxu0 %v3486_v16 }
 0x979   :  { %3630 = vmatmul.mubr.f32.gmra.mxu0 %v3485_v54 }
 0x97a   :  { %3635 = vmatprep.mubr.f32.mxu0 %v3488_v28 }
 0x97d   :  { %3636 = vmatmul.mubr.f32.gmra.mxu0 %v3487_v53 }
 0x97e   :  { %3641 = vmatprep.mubr.f32.mxu0 %v3490_v9 }
 0x981   :  { %3642 = vmatmul.mubr.f32.gmra.mxu0 %v3489_v51 }
 0x982   :  { %3647 = vmatprep.mubr.f32.mxu0 %v3492_v34 }
 0x985   :  { %3648 = vmatmul.mubr.f32.gmra.mxu0 %v3491_v22 }
 0xa09   :  { %v6618_v13 = vpop.f32.mrf.mxu0 }
 0xa0a   :  { %v3702_v26 = vmul.f32 %v6618_v13, %v6618_v13 }
 0xa0b   :  { %v6620_v11 = vpop.f32.mrf.mxu0 }
 0xa0c   :  { %v3654_v25 = vadd.f32 %v6620_v11, %v6618_v13  ;;  %v3703_v24 = vmul.f32 %v6620_v11, %v6620_v11 }
 0xa0d   :  { %v6628_v62 = vpop.f32.mrf.mxu0 }
 0xa0e   :  { %3655 = vadd.xlane.f32.xlu0 %v3654_v25  ;;  %v3734_v56 = vadd.f32 %v3703_v24, %v3702_v26  ;;  %v3704_v41 = vmul.f32 %v6628_v62, %v6628_v62 }
 0xa0f   :  { %v6630_v33 = vpop.f32.mrf.mxu0 }
 0xa10   :  { %v3705_v44 = vmul.f32 %v6630_v33, %v6630_v33  ;;  %3735 = vadd.xlane.f32.xlu1 %v3734_v56  ;;  %v3657_v43 = vadd.f32 %v6630_v33, %v6628_v62 }
 0xa11   :  { %v6636_v29 = vpop.f32.mrf.mxu0 }
 0xa12   :  { %v3706_v7 = vmul.f32 %v6636_v29, %v6636_v29  ;;  %v3737_v38 = vadd.f32 %v3705_v44, %v3704_v41 }
 0xa13   :  { %v6642_v60 = vpop.f32.mrf.mxu0 }
 0xa14   :  { %v3707_v17 = vmul.f32 %v6642_v60, %v6642_v60  ;;  %3738 = vadd.xlane.f32.xlu0 %v3737_v38  ;;  %3658 = vadd.xlane.f32.xlu1 %v3657_v43  ;;  %v3660_v10 = vadd.f32 %v6642_v60, %v6636_v29 }
 0xa15   :  { %v6646_v40 = vpop.f32.mrf.mxu0 }
 0xa16   :  { %v3740_v61 = vadd.f32 %v3707_v17, %v3706_v7  ;;  %v3708_v27 = vmul.f32 %v6646_v40, %v6646_v40 }
 0xa17   :  { %v6650_v39 = vpop.f32.mrf.mxu0 }
 0xa18   :  { %v3663_v48 = vadd.f32 %v6650_v39, %v6646_v40  ;;  %3661 = vadd.xlane.f32.xlu0 %v3660_v10  ;;  %3741 = vadd.xlane.f32.xlu1 %v3740_v61  ;;  %v3709_v0 = vmul.f32 %v6650_v39, %v6650_v39 }
 0xa19   :  { %v6654_v30 = vpop.f32.mrf.mxu0 }
 0xa1a   :  { %v3710_v15 = vmul.f32 %v6654_v30, %v6654_v30  ;;  %v3743_v55 = vadd.f32 %v3709_v0, %v3708_v27 }
 0xa1b   :  { %v6662_v18 = vpop.f32.mrf.mxu0 }
 0xa1c   :  { %v3666_v14 = vadd.f32 %v6662_v18, %v6654_v30  ;;  %v3711_v37 = vmul.f32 %v6662_v18, %v6662_v18  ;;  %3664 = vadd.xlane.f32.xlu0 %v3663_v48 }
 0xa1d   :  { %v6668_v21 = vpop.f32.mrf.mxu0 }
 0xa1e   :  { %3667 = vadd.xlane.f32.xlu1 %v3666_v14  ;;  %v3746_v47 = vadd.f32 %v3711_v37, %v3710_v15  ;;  %v3712_v57 = vmul.f32 %v6668_v21, %v6668_v21 }
 0xa1f   :  { %v6670_v4 = vpop.f32.mrf.mxu0 }
 0xa20   :  { %v3669_v59 = vadd.f32 %v6670_v4, %v6668_v21  ;;  %3744 = vadd.xlane.f32.xlu0 %v3743_v55  ;;  %v3713_v46 = vmul.f32 %v6670_v4, %v6670_v4 }
 0xa21   :  { %v6674_v6 = vpop.f32.mrf.mxu0 }
 0xa22   :  { %v3714_v45 = vmul.f32 %v6674_v6, %v6674_v6  ;;  %3747 = vadd.xlane.f32.xlu1 %v3746_v47  ;;  %v3749_v8 = vadd.f32 %v3713_v46, %v3712_v57 }
 0xa23   :  { %v6682_v49 = vpop.f32.mrf.mxu0 }
 0xa24   :  { %v3672_v2 = vadd.f32 %v6682_v49, %v6674_v6  ;;  %v3715_v50 = vmul.f32 %v6682_v49, %v6682_v49  ;;  %3670 = vadd.xlane.f32.xlu0 %v3669_v59 }
 0xa25   :  { %v6688_v35 = vpop.f32.mrf.mxu0 }
 0xa26   :  { %3673 = vadd.xlane.f32.xlu1 %v3672_v2  ;;  %v3752_v52 = vadd.f32 %v3715_v50, %v3714_v45  ;;  %v3716_v23 = vmul.f32 %v6688_v35, %v6688_v35 }
 0xa27   :  { %v6690_v32 = vpop.f32.mrf.mxu0 }
 0xa28   :  { %v3675_v42 = vadd.f32 %v6690_v32, %v6688_v35  ;;  %3750 = vadd.xlane.f32.xlu0 %v3749_v8  ;;  %v3717_v20 = vmul.f32 %v6690_v32, %v6690_v32 }
 0xa29   :  { %v6694_v12 = vpop.f32.mrf.mxu0 }
 0xa2a   :  { %v3718_v31 = vmul.f32 %v6694_v12, %v6694_v12  ;;  %3753 = vadd.xlane.f32.xlu1 %v3752_v52  ;;  %v3755_v19 = vadd.f32 %v3717_v20, %v3716_v23 }
 0xa2b   :  { %v6702_v3 = vpop.f32.mrf.mxu0 }
 0xa2c   :  { %v3678_v63 = vadd.f32 %v6702_v3, %v6694_v12  ;;  %v3719_v36 = vmul.f32 %v6702_v3, %v6702_v3  ;;  %3676 = vadd.xlane.f32.xlu0 %v3675_v42 }
 0xa2d   :  { %v6708_v1 = vpop.f32.mrf.mxu0 }
 0xa2e   :  { %3679 = vadd.xlane.f32.xlu1 %v3678_v63  ;;  %v3758_v58 = vadd.f32 %v3719_v36, %v3718_v31  ;;  %v3720_v28 = vmul.f32 %v6708_v1, %v6708_v1 }
 0xa2f   :  { %v6710_v5 = vpop.f32.mrf.mxu0 }
 0xa30   :  { %v3681_v16 = vadd.f32 %v6710_v5, %v6708_v1  ;;  %3756 = vadd.xlane.f32.xlu0 %v3755_v19  ;;  %v3721_v53 = vmul.f32 %v6710_v5, %v6710_v5 }
 0xa31   :  { %v6714_v54 = vpop.f32.mrf.mxu0 }
 0xa32   :  { %v3722_v9 = vmul.f32 %v6714_v54, %v6714_v54  ;;  %3759 = vadd.xlane.f32.xlu1 %v3758_v58  ;;  %v3761_v25 = vadd.f32 %v3721_v53, %v3720_v28 }
 0xa33   :  { %v6722_v51 = vpop.f32.mrf.mxu0 }
 0xa34   :  { %v3684_v34 = vadd.f32 %v6722_v51, %v6714_v54  ;;  %v3723_v22 = vmul.f32 %v6722_v51, %v6722_v51  ;;  %3682 = vadd.xlane.f32.xlu0 %v3681_v16 }
 0xa35   :  { %v6728_v26 = vpop.f32.mrf.mxu0 }
 0xa36   :  { %3685 = vadd.xlane.f32.xlu1 %v3684_v34  ;;  %v3764_v24 = vadd.f32 %v3723_v22, %v3722_v9  ;;  %v3724_v43 = vmul.f32 %v6728_v26, %v6728_v26 }
 0xa37   :  { %v6730_v56 = vpop.f32.mrf.mxu0 }
 0xa38   :  { %v3687_v41 = vadd.f32 %v6730_v56, %v6728_v26  ;;  %3762 = vadd.xlane.f32.xlu0 %v3761_v25  ;;  %v3725_v7 = vmul.f32 %v6730_v56, %v6730_v56 }
 0xa39   :  { %v6734_v44 = vpop.f32.mrf.mxu0 }
 0xa3a   :  { %v3726_v38 = vmul.f32 %v6734_v44, %v6734_v44  ;;  %3765 = vadd.xlane.f32.xlu1 %v3764_v24  ;;  %v3767_v27 = vadd.f32 %v3725_v7, %v3724_v43 }
 0xa3b   :  { %v6742_v17 = vpop.f32.mrf.mxu0 }
 0xa3c   :  { %v3690_v10 = vadd.f32 %v6742_v17, %v6734_v44  ;;  %v3727_v61 = vmul.f32 %v6742_v17, %v6742_v17  ;;  %3688 = vadd.xlane.f32.xlu0 %v3687_v41 }
 0xa3d   :  { %v6748_v48 = vpop.f32.mrf.mxu0 }
 0xa3e   :  { %3691 = vadd.xlane.f32.xlu1 %v3690_v10  ;;  %v3770_v0 = vadd.f32 %v3727_v61, %v3726_v38  ;;  %v3728_v55 = vmul.f32 %v6748_v48, %v6748_v48 }
 0xa3f   :  { %v6750_v15 = vpop.f32.mrf.mxu0 }
 0xa40   :  { %v3693_v14 = vadd.f32 %v6750_v15, %v6748_v48  ;;  %3768 = vadd.xlane.f32.xlu0 %v3767_v27  ;;  %v3729_v47 = vmul.f32 %v6750_v15, %v6750_v15 }
 0xa41   :  { %v6754_v37 = vpop.f32.mrf.mxu0 }
 0xa42   :  { %v3730_v59 = vmul.f32 %v6754_v37, %v6754_v37  ;;  %3771 = vadd.xlane.f32.xlu1 %v3770_v0  ;;  %v3773_v50 = vadd.f32 %v3729_v47, %v3728_v55 }
 0xa43   :  { %v6762_v57 = vpop.f32.mrf.mxu0 }
 0xa44   :  { %v3696_v46 = vadd.f32 %v6762_v57, %v6754_v37  ;;  %v3731_v45 = vmul.f32 %v6762_v57, %v6762_v57  ;;  %3694 = vadd.xlane.f32.xlu0 %v3693_v14 }
 0xa45   :  { %v6768_v2 = vpop.f32.mrf.mxu0 }
 0xa46   :  { %3697 = vadd.xlane.f32.xlu1 %v3696_v46  ;;  %v3776_v8 = vadd.f32 %v3731_v45, %v3730_v59  ;;  %v3732_v23 = vmul.f32 %v6768_v2, %v6768_v2 }
 0xa47   :  { %v6770_v52 = vpop.f32.mrf.mxu0 }
 0xa48   :  { %3774 = vadd.xlane.f32.xlu0 %v3773_v50  ;;  %v3699_v42 = vadd.f32 %v6770_v52, %v6768_v2  ;;  %v3733_v20 = vmul.f32 %v6770_v52, %v6770_v52 }
 0xa4a   :  { %3777 = vadd.xlane.f32.xlu1 %v3776_v8  ;;  %v3779_v31 = vadd.f32 %v3733_v20, %v3732_v23 }
 0xa4c   :  { %3700 = vadd.xlane.f32.xlu0 %v3699_v42 }
 0xa50   :  { %3780 = vadd.xlane.f32.xlu0 %v3779_v31 }
 0xa97   :  { %v3656_v63 = vpop.xlane.xlu0 %3655 }
 0xa98   :  { %v3782_v36 = vmul.f32 0.00390625, %v3656_v63 }
 0xa99   :  { %v3736_v19 = vpop.xlane.xlu1 %3735 }
 0xa9a   :  { %v3814_v58 = vmul.f32 %v3782_v36, %v3782_v36  ;;  %v3798_v16 = vmul.f32 0.00390625, %v3736_v19 }
 0xa9c   :  { %v3830_v28 = vsub.f32 %v3798_v16, %v3814_v58 }
 0xa9d   :  { %v3739_v53 = vpop.xlane.xlu0 %3738  ;;  %v3659_v9 = vpop.xlane.xlu1 %3658 }
 0xa9e   :  { %v3846_v34 = vmax.f32 %v3830_v28, 0.0  ;;  %v6778_v22 = vmul.f32 0.00390625, %v3659_v9  ;;  %v3799_v24 = vmul.f32 0.00390625, %v3739_v53 }
 0xaa0   :  { %v3878_v25 = vadd.f32 1e-05, %v3846_v34  ;;  %v3815_v41 = vmul.f32 %v6778_v22, %v6778_v22  ;;  %v3862_v34 = vld [vmem:[%s6995_s11] sm:$0xff] }
 0xaa1   :  { %v3662_v43 = vpop.xlane.xlu0 %3661  ;;  %v3742_v7 = vpop.xlane.xlu1 %3741 }
 0xaa2   :  { %4695 = vrsqrt.f32 %v3878_v25  ;;  %v3831_v38 = vsub.f32 %v3799_v24, %v3815_v41  ;;  %v6782_v10 = vmul.f32 0.00390625, %v3662_v43  ;;  %v3800_v0 = vmul.f32 0.00390625, %v3742_v7 }
 0xaa4   :  { %v3847_v61 = vmax.f32 %v3831_v38, 0.0  ;;  %v3816_v27 = vmul.f32 %v6782_v10, %v6782_v10 }
 0xaa5   :  { %v3665_v14 = vpop.xlane.xlu0 %3664 }
 0xaa6   :  { %v3879_v55 = vadd.f32 1e-05, %v3847_v61  ;;  %v3832_v47 = vsub.f32 %v3800_v0, %v3816_v27  ;;  %v6786_v59 = vmul.f32 0.00390625, %v3665_v14 }
 0xaa7   :  { %v3668_v46 = vpop.xlane.xlu1 %3667 }
 0xaa8   :  { %4697 = vrsqrt.f32 %v3879_v55  ;;  %v3848_v45 = vmax.f32 %v3832_v47, 0.0  ;;  %v6788_v50 = vmul.f32 0.00390625, %v3668_v46  ;;  %v3817_v23 = vmul.f32 %v6786_v59, %v6786_v59  ;;  %v3863_v47 = vld [vmem:[%s6995_s11 + $0x8] sm:$0xff] }
 0xaa9   :  { %v3745_v8 = vpop.xlane.xlu0 %3744 }
 0xaaa   :  { %v3880_v42 = vadd.f32 1e-05, %v3848_v45  ;;  %v3818_v20 = vmul.f32 %v6788_v50, %v6788_v50  ;;  %v3801_v31 = vmul.f32 0.00390625, %v3745_v8 }
 0xaab   :  { %v3748_v63 = vpop.xlane.xlu1 %3747 }
 0xaac   :  { %4699 = vrsqrt.f32 %v3880_v42  ;;  %v3833_v19 = vsub.f32 %v3801_v31, %v3817_v23  ;;  %v3802_v58 = vmul.f32 0.00390625, %v3748_v63 }
 0xaad   :  { %v3671_v16 = vpop.xlane.xlu0 %3670 }
 0xaae   :  { %v3849_v28 = vmax.f32 %v3833_v19, 0.0  ;;  %v3834_v53 = vsub.f32 %v3802_v58, %v3818_v20  ;;  %v6794_v9 = vmul.f32 0.00390625, %v3671_v16  ;;  %v3926_v16 = vld [vmem:[%s6996_s12] sm:$0xff] }
 0xaaf   :  { %v4696_v25 = vpop.eup %4695  ;;  %v3674_v24 = vpop.xlane.xlu1 %3673 }
 0xab0   :  { %v3881_v41 = vadd.f32 1e-05, %v3849_v28  ;;  %v3850_v43 = vmax.f32 %v3834_v53, 0.0  ;;  %v6799_v7 = vmul.f32 0.00390625, %v3674_v24  ;;  %v3819_v38 = vmul.f32 %v6794_v9, %v6794_v9 }
 0xab1   :  { %v3751_v61 = vpop.xlane.xlu0 %3750  ;;  %v3910_v27 = vmul.f32 %v4696_v25, %v3862_v34  ;;  %v3864_v25 = vld [vmem:[%s6995_s11 + $0x10] sm:$0xff] }
 0xab2   :  { %4701 = vrsqrt.f32 %v3881_v41  ;;  %v3882_v0 = vadd.f32 1e-05, %v3850_v43  ;;  %v3820_v14 = vmul.f32 %v6799_v7, %v6799_v7  ;;  %v3803_v55 = vmul.f32 0.00390625, %v3751_v61 }
 0xab3   :  { %3976 = vperm.xlu1 %4605, %v3910_v27   ;;  %v3754_v46 = vpop.xlane.xlu1 %3753  ;;  %v3942_v20 = vmul.f32 %v3910_v27, %v3782_v36 }
 0xab4   :  { %4703 = vrsqrt.f32 %v3882_v0  ;;  %v3835_v45 = vsub.f32 %v3803_v55, %v3819_v38  ;;  %v3804_v8 = vmul.f32 0.00390625, %v3754_v46  ;;  %v3927_v46 = vld [vmem:[%s6996_s12 + $0x8] sm:$0xff] }
 0xab5   :  { %v4698_v42 = vpop.eup %4697  ;;  %v3677_v23 = vpop.xlane.xlu0 %3676  ;;  %v3958_v43 = vsub.f32 %v3926_v16, %v3942_v20 }
 0xab6   :  { %v3911_v31 = vmul.f32 %v4698_v42, %v3863_v47  ;;  %v3851_v63 = vmax.f32 %v3835_v45, 0.0  ;;  %v3836_v19 = vsub.f32 %v3804_v8, %v3820_v14  ;;  %v6808_v58 = vmul.f32 0.00390625, %v3677_v23  ;;  %v3928_v42 = vld [vmem:[%s6996_s12 + $0x10] sm:$0xff] }
 0xab7   :  { %v3680_v28 = vpop.xlane.xlu1 %3679 }
 0xab8   :  { %v3883_v53 = vadd.f32 1e-05, %v3851_v63  ;;  %v3852_v34 = vmax.f32 %v3836_v19, 0.0  ;;  %3981 = vperm.xlu0 %4606, %v3911_v31   ;;  %v6816_v41 = vmul.f32 0.00390625, %v3680_v28  ;;  %v3821_v61 = vmul.f32 %v6808_v58, %v6808_v58  ;;  %v3865_v19 = vld [vmem:[%s6995_s11 + $0x18] sm:$0xff] }
 0xab9   :  { %v4700_v24 = vpop.eup %4699  ;;  %v3757_v36 = vpop.xlane.xlu0 %3756  ;;  %v3943_v0 = vmul.f32 %v3911_v31, %v6778_v22 }
 0xaba   :  { %4705 = vrsqrt.f32 %v3883_v53  ;;  %v3884_v38 = vadd.f32 1e-05, %v3852_v34  ;;  %v3805_v27 = vmul.f32 0.00390625, %v3757_v36  ;;  %v3822_v14 = vmul.f32 %v6816_v41, %v6816_v41 }
 0xabb   :  { %v3760_v55 = vpop.xlane.xlu1 %3759  ;;  %v3912_v47 = vmul.f32 %v4700_v24, %v3864_v25  ;;  %v3959_v28 = vsub.f32 %v3927_v46, %v3943_v0 }
 0xabc   :  { %4707 = vrsqrt.f32 %v3884_v38  ;;  %v3837_v45 = vsub.f32 %v3805_v27, %v3821_v61  ;;  %v3806_v8 = vmul.f32 0.00390625, %v3760_v55  ;;  %4088 = vperm.xlu0 %4606, %v3958_v43  }
 0xabd   :  { %3986 = vperm.xlu1 %4605, %v3912_v47   ;;  %v3683_v23 = vpop.xlane.xlu0 %3682  ;;  %v3944_v22 = vmul.f32 %v3912_v47, %v6782_v10  ;;  %v3866_v10 = vld [vmem:[%s6995_s11 + $0x20] sm:$0xff] }
 0xabe   :  { %v3853_v20 = vmax.f32 %v3837_v45, 0.0  ;;  %v3838_v31 = vsub.f32 %v3806_v8, %v3822_v14  ;;  %v6830_v63 = vmul.f32 0.00390625, %v3683_v23  ;;  %v3929_v23 = vld [vmem:[%s6996_s12 + $0x18] sm:$0xff] }
 0xabf   :  { %v4702_v16 = vpop.eup %4701  ;;  %v3686_v53 = vpop.xlane.xlu1 %3685  ;;  %v3960_v34 = vsub.f32 %v3928_v42, %v3944_v22  ;;  %v3930_v22 = vld [vmem:[%s6996_s12 + $0x20] sm:$0xff] }
 0xac0   :  { %v3885_v25 = vadd.f32 1e-05, %v3853_v20  ;;  %v3854_v24 = vmax.f32 %v3838_v31, 0.0  ;;  %v6835_v36 = vmul.f32 0.00390625, %v3686_v53  ;;  %v3823_v38 = vmul.f32 %v6830_v63, %v6830_v63 }
 0xac1   :  { %v4704_v43 = vpop.eup %4703  ;;  %4093 = vperm.xlu1 %4605, %v3959_v28   ;;  %4098 = vperm.xlu0 %4606, %v3960_v34   ;;  %v3763_v61 = vpop.xlane.xlu0 %3762  ;;  %v3913_v27 = vmul.f32 %v4702_v16, %v3865_v19 }
 0xac2   :  { %4709 = vrsqrt.f32 %v3885_v25  ;;  %v3886_v0 = vadd.f32 1e-05, %v3854_v24  ;;  %v3824_v14 = vmul.f32 %v6835_v36, %v6835_v36  ;;  %v3807_v55 = vmul.f32 0.00390625, %v3763_v61 }
 0xac3   :  { %v3766_v47 = vpop.xlane.xlu1 %3765  ;;  %v3914_v46 = vmul.f32 %v4704_v43, %v3866_v10  ;;  %v3945_v45 = vmul.f32 %v3913_v27, %v6786_v59  ;;  %v3867_v59 = vld [vmem:[%s6995_s11 + $0x28] sm:$0xff] }
 0xac4   :  { %4711 = vrsqrt.f32 %v3886_v0  ;;  %v3839_v8 = vsub.f32 %v3807_v55, %v3823_v38  ;;  %v3808_v42 = vmul.f32 0.00390625, %v3766_v47 }
 0xac5   :  { %3991 = vperm.xlu1 %4605, %v3913_v27   ;;  %3996 = vperm.xlu0 %4606, %v3914_v46   ;;  %v3689_v20 = vpop.xlane.xlu0 %3688  ;;  %v3946_v31 = vmul.f32 %v3914_v46, %v6788_v50  ;;  %v3961_v25 = vsub.f32 %v3929_v23, %v3945_v45  ;;  %v3868_v50 = vld [vmem:[%s6995_s11 + $0x30] sm:$0xff] }
 0xac6   :  { %v3855_v19 = vmax.f32 %v3839_v8, 0.0  ;;  %v3840_v16 = vsub.f32 %v3808_v42, %v3824_v14  ;;  %v6852_v28 = vmul.f32 0.00390625, %v3689_v20  ;;  %v3931_v20 = vld [vmem:[%s6996_s12 + $0x28] sm:$0xff] }
 0xac7   :  { %v4706_v53 = vpop.eup %4705  ;;  %v3692_v34 = vpop.xlane.xlu1 %3691  ;;  %v3962_v24 = vsub.f32 %v3930_v22, %v3946_v31  ;;  %v3932_v31 = vld [vmem:[%s6996_s12 + $0x30] sm:$0xff] }
 0xac8   :  { %v3887_v10 = vadd.f32 1e-05, %v3855_v19  ;;  %v3856_v43 = vmax.f32 %v3840_v16, 0.0  ;;  %v6857_v38 = vmul.f32 0.00390625, %v3692_v34  ;;  %v3825_v27 = vmul.f32 %v6852_v28, %v6852_v28 }
 0xac9   :  { %v4708_v61 = vpop.eup %4707  ;;  %4103 = vperm.xlu1 %4605, %v3961_v25   ;;  %4108 = vperm.xlu0 %4606, %v3962_v24   ;;  %v3769_v0 = vpop.xlane.xlu0 %3768  ;;  %v3915_v14 = vmul.f32 %v4706_v53, %v3867_v59 }
 0xaca   :  { %4713 = vrsqrt.f32 %v3887_v10  ;;  %v3888_v55 = vadd.f32 1e-05, %v3856_v43  ;;  %v3826_v47 = vmul.f32 %v6857_v38, %v6857_v38  ;;  %v3809_v46 = vmul.f32 0.00390625, %v3769_v0 }
 0xacb   :  { %v3772_v45 = vpop.xlane.xlu1 %3771  ;;  %v3916_v8 = vmul.f32 %v4708_v61, %v3868_v50  ;;  %v3947_v42 = vmul.f32 %v3915_v14, %v6794_v9  ;;  %v3869_v9 = vld [vmem:[%s6995_s11 + $0x38] sm:$0xff] }
 0xacc   :  { %4715 = vrsqrt.f32 %v3888_v55  ;;  %v3841_v23 = vsub.f32 %v3809_v46, %v3825_v27  ;;  %v3810_v22 = vmul.f32 0.00390625, %v3772_v45 }
 0xacd   :  { %4001 = vperm.xlu1 %4605, %v3915_v14   ;;  %4006 = vperm.xlu0 %4606, %v3916_v8   ;;  %v3695_v19 = vpop.xlane.xlu0 %3694  ;;  %v3948_v16 = vmul.f32 %v3916_v8, %v6799_v7  ;;  %v3963_v10 = vsub.f32 %v3931_v20, %v3947_v42  ;;  %v3870_v7 = vld [vmem:[%s6995_s11 + $0x40] sm:$0xff] }
 0xace   :  { %v3857_v59 = vmax.f32 %v3841_v23, 0.0  ;;  %v3842_v53 = vsub.f32 %v3810_v22, %v3826_v47  ;;  %v6874_v34 = vmul.f32 0.00390625, %v3695_v19  ;;  %v3933_v19 = vld [vmem:[%s6996_s12 + $0x38] sm:$0xff] }
 0xacf   :  { %v4710_v25 = vpop.eup %4709  ;;  %v3698_v24 = vpop.xlane.xlu1 %3697  ;;  %v3964_v43 = vsub.f32 %v3932_v31, %v3948_v16  ;;  %v3934_v16 = vld [vmem:[%s6996_s12 + $0x40] sm:$0xff] }
 0xad0   :  { %v3889_v50 = vadd.f32 1e-05, %v3857_v59  ;;  %v3858_v61 = vmax.f32 %v3842_v53, 0.0  ;;  %v6879_v27 = vmul.f32 0.00390625, %v3698_v24  ;;  %v3827_v14 = vmul.f32 %v6874_v34, %v6874_v34 }
 0xad1   :  { %v4712_v0 = vpop.eup %4711  ;;  %4113 = vperm.xlu1 %4605, %v3963_v10   ;;  %4118 = vperm.xlu0 %4606, %v3964_v43   ;;  %v3775_v55 = vpop.xlane.xlu0 %3774  ;;  %v3917_v47 = vmul.f32 %v4710_v25, %v3869_v9 }
 0xad2   :  { %4717 = vrsqrt.f32 %v3889_v50  ;;  %v3890_v46 = vadd.f32 1e-05, %v3858_v61  ;;  %v3828_v45 = vmul.f32 %v6879_v27, %v6879_v27  ;;  %v3811_v8 = vmul.f32 0.00390625, %v3775_v55  ;;  %v3872_v61 = vld [vmem:[%s6995_s11 + $0x50] sm:$0xff] }
 0xad3   :  { %v3778_v42 = vpop.xlane.xlu1 %3777  ;;  %v3918_v23 = vmul.f32 %v4712_v0, %v3870_v7  ;;  %v3949_v22 = vmul.f32 %v3917_v47, %v6808_v58  ;;  %v3871_v58 = vld [vmem:[%s6995_s11 + $0x48] sm:$0xff] }
 0xad4   :  { %4719 = vrsqrt.f32 %v3890_v46  ;;  %v3843_v20 = vsub.f32 %v3811_v8, %v3827_v14  ;;  %v3812_v31 = vmul.f32 0.00390625, %v3778_v42 }
 0xad5   :  { %4011 = vperm.xlu1 %4605, %v3917_v47   ;;  %4016 = vperm.xlu0 %4606, %v3918_v23   ;;  %v3701_v59 = vpop.xlane.xlu0 %3700  ;;  %v3950_v53 = vmul.f32 %v3918_v23, %v6816_v41  ;;  %v3965_v43 = vsub.f32 %v3933_v19, %v3949_v22  ;;  %v3936_v23 = vld [vmem:[%s6996_s12 + $0x50] sm:$0xff]  ;;  %v3873_v19 = vld [vmem:[%s6995_s11 + $0x58] sm:$0xff] }
 0xad6   :  { %v3859_v9 = vmax.f32 %v3843_v20, 0.0  ;;  %v3844_v25 = vsub.f32 %v3812_v31, %v3828_v45  ;;  %v6899_v24 = vmul.f32 0.00390625, %v3701_v59  ;;  %v3935_v20 = vld [vmem:[%s6996_s12 + $0x48] sm:$0xff] }
 0xad7   :  { %v4714_v10 = vpop.eup %4713  ;;  %v3966_v50 = vsub.f32 %v3934_v16, %v3950_v53 }
 0xad8   :  { %v3891_v7 = vadd.f32 1e-05, %v3859_v9  ;;  %v3860_v0 = vmax.f32 %v3844_v25, 0.0  ;;  %v3919_v14 = vmul.f32 %v4714_v10, %v3871_v58  ;;  %v3829_v41 = vmul.f32 %v6899_v24, %v6899_v24  ;;  %v3874_v58 = vld [vmem:[%s6995_s11 + $0x60] sm:$0xff] }
 0xad9   :  { %v4716_v55 = vpop.eup %4715  ;;  %4123 = vperm.xlu1 %4605, %v3965_v43   ;;  %4128 = vperm.xlu0 %4606, %v3966_v50   ;;  %v3781_v47 = vpop.xlane.xlu0 %3780  ;;  %v3938_v50 = vld [vmem:[%s6996_s12 + $0x60] sm:$0xff] }
 0xada   :  { %4721 = vrsqrt.f32 %v3891_v7  ;;  %v3892_v46 = vadd.f32 1e-05, %v3860_v0  ;;  %v3813_v45 = vmul.f32 0.00390625, %v3781_v47  ;;  %v3920_v8 = vmul.f32 %v4716_v55, %v3872_v61  ;;  %v3937_v61 = vld [vmem:[%s6996_s12 + $0x58] sm:$0xff]  ;;  %v3875_v0 = vld [vmem:[%s6995_s11 + $0x68] sm:$0xff] }
 0xadb   :  { %v3951_v42 = vmul.f32 %v3919_v14, %v6830_v63 }
 0xadc   :  { %4723 = vrsqrt.f32 %v3892_v46  ;;  %v3845_v22 = vsub.f32 %v3813_v45, %v3829_v41  ;;  %v3952_v31 = vmul.f32 %v3920_v8, %v6835_v36 }
 0xadd   :  { %4021 = vperm.xlu1 %4605, %v3919_v14   ;;  %4026 = vperm.xlu0 %4606, %v3920_v8   ;;  %v3967_v53 = vsub.f32 %v3935_v20, %v3951_v42  ;;  %v3940_v8 = vld [vmem:[%s6996_s12 + $0x70] sm:$0xff]  ;;  %v3939_v42 = vld [vmem:[%s6996_s12 + $0x68] sm:$0xff] }
 0xade   :  { %v3861_v16 = vmax.f32 %v3845_v22, 0.0  ;;  %v3968_v63 = vsub.f32 %v3936_v23, %v3952_v31  ;;  %v3877_v22 = vld [vmem:[%s6995_s11 + $0x78] sm:$0xff] }
 0xadf   :  { %v4718_v59 = vpop.eup %4717 }
 0xae0   :  { %v3893_v9 = vadd.f32 1e-05, %v3861_v16  ;;  %v3921_v25 = vmul.f32 %v4718_v59, %v3873_v19 }
 0xae1   :  { %v4720_v10 = vpop.eup %4719  ;;  %4133 = vperm.xlu1 %4605, %v3967_v53   ;;  %4138 = vperm.xlu0 %4606, %v3968_v63   ;;  %v3941_v63 = vld [vmem:[%s6996_s12 + $0x78] sm:$0xff] }
 0xae2   :  { %4725 = vrsqrt.f32 %v3893_v9  ;;  %v3922_v36 = vmul.f32 %v4720_v10, %v3874_v58  ;;  %v3953_v43 = vmul.f32 %v3921_v25, %v6852_v28  ;;  %v3876_v28 = vld [vmem:[%s6995_s11 + $0x70] sm:$0xff]  ;;  %s4754_s11 = smov [#allocation2]  }
 0xae3   :  { %s4300_s12 = sshll.u32 %s4754_s11, 4  ;;  %s4301_s12 = int_to_ptr.vmem [resolvable:$true] %s4300_s12 }
 0xae4   :  { %v3954_v7 = vmul.f32 %v3922_v36, %v6857_v38  ;;  %v3969_v41 = vsub.f32 %v3937_v61, %v3953_v43  ;;  %s4727_s30 = scalar_lea.vmem %s4301_s12, 4096  ;;  %p4732_p1 = scmp.lt.s32.totalorder %s4301_s12, %s4301_s12 }
 0xae5   :  { %4031 = vperm.xlu1 %4605, %v3921_v25   ;;  %4036 = vperm.xlu0 %4606, %v3922_v36   ;;  %p4728_p0 = scmp.ne.s32.totalorder %s4301_s12, %s4727_s30  ;;  %p4733_p2 = scmp.lt.s32.totalorder %s4727_s30, %s4727_s30 }
 0xae6   :  { %v3970_v14 = vsub.f32 %v3938_v50, %v3954_v7 }
 0xae7   :  { %v4722_v55 = vpop.eup %4721  ;;  %p4734_p3 = por %p4733_p2, %p4732_p1 }
 0xae8   :  { %v3923_v47 = vmul.f32 %v4722_v55, %v3875_v0 }
 0xae9   :  { %v4724_v46 = vpop.eup %4723  ;;  %4143 = vperm.xlu1 %4605, %v3969_v41   ;;  %4148 = vperm.xlu0 %4606, %v3970_v14   ;;  %p4735_p4 = pnand %p4734_p3, %p4728_p0 }
 0xaea   :  { %v3924_v45 = vmul.f32 %v4724_v46, %v3876_v28  ;;  %v3955_v38 = vmul.f32 %v3923_v47, %v6874_v34 }
 0xaec   :  { %v3956_v23 = vmul.f32 %v3924_v45, %v6879_v27  ;;  %v3971_v19 = vsub.f32 %v3939_v42, %v3955_v38 }
 0xaed   :  { %4041 = vperm.xlu1 %4605, %v3923_v47   ;;  %4046 = vperm.xlu0 %4606, %v3924_v45  }
 0xaee   :  { %v3972_v20 = vsub.f32 %v3940_v8, %v3956_v23 }
 0xaef   :  { %v4726_v31 = vpop.eup %4725 }
 0xaf0   :  { %v3925_v34 = vmul.f32 %v4726_v31, %v3877_v22 }
 0xaf1   :  { %4153 = vperm.xlu1 %4605, %v3971_v19   ;;  %4158 = vperm.xlu0 %4606, %v3972_v20  }
 0xaf2   :  { %v3957_v16 = vmul.f32 %v3925_v34, %v6899_v24 }
 0xaf4   :  { %v3973_v27 = vsub.f32 %v3941_v63, %v3957_v16 }
 0xaf5   :  { %4051 = vperm.xlu1 %4605, %v3925_v34  }
 0xaf9   :  { %4163 = vperm.xlu1 %4605, %v3973_v27  }
 0xb2e   :  { %v3977_v59 = vpop.permute.xlu1 %3976 }
 0xb2f   :  { %v4054_v58 = vmul.f32 %v3977_v59, %v6618_v13  ;;  %v4055_v9 = vmul.f32 %v3977_v59, %v6620_v11 }
 0xb33   :  { %v3982_v53 = vpop.permute.xlu0 %3981 }
 0xb34   :  { %v4056_v24 = vmul.f32 %v3982_v53, %v6628_v62  ;;  %v4057_v7 = vmul.f32 %v3982_v53, %v6630_v33 }
 0xb37   :  { %v4089_v25 = vpop.permute.xlu0 %4088 }
 0xb38   :  { %v3987_v10 = vpop.permute.xlu1 %3986  ;;  %v4166_v36 = vadd.f32 %v4089_v25, %v4054_v58  ;;  %v4167_v43 = vadd.f32 %v4089_v25, %v4055_v9 }
 0xb39   :  { %v4058_v0 = vmul.f32 %v3987_v10, %v6636_v29  ;;  %v4059_v14 = vmul.f32 %v3987_v10, %v6642_v60 }
 0xb3a   :  { %v4198_v50 = vmul.f32 0.2, %v4166_v36  ;;  %v4199_v61 = vmul.f32 0.2, %v4167_v43 }
 0xb3c   :  { %v4230_v55 = vmax.f32 %v4166_v36, %v4198_v50  ;;  %v4231_v41 = vmax.f32 %v4167_v43, %v4199_v61  ;;  %v4094_v28 = vpop.permute.xlu1 %4093  ;;  %v4099_v13 = vpop.permute.xlu0 %4098 }
 0xb3d   :  { %v4168_v47 = vadd.f32 %v4094_v28, %v4056_v24  ;;  %v4169_v11 = vadd.f32 %v4094_v28, %v4057_v7  ;;  %v4170_v46 = vadd.f32 %v4099_v13, %v4058_v0  ;;  %v4171_v45 = vadd.f32 %v4099_v13, %v4059_v14 }
 0xb3e   :  { %4262 = vst [vmem:[#allocation2] sm:$0xff] %v4230_v55  ;;  %4279 = vst [vmem:[#allocation2 + $0x80] sm:$0xff] %v4231_v41 }
 0xb3f   :  { %v4200_v38 = vmul.f32 0.2, %v4168_v47  ;;  %v4201_v8 = vmul.f32 0.2, %v4169_v11  ;;  %v4202_v42 = vmul.f32 0.2, %v4170_v46 }
 0xb40   :  { %v4203_v62 = vmul.f32 0.2, %v4171_v45  ;;  %v3992_v23 = vpop.permute.xlu1 %3991  ;;  %v3997_v33 = vpop.permute.xlu0 %3996 }
 0xb41   :  { %v4232_v22 = vmax.f32 %v4168_v47, %v4200_v38  ;;  %v4233_v29 = vmax.f32 %v4169_v11, %v4201_v8  ;;  %v4234_v20 = vmax.f32 %v4170_v46, %v4202_v42  ;;  %v4060_v31 = vmul.f32 %v3992_v23, %v6646_v40 }
 0xb42   :  { %v4235_v60 = vmax.f32 %v4171_v45, %v4203_v62  ;;  %v4061_v19 = vmul.f32 %v3992_v23, %v6650_v39  ;;  %v4062_v34 = vmul.f32 %v3997_v33, %v6654_v30  ;;  %v4063_v16 = vmul.f32 %v3997_v33, %v6662_v18 }
 0xb43   :  { %4263 = vst [vmem:[#allocation2 + $0x8] sm:$0xff] %v4232_v22  ;;  %4280 = vst [vmem:[#allocation2 + $0x88] sm:$0xff] %v4233_v29 }
 0xb44   :  { %4264 = vst [vmem:[#allocation2 + $0x10] sm:$0xff] %v4234_v20  ;;  %4281 = vst [vmem:[#allocation2 + $0x90] sm:$0xff] %v4235_v60  ;;  %v4104_v63 = vpop.permute.xlu1 %4103  ;;  %v4109_v27 = vpop.permute.xlu0 %4108 }
 0xb45   :  { %v4172_v59 = vadd.f32 %v4104_v63, %v4060_v31  ;;  %v4173_v53 = vadd.f32 %v4104_v63, %v4061_v19  ;;  %v4174_v58 = vadd.f32 %v4109_v27, %v4062_v34  ;;  %v4175_v9 = vadd.f32 %v4109_v27, %v4063_v16 }
 0xb47   :  { %v4204_v25 = vmul.f32 0.2, %v4172_v59  ;;  %v4205_v10 = vmul.f32 0.2, %v4173_v53  ;;  %v4206_v36 = vmul.f32 0.2, %v4174_v58 }
 0xb48   :  { %v4207_v43 = vmul.f32 0.2, %v4175_v9  ;;  %v4002_v50 = vpop.permute.xlu1 %4001  ;;  %v4007_v61 = vpop.permute.xlu0 %4006 }
 0xb49   :  { %v4236_v40 = vmax.f32 %v4172_v59, %v4204_v25  ;;  %v4237_v24 = vmax.f32 %v4173_v53, %v4205_v10  ;;  %v4238_v39 = vmax.f32 %v4174_v58, %v4206_v36  ;;  %v4064_v30 = vmul.f32 %v4002_v50, %v6668_v21 }
 0xb4a   :  { %v4239_v7 = vmax.f32 %v4175_v9, %v4207_v43  ;;  %v4065_v18 = vmul.f32 %v4002_v50, %v6670_v4  ;;  %v4066_v0 = vmul.f32 %v4007_v61, %v6674_v6  ;;  %v4067_v14 = vmul.f32 %v4007_v61, %v6682_v49 }
 0xb4b   :  { %4265 = vst [vmem:[#allocation2 + $0x18] sm:$0xff] %v4236_v40  ;;  %4282 = vst [vmem:[#allocation2 + $0x98] sm:$0xff] %v4237_v24 }
 0xb4c   :  { %4266 = vst [vmem:[#allocation2 + $0x20] sm:$0xff] %v4238_v39  ;;  %4283 = vst [vmem:[#allocation2 + $0xa0] sm:$0xff] %v4239_v7  ;;  %v4114_v55 = vpop.permute.xlu1 %4113  ;;  %v4119_v41 = vpop.permute.xlu0 %4118 }
 0xb4d   :  { %v4176_v28 = vadd.f32 %v4114_v55, %v4064_v30  ;;  %v4177_v13 = vadd.f32 %v4114_v55, %v4065_v18  ;;  %v4178_v47 = vadd.f32 %v4119_v41, %v4066_v0  ;;  %v4179_v11 = vadd.f32 %v4119_v41, %v4067_v14 }
 0xb4f   :  { %v4208_v46 = vmul.f32 0.2, %v4176_v28  ;;  %v4209_v45 = vmul.f32 0.2, %v4177_v13  ;;  %v4210_v38 = vmul.f32 0.2, %v4178_v47 }
 0xb50   :  { %v4211_v8 = vmul.f32 0.2, %v4179_v11  ;;  %v4012_v42 = vpop.permute.xlu1 %4011  ;;  %v4017_v62 = vpop.permute.xlu0 %4016 }
 0xb51   :  { %v4240_v21 = vmax.f32 %v4176_v28, %v4208_v46  ;;  %v4241_v23 = vmax.f32 %v4177_v13, %v4209_v45  ;;  %v4242_v4 = vmax.f32 %v4178_v47, %v4210_v38  ;;  %v4068_v6 = vmul.f32 %v4012_v42, %v6688_v35 }
 0xb52   :  { %v4243_v33 = vmax.f32 %v4179_v11, %v4211_v8  ;;  %v4069_v49 = vmul.f32 %v4012_v42, %v6690_v32  ;;  %v4070_v22 = vmul.f32 %v4017_v62, %v6694_v12  ;;  %v4071_v29 = vmul.f32 %v4017_v62, %v6702_v3 }
 0xb53   :  { %4267 = vst [vmem:[#allocation2 + $0x28] sm:$0xff] %v4240_v21  ;;  %4284 = vst [vmem:[#allocation2 + $0xa8] sm:$0xff] %v4241_v23 }
 0xb54   :  { %4268 = vst [vmem:[#allocation2 + $0x30] sm:$0xff] %v4242_v4  ;;  %4285 = vst [vmem:[#allocation2 + $0xb0] sm:$0xff] %v4243_v33  ;;  %v4124_v20 = vpop.permute.xlu1 %4123  ;;  %v4129_v60 = vpop.permute.xlu0 %4128 }
 0xb55   :  { %v4180_v31 = vadd.f32 %v4124_v20, %v4068_v6  ;;  %v4181_v19 = vadd.f32 %v4124_v20, %v4069_v49  ;;  %v4182_v34 = vadd.f32 %v4129_v60, %v4070_v22  ;;  %v4183_v16 = vadd.f32 %v4129_v60, %v4071_v29 }
 0xb57   :  { %v4212_v63 = vmul.f32 0.2, %v4180_v31  ;;  %v4213_v27 = vmul.f32 0.2, %v4181_v19  ;;  %v4214_v59 = vmul.f32 0.2, %v4182_v34 }
 0xb58   :  { %v4215_v53 = vmul.f32 0.2, %v4183_v16  ;;  %v4022_v58 = vpop.permute.xlu1 %4021  ;;  %v4027_v9 = vpop.permute.xlu0 %4026 }
 0xb59   :  { %v4244_v35 = vmax.f32 %v4180_v31, %v4212_v63  ;;  %v4245_v25 = vmax.f32 %v4181_v19, %v4213_v27  ;;  %v4246_v32 = vmax.f32 %v4182_v34, %v4214_v59  ;;  %v4072_v12 = vmul.f32 %v4022_v58, %v6708_v1 }
 0xb5a   :  { %v4247_v10 = vmax.f32 %v4183_v16, %v4215_v53  ;;  %v4073_v3 = vmul.f32 %v4022_v58, %v6710_v5  ;;  %v4074_v36 = vmul.f32 %v4027_v9, %v6714_v54  ;;  %v4075_v43 = vmul.f32 %v4027_v9, %v6722_v51 }
 0xb5b   :  { %4269 = vst [vmem:[#allocation2 + $0x38] sm:$0xff] %v4244_v35  ;;  %4286 = vst [vmem:[#allocation2 + $0xb8] sm:$0xff] %v4245_v25 }
 0xb5c   :  { %4270 = vst [vmem:[#allocation2 + $0x40] sm:$0xff] %v4246_v32  ;;  %4287 = vst [vmem:[#allocation2 + $0xc0] sm:$0xff] %v4247_v10  ;;  %v4134_v50 = vpop.permute.xlu1 %4133  ;;  %v4139_v61 = vpop.permute.xlu0 %4138 }
 0xb5d   :  { %v4184_v40 = vadd.f32 %v4134_v50, %v4072_v12  ;;  %v4185_v24 = vadd.f32 %v4134_v50, %v4073_v3  ;;  %v4186_v39 = vadd.f32 %v4139_v61, %v4074_v36  ;;  %v4187_v7 = vadd.f32 %v4139_v61, %v4075_v43 }
 0xb5f   :  { %v4216_v30 = vmul.f32 0.2, %v4184_v40  ;;  %v4217_v18 = vmul.f32 0.2, %v4185_v24  ;;  %v4218_v0 = vmul.f32 0.2, %v4186_v39 }
 0xb60   :  { %v4219_v14 = vmul.f32 0.2, %v4187_v7  ;;  %v4032_v55 = vpop.permute.xlu1 %4031  ;;  %v4037_v41 = vpop.permute.xlu0 %4036 }
 0xb61   :  { %v4248_v1 = vmax.f32 %v4184_v40, %v4216_v30  ;;  %v4249_v28 = vmax.f32 %v4185_v24, %v4217_v18  ;;  %v4250_v5 = vmax.f32 %v4186_v39, %v4218_v0  ;;  %v4076_v54 = vmul.f32 %v4032_v55, %v6728_v26 }
 0xb62   :  { %v4251_v13 = vmax.f32 %v4187_v7, %v4219_v14  ;;  %v4077_v51 = vmul.f32 %v4032_v55, %v6730_v56  ;;  %v4078_v47 = vmul.f32 %v4037_v41, %v6734_v44  ;;  %v4079_v11 = vmul.f32 %v4037_v41, %v6742_v17 }
 0xb63   :  { %4271 = vst [vmem:[#allocation2 + $0x48] sm:$0xff] %v4248_v1  ;;  %4288 = vst [vmem:[#allocation2 + $0xc8] sm:$0xff] %v4249_v28 }
 0xb64   :  { %4272 = vst [vmem:[#allocation2 + $0x50] sm:$0xff] %v4250_v5  ;;  %4289 = vst [vmem:[#allocation2 + $0xd0] sm:$0xff] %v4251_v13  ;;  %v4144_v46 = vpop.permute.xlu1 %4143  ;;  %v4149_v45 = vpop.permute.xlu0 %4148 }
 0xb65   :  { %v4188_v38 = vadd.f32 %v4144_v46, %v4076_v54  ;;  %v4189_v8 = vadd.f32 %v4144_v46, %v4077_v51  ;;  %v4190_v42 = vadd.f32 %v4149_v45, %v4078_v47  ;;  %v4191_v62 = vadd.f32 %v4149_v45, %v4079_v11 }
 0xb67   :  { %v4220_v21 = vmul.f32 0.2, %v4188_v38  ;;  %v4221_v23 = vmul.f32 0.2, %v4189_v8  ;;  %v4222_v4 = vmul.f32 0.2, %v4190_v42 }
 0xb68   :  { %v4223_v33 = vmul.f32 0.2, %v4191_v62  ;;  %v4042_v6 = vpop.permute.xlu1 %4041  ;;  %v4047_v49 = vpop.permute.xlu0 %4046 }
 0xb69   :  { %v4252_v26 = vmax.f32 %v4188_v38, %v4220_v21  ;;  %v4253_v22 = vmax.f32 %v4189_v8, %v4221_v23  ;;  %v4254_v56 = vmax.f32 %v4190_v42, %v4222_v4  ;;  %v4080_v44 = vmul.f32 %v4042_v6, %v6748_v48 }
 0xb6a   :  { %v4255_v29 = vmax.f32 %v4191_v62, %v4223_v33  ;;  %v4081_v17 = vmul.f32 %v4042_v6, %v6750_v15  ;;  %v4082_v20 = vmul.f32 %v4047_v49, %v6754_v37  ;;  %v4083_v60 = vmul.f32 %v4047_v49, %v6762_v57 }
 0xb6b   :  { %4273 = vst [vmem:[#allocation2 + $0x58] sm:$0xff] %v4252_v26  ;;  %4290 = vst [vmem:[#allocation2 + $0xd8] sm:$0xff] %v4253_v22 }
 0xb6c   :  { %4274 = vst [vmem:[#allocation2 + $0x60] sm:$0xff] %v4254_v56  ;;  %4291 = vst [vmem:[#allocation2 + $0xe0] sm:$0xff] %v4255_v29  ;;  %v4154_v31 = vpop.permute.xlu1 %4153  ;;  %v4159_v19 = vpop.permute.xlu0 %4158 }
 0xb6d   :  { %v4192_v34 = vadd.f32 %v4154_v31, %v4080_v44  ;;  %v4193_v16 = vadd.f32 %v4154_v31, %v4081_v17  ;;  %v4194_v63 = vadd.f32 %v4159_v19, %v4082_v20  ;;  %v4195_v27 = vadd.f32 %v4159_v19, %v4083_v60 }
 0xb6f   :  { %v4224_v59 = vmul.f32 0.2, %v4192_v34  ;;  %v4225_v53 = vmul.f32 0.2, %v4193_v16  ;;  %v4226_v58 = vmul.f32 0.2, %v4194_v63 }
 0xb70   :  { %v4227_v9 = vmul.f32 0.2, %v4195_v27  ;;  %v4052_v35 = vpop.permute.xlu1 %4051 }
 0xb71   :  { %v4256_v25 = vmax.f32 %v4192_v34, %v4224_v59  ;;  %v4257_v48 = vmax.f32 %v4193_v16, %v4225_v53  ;;  %v4258_v32 = vmax.f32 %v4194_v63, %v4226_v58  ;;  %v4084_v37 = vmul.f32 %v4052_v35, %v6768_v2 }
 0xb72   :  { %v4259_v15 = vmax.f32 %v4195_v27, %v4227_v9  ;;  %v4085_v57 = vmul.f32 %v4052_v35, %v6770_v52 }
 0xb73   :  { %4275 = vst [vmem:[#allocation2 + $0x68] sm:$0xff] %v4256_v25  ;;  %4292 = vst [vmem:[#allocation2 + $0xe8] sm:$0xff] %v4257_v48 }
 0xb74   :  { %4276 = vst [vmem:[#allocation2 + $0x70] sm:$0xff] %v4258_v32  ;;  %4293 = vst [vmem:[#allocation2 + $0xf0] sm:$0xff] %v4259_v15  ;;  %v4164_v10 = vpop.permute.xlu1 %4163 }
 0xb75   :  { %v4196_v12 = vadd.f32 %v4164_v10, %v4084_v37  ;;  %v4197_v3 = vadd.f32 %v4164_v10, %v4085_v57 }
 0xb77   :  { %v4228_v36 = vmul.f32 0.2, %v4196_v12  ;;  %v4229_v43 = vmul.f32 0.2, %v4197_v3 }
 0xb79   :  { %v4260_v50 = vmax.f32 %v4196_v12, %v4228_v36  ;;  %v4261_v61 = vmax.f32 %v4197_v3, %v4229_v43 }
 0xb7b   :  { %4277 = vst [vmem:[#allocation2 + $0x78] sm:$0xff] %v4260_v50  ;;  %4294 = vst [vmem:[#allocation2 + $0xf8] sm:$0xff] %v4261_v61 }
 0xb7c   :  { %4738 = shalt.err (!%p4735_p4)
}
 0xb7d   :  { %s4755_s14 = smov 128   ;;  %s4756_s1 = smov 8  }
 0xb7e   :  { %4306 = dma.vmem_to_hbm [thread:$0]  %s4301_s12, 4096, %s6997_s13, [#allocation3], %s4755_s14, %s4755_s14, %s4756_s1  }
 0xb7f   :  { %4747 = dma.done.wait [#allocation3], 4096  }
 0xb80   :  { %4748 = vsyncadd [#allocation3], 4294963200 }
 0xb81   :  { %4310 = vsyncpa [#allocation3], 1 }

</bundles_post_ra>
